<compile_context>
chip_gen: v6e
topology: v6e:2x2x1
jax: 0.10.0
libtpu: 0.0.40
codegen_flags: <defaults>
</compile_context>

<pallas_src>
import math

import jax
import jax.numpy as jnp
import numpy as np
from jax.experimental import pallas as pl
from jax.experimental.pallas import tpu as pltpu

OMEGA0 = 30.0


# ------------------------------ Pallas kernels ------------------------------ #

def fourier_fold_kernel(t_ref, bflat_ref, woac_ref, boac_ref,
                        wodc_ref, bodc_ref, r_ref, weff_ref, beff_ref):
    """Fold the per-t sin/cos table into the Siren output layer (runs once)."""
    # s_flat[0, m*C + c] = sin(2*pi*t*B[m, c])      for m <  M
    #                    = cos(2*pi*t*B[m - M, c])  for m >= M
    # (2*pi is pre-folded into bflat at prep time.)
    t = t_ref[0]
    tb = t * bflat_ref[...]                                          # (1, M*C)
    s_flat = jnp.concatenate([jnp.sin(tb), jnp.cos(tb)], axis=-1)    # (1, 2MC)

    # R[m*C + c, c] = 1/(2M)  =>  (w * s) @ R == mean over the 2M AC rows.
    weff_ref[...] = (jnp.dot(woac_ref[...] * s_flat, r_ref[...],
                             preferred_element_type=jnp.float32)
                     + wodc_ref[...])                                # (H, C)
    beff_ref[...] = (jnp.dot(boac_ref[...] * s_flat, r_ref[...],
                             preferred_element_type=jnp.float32)
                     + bodc_ref[...])                                # (1, C)


def siren_head_kernel(x_ref, w0_ref, b0_ref, w1_ref, b1_ref,
                      w2_ref, b2_ref, w3_ref, b3_ref,
                      weff_ref, beff_ref, out_ref):
    """Siren MLP (bf16 MXU matmuls, f32 accumulation) -> folded head."""
    # OMEGA0 is pre-folded into w0..w3 / b0..b3 (weights stored bf16).
    h = jnp.sin(jnp.dot(x_ref[...].astype(jnp.bfloat16), w0_ref[...],
                        preferred_element_type=jnp.float32) + b0_ref[...])
    h = jnp.sin(jnp.dot(h.astype(jnp.bfloat16), w1_ref[...],
                        preferred_element_type=jnp.float32) + b1_ref[...])
    h = jnp.sin(jnp.dot(h.astype(jnp.bfloat16), w2_ref[...],
                        preferred_element_type=jnp.float32) + b2_ref[...])
    h = jnp.sin(jnp.dot(h.astype(jnp.bfloat16), w3_ref[...],
                        preferred_element_type=jnp.float32) + b3_ref[...])
    w_eff = weff_ref[...].astype(jnp.bfloat16)                       # (H, C)
    out_ref[...] = (jnp.dot(h.astype(jnp.bfloat16), w_eff,
                            preferred_element_type=jnp.float32)
                    + beff_ref[...])


# -------------------------------- Wrappers ---------------------------------- #

def prepare_params(siren_params, B_mat, mapping_size, output_channels):
    """One-time repack: fold OMEGA0/2*pi, split AC/DC head, bf16 weights, R."""
    (w0, b0), (w1, b1), (w2, b2), (w3, b3), (wo, bo) = siren_params
    M, C = mapping_size, output_channels
    two_mc = 2 * M * C

    # Fold OMEGA0 into the four sin-activated layers; store matmul weights bf16.
    mlp = []
    for w, b in ((w0, b0), (w1, b1), (w2, b2), (w3, b3)):
        mlp.append((OMEGA0 * w).astype(jnp.bfloat16))
        mlp.append((OMEGA0 * b).astype(jnp.float32))
    mlp = tuple(mlp)

    wo_ac, wo_dc = wo[:, :two_mc], wo[:, two_mc:]        # (H, 2MC), (H, C)
    bo_ac, bo_dc = bo[:, :two_mc], bo[:, two_mc:]        # (1, 2MC), (1, C)
    b_flat = (2.0 * jnp.pi) * B_mat.reshape(1, M * C)    # 2*pi pre-folded
    j = jnp.arange(two_mc, dtype=jnp.int32)[:, None]
    c = jnp.arange(C, dtype=jnp.int32)[None, :]
    r_mat = jnp.where(j % C == c, 1.0 / (2 * M), 0.0).astype(jnp.float32)
    fold = (wo_ac, bo_ac, wo_dc, bo_dc, b_flat, r_mat)
    return mlp, fold


def _fold_t(t_arr, fold_params):
    """Tiny pallas_call: compute W_eff (H,C) and b_eff (1,C) once per call."""
    wo_ac, bo_ac, wo_dc, bo_dc, b_flat, r_mat = fold_params
    H = wo_ac.shape[0]
    C = wo_dc.shape[1]
    inputs = (b_flat, wo_ac, bo_ac, wo_dc, bo_dc, r_mat)
    in_specs = ([pl.BlockSpec(memory_space=pltpu.MemorySpace.SMEM)]     # t
                + [pl.BlockSpec(a.shape, lambda i: (0, 0)) for a in inputs])
    out_specs = (pl.BlockSpec((H, C), lambda i: (0, 0)),
                 pl.BlockSpec((1, C), lambda i: (0, 0)))
    return pl.pallas_call(
        fourier_fold_kernel,
        out_shape=(jax.ShapeDtypeStruct((H, C), jnp.float32),
                   jax.ShapeDtypeStruct((1, C), jnp.float32)),
        grid=(1,),
        in_specs=in_specs,
        out_specs=out_specs,
    )(t_arr, *inputs)


def _pick_tile(batch):
    # >= 2 grid steps whenever possible (v7x shards batch across its 2 TCs),
    # large tiles (amortize ~0.35 us/step on single-TC v5e/v6e), cap 1024,
    # multiple of 8 (sublane rule).
    half = pl.cdiv(batch, 2)
    tb = 8 * pl.cdiv(half, 8)
    return int(max(8, min(1024, tb)))


def fourier_features_forward(x, t_arr, mlp_params, fold_params, *,
                             block_batch=None):
    """Full FourierFeatures.forward (non-testing branch) in two pallas_calls."""
    # --- per-t fold (hoisted out of the batch grid) -------------------------
    w_eff, b_eff = _fold_t(t_arr, fold_params)

    # --- Siren MLP + head over a batch grid ----------------------------------
    batch, cin = x.shape
    w0, b0, w1, b1, w2, b2, w3, b3 = mlp_params
    hidden = w0.shape[1]
    C = w_eff.shape[1]

    tb = _pick_tile(batch) if block_batch is None else int(block_batch)
    n_steps = pl.cdiv(batch, tb)
    padded = tb * n_steps
    if padded != batch:                      # pad instead of collapsing grid
        x = jnp.pad(x, ((0, padded - batch), (0, 0)))
    grid = (n_steps,)

    resident = (w0, b0, w1, b1, w2, b2, w3, b3, w_eff, b_eff)
    in_specs = ([pl.BlockSpec((tb, cin), lambda i: (i, 0))]            # x tile
                + [pl.BlockSpec(w.shape, lambda i: (0, 0))             # resident
                   for w in resident])
    out_specs = pl.BlockSpec((tb, C), lambda i: (i, 0))

    flops = 2 * padded * (cin * hidden + 3 * hidden * hidden + hidden * C)
    transcendentals = 4 * padded * hidden
    bytes_accessed = (x.size * 4 + padded * C * 4
                      + sum(int(w.size) * w.dtype.itemsize for w in resident))

    out = pl.pallas_call(
        siren_head_kernel,
        out_shape=jax.ShapeDtypeStruct((padded, C), jnp.float32),
        grid=grid,
        in_specs=in_specs,
        out_specs=out_specs,
        compiler_params=pltpu.CompilerParams(
            dimension_semantics=("parallel",)),
        cost_estimate=pl.CostEstimate(flops=int(flops),
                                      transcendentals=int(transcendentals),
                                      bytes_accessed=int(bytes_accessed)),
    )(x, *resident)
    return out[:batch] if padded != batch else out


# --------------------------- Deterministic init ----------------------------- #

def init_siren_params(key, in_features, hidden, n_hidden_layers, out_features):
    """Standard SIREN init (first layer U(-1/in, 1/in); others sqrt(6/in)/w0)."""
    params = []
    dims = [in_features] + [hidden] * (n_hidden_layers + 1) + [out_features]
    keys = jax.random.split(key, len(dims) - 1)
    for i, (fan_in, fan_out) in enumerate(zip(dims[:-1], dims[1:])):
        if i == 0:
            bound = 1.0 / fan_in
        else:
            bound = math.sqrt(6.0 / fan_in) / OMEGA0
        w = jax.random.uniform(keys[i], (fan_in, fan_out), jnp.float32,
                               -bound, bound)
        b = jax.random.uniform(jax.random.fold_in(keys[i], 1), (1, fan_out),
                               jnp.float32, -bound, bound)
        params.append((w, b))
    return params


# ----------------------------- JAX reference -------------------------------- #

def reference_forward(x, t, siren_params, B_mat, mapping_size, output_channels):
    h = x
    for i, (w, b) in enumerate(siren_params):
        h = h @ w + b
        if i < len(siren_params) - 1:
            h = jnp.sin(OMEGA0 * h)
    coeffs = h.reshape(x.shape[0], 2 * mapping_size + 1, output_channels)
    dc = coeffs[:, -1:, :]
    ac = coeffs[:, :-1, :]
    tb = 2.0 * jnp.pi * t * B_mat                                      # (M, C)
    tsins = jnp.concatenate([jnp.sin(tb), jnp.cos(tb)], axis=0)[None]  # (1,2M,C)
    series = ac * tsins
    val = jnp.mean(series, axis=1, keepdims=True) + dc
    return val[:, 0, :]


# ---------------------------------- Main ------------------------------------ #

if __name__ == "__main__":
    batch = 8
    input_channels = 4
    output_channels = 8
    mapping_size = 64
    hidden = 128           # hard-coded in the PyTorch module: Siren(in, 128, 3, ...)
    scale = 1.5
    t = 0.37

    key = jax.random.PRNGKey(0)
    kx, kB, ksiren = jax.random.split(key, 3)

    x = jax.random.uniform(kx, (batch, input_channels), jnp.float32, -1.0, 1.0)
    # B ~ randn(1, M, C) * scale  (stored here as (M, C))
    B_mat = jax.random.normal(kB, (mapping_size, output_channels),
                              jnp.float32) * scale
    siren_params = init_siren_params(
        ksiren, input_channels, hidden, 3,
        (2 * mapping_size + 1) * output_channels)

    mlp_params, fold_params = prepare_params(
        siren_params, B_mat, mapping_size, output_channels)
    t_arr = jnp.asarray([t], dtype=jnp.float32)     # device scalar, built once

    fwd = jax.jit(fourier_features_forward, static_argnames=("block_batch",))
    out = jax.block_until_ready(fwd(x, t_arr, mlp_params, fold_params))

    ref = reference_forward(x, t, siren_params, B_mat,
                            mapping_size, output_channels)
    np.testing.assert_allclose(np.asarray(out), np.asarray(ref),
                               rtol=1e-2, atol=1e-2)
    assert out.shape == (batch, output_channels)

    print("KERNEL_OK")
</pallas_src>

<mosaic_0001>
module attributes {stable_mosaic.version = 11 : i64} {
  func.func @fourier_fold_kernel(%arg0: i32, %arg1: memref<1xf32, #tpu.memory_space<smem>>, %arg2: memref<1x512xf32, #tpu.memory_space<vmem>>, %arg3: memref<128x1024xf32, #tpu.memory_space<vmem>>, %arg4: memref<1x1024xf32, #tpu.memory_space<vmem>>, %arg5: memref<128x8xf32, #tpu.memory_space<vmem>>, %arg6: memref<1x8xf32, #tpu.memory_space<vmem>>, %arg7: memref<1024x8xf32, #tpu.memory_space<vmem>>, %arg8: memref<128x8xf32, #tpu.memory_space<vmem>>, %arg9: memref<1x8xf32, #tpu.memory_space<vmem>>) attributes {dimension_semantics = [#tpu.dimension_semantics<arbitrary>], iteration_bounds = array<i64: 1>, scalar_prefetch = 0 : i64, scratch_operands = 0 : i64, tpu.core_type = #tpu.core_type<tc>, window_params = [{transform_indices = @transform_0, window_bounds = array<i64: 1>}, {pipeline_mode = #tpu.pipeline_mode<synchronous>, transform_indices = @transform_1, window_bounds = array<i64: 1, 512>}, {pipeline_mode = #tpu.pipeline_mode<synchronous>, transform_indices = @transform_2, window_bounds = array<i64: 128, 1024>}, {pipeline_mode = #tpu.pipeline_mode<synchronous>, transform_indices = @transform_3, window_bounds = array<i64: 1, 1024>}, {pipeline_mode = #tpu.pipeline_mode<synchronous>, transform_indices = @transform_4, window_bounds = array<i64: 128, 8>}, {pipeline_mode = #tpu.pipeline_mode<synchronous>, transform_indices = @transform_5, window_bounds = array<i64: 1, 8>}, {pipeline_mode = #tpu.pipeline_mode<synchronous>, transform_indices = @transform_6, window_bounds = array<i64: 1024, 8>}, {pipeline_mode = #tpu.pipeline_mode<synchronous>, transform_indices = @transform_7, window_bounds = array<i64: 128, 8>}, {pipeline_mode = #tpu.pipeline_mode<synchronous>, transform_indices = @transform_8, window_bounds = array<i64: 1, 8>}]} {
    %c0 = arith.constant 0 : index
    %0 = memref.load %arg1[%c0] : memref<1xf32, #tpu.memory_space<smem>>
    %c0_0 = arith.constant 0 : index
    %c0_1 = arith.constant 0 : index
    %1 = vector.load %arg2[%c0_0, %c0_1] : memref<1x512xf32, #tpu.memory_space<vmem>>, vector<1x512xf32>
    %2 = vector.broadcast %0 : f32 to vector<1x512xf32>
    %3 = arith.mulf %2, %1 : vector<1x512xf32>
    %4 = math.sin %3 : vector<1x512xf32>
    %5 = math.cos %3 : vector<1x512xf32>
    %6 = tpu.concatenate %4, %5 in 1 : vector<1x512xf32>, vector<1x512xf32> -> vector<1x1024xf32>
    %c0_2 = arith.constant 0 : index
    %c0_3 = arith.constant 0 : index
    %7 = vector.load %arg3[%c0_2, %c0_3] : memref<128x1024xf32, #tpu.memory_space<vmem>>, vector<128x1024xf32>
    %8 = vector.broadcast %6 : vector<1x1024xf32> to vector<128x1024xf32>
    %9 = arith.mulf %7, %8 : vector<128x1024xf32>
    %c0_4 = arith.constant 0 : index
    %c0_5 = arith.constant 0 : index
    %10 = vector.load %arg7[%c0_4, %c0_5] : memref<1024x8xf32, #tpu.memory_space<vmem>>, vector<1024x8xf32>
    %cst = arith.constant dense<0.000000e+00> : vector<128x8xf32>
    %11 = tpu.matmul %9, %10, %cst {dimension_numbers = #tpu.dot_dimension_numbers<[1], [0], [0], [1], [0, 0, 1, 1], [], []>} : vector<128x1024xf32>, vector<1024x8xf32>, vector<128x8xf32> -> vector<128x8xf32>
    %c0_6 = arith.constant 0 : index
    %c0_7 = arith.constant 0 : index
    %12 = vector.load %arg5[%c0_6, %c0_7] : memref<128x8xf32, #tpu.memory_space<vmem>>, vector<128x8xf32>
    %13 = arith.addf %11, %12 : vector<128x8xf32>
    %c0_8 = arith.constant 0 : index
    %c0_9 = arith.constant 0 : index
    %14 = vector.load %arg8[%c0_8, %c0_9] : memref<128x8xf32, #tpu.memory_space<vmem>>, vector<128x8xf32>
    tpu.vector_store %arg8[%c0_8, %c0_9], %13 {strides = array<i32>} : memref<128x8xf32, #tpu.memory_space<vmem>>, vector<128x8xf32>,
    %c0_10 = arith.constant 0 : index
    %c0_11 = arith.constant 0 : index
    %15 = vector.load %arg4[%c0_10, %c0_11] : memref<1x1024xf32, #tpu.memory_space<vmem>>, vector<1x1024xf32>
    %16 = arith.mulf %15, %6 : vector<1x1024xf32>
    %c0_12 = arith.constant 0 : index
    %c0_13 = arith.constant 0 : index
    %17 = vector.load %arg7[%c0_12, %c0_13] : memref<1024x8xf32, #tpu.memory_space<vmem>>, vector<1024x8xf32>
    %cst_14 = arith.constant dense<0.000000e+00> : vector<1x8xf32>
    %18 = tpu.matmul %16, %17, %cst_14 {dimension_numbers = #tpu.dot_dimension_numbers<[1], [0], [0], [1], [0, 0, 1, 1], [], []>} : vector<1x1024xf32>, vector<1024x8xf32>, vector<1x8xf32> -> vector<1x8xf32>
    %c0_15 = arith.constant 0 : index
    %c0_16 = arith.constant 0 : index
    %19 = vector.load %arg6[%c0_15, %c0_16] : memref<1x8xf32, #tpu.memory_space<vmem>>, vector<1x8xf32>
    %20 = arith.addf %18, %19 : vector<1x8xf32>
    %c0_17 = arith.constant 0 : index
    %c0_18 = arith.constant 0 : index
    %21 = vector.load %arg9[%c0_17, %c0_18] : memref<1x8xf32, #tpu.memory_space<vmem>>, vector<1x8xf32>
    tpu.vector_store %arg9[%c0_17, %c0_18], %20 {strides = array<i32>} : memref<1x8xf32, #tpu.memory_space<vmem>>, vector<1x8xf32>,
    return
  }
  func.func @transform_0(%arg0: i32) -> i32 {
    %c0_i32 = arith.constant 0 : i32
    %c0_i32_0 = arith.constant 0 : i32
    return %c0_i32 : i32
  }
  func.func @transform_1(%arg0: i32) -> (i32, i32) {
    %c0_i32 = arith.constant 0 : i32
    %c0_i32_0 = arith.constant 0 : i32
    %c0_i32_1 = arith.constant 0 : i32
    return %c0_i32, %c0_i32_0 : i32, i32
  }
  func.func @transform_2(%arg0: i32) -> (i32, i32) {
    %c0_i32 = arith.constant 0 : i32
    %c0_i32_0 = arith.constant 0 : i32
    %c0_i32_1 = arith.constant 0 : i32
    return %c0_i32, %c0_i32_0 : i32, i32
  }
  func.func @transform_3(%arg0: i32) -> (i32, i32) {
    %c0_i32 = arith.constant 0 : i32
    %c0_i32_0 = arith.constant 0 : i32
    %c0_i32_1 = arith.constant 0 : i32
    return %c0_i32, %c0_i32_0 : i32, i32
  }
  func.func @transform_4(%arg0: i32) -> (i32, i32) {
    %c0_i32 = arith.constant 0 : i32
    %c0_i32_0 = arith.constant 0 : i32
    %c0_i32_1 = arith.constant 0 : i32
    return %c0_i32, %c0_i32_0 : i32, i32
  }
  func.func @transform_5(%arg0: i32) -> (i32, i32) {
    %c0_i32 = arith.constant 0 : i32
    %c0_i32_0 = arith.constant 0 : i32
    %c0_i32_1 = arith.constant 0 : i32
    return %c0_i32, %c0_i32_0 : i32, i32
  }
  func.func @transform_6(%arg0: i32) -> (i32, i32) {
    %c0_i32 = arith.constant 0 : i32
    %c0_i32_0 = arith.constant 0 : i32
    %c0_i32_1 = arith.constant 0 : i32
    return %c0_i32, %c0_i32_0 : i32, i32
  }
  func.func @transform_7(%arg0: i32) -> (i32, i32) {
    %c0_i32 = arith.constant 0 : i32
    %c0_i32_0 = arith.constant 0 : i32
    %c0_i32_1 = arith.constant 0 : i32
    return %c0_i32, %c0_i32_0 : i32, i32
  }
  func.func @transform_8(%arg0: i32) -> (i32, i32) {
    %c0_i32 = arith.constant 0 : i32
    %c0_i32_0 = arith.constant 0 : i32
    %c0_i32_1 = arith.constant 0 : i32
    return %c0_i32, %c0_i32_0 : i32, i32
  }
}

module attributes {stable_mosaic.version = 11 : i64} {
  func.func @siren_head_kernel(%arg0: i32, %arg1: memref<8x4xf32, #tpu.memory_space<vmem>>, %arg2: memref<4x128xbf16, #tpu.memory_space<vmem>>, %arg3: memref<1x128xf32, #tpu.memory_space<vmem>>, %arg4: memref<128x128xbf16, #tpu.memory_space<vmem>>, %arg5: memref<1x128xf32, #tpu.memory_space<vmem>>, %arg6: memref<128x128xbf16, #tpu.memory_space<vmem>>, %arg7: memref<1x128xf32, #tpu.memory_space<vmem>>, %arg8: memref<128x128xbf16, #tpu.memory_space<vmem>>, %arg9: memref<1x128xf32, #tpu.memory_space<vmem>>, %arg10: memref<128x8xf32, #tpu.memory_space<vmem>>, %arg11: memref<1x8xf32, #tpu.memory_space<vmem>>, %arg12: memref<8x8xf32, #tpu.memory_space<vmem>>) attributes {dimension_semantics = [#tpu.dimension_semantics<parallel>], iteration_bounds = array<i64: 1>, scalar_prefetch = 0 : i64, scratch_operands = 0 : i64, tpu.core_type = #tpu.core_type<tc>, window_params = [{transform_indices = @transform_0, window_bounds = array<i64: 8, 4>}, {pipeline_mode = #tpu.pipeline_mode<synchronous>, transform_indices = @transform_1, window_bounds = array<i64: 4, 128>}, {pipeline_mode = #tpu.pipeline_mode<synchronous>, transform_indices = @transform_2, window_bounds = array<i64: 1, 128>}, {pipeline_mode = #tpu.pipeline_mode<synchronous>, transform_indices = @transform_3, window_bounds = array<i64: 128, 128>}, {pipeline_mode = #tpu.pipeline_mode<synchronous>, transform_indices = @transform_4, window_bounds = array<i64: 1, 128>}, {pipeline_mode = #tpu.pipeline_mode<synchronous>, transform_indices = @transform_5, window_bounds = array<i64: 128, 128>}, {pipeline_mode = #tpu.pipeline_mode<synchronous>, transform_indices = @transform_6, window_bounds = array<i64: 1, 128>}, {pipeline_mode = #tpu.pipeline_mode<synchronous>, transform_indices = @transform_7, window_bounds = array<i64: 128, 128>}, {pipeline_mode = #tpu.pipeline_mode<synchronous>, transform_indices = @transform_8, window_bounds = array<i64: 1, 128>}, {pipeline_mode = #tpu.pipeline_mode<synchronous>, transform_indices = @transform_9, window_bounds = array<i64: 128, 8>}, {pipeline_mode = #tpu.pipeline_mode<synchronous>, transform_indices = @transform_10, window_bounds = array<i64: 1, 8>}, {transform_indices = @transform_11, window_bounds = array<i64: 8, 8>}]} {
    %c0 = arith.constant 0 : index
    %c0_0 = arith.constant 0 : index
    %0 = vector.load %arg1[%c0, %c0_0] : memref<8x4xf32, #tpu.memory_space<vmem>>, vector<8x4xf32>
    %1 = arith.truncf %0 : vector<8x4xf32> to vector<8x4xbf16>
    %c0_1 = arith.constant 0 : index
    %c0_2 = arith.constant 0 : index
    %2 = vector.load %arg2[%c0_1, %c0_2] : memref<4x128xbf16, #tpu.memory_space<vmem>>, vector<4x128xbf16>
    %cst = arith.constant dense<0.000000e+00> : vector<8x128xf32>
    %3 = tpu.matmul %1, %2, %cst {dimension_numbers = #tpu.dot_dimension_numbers<[1], [0], [0], [1], [0, 0, 1, 1], [], []>} : vector<8x4xbf16>, vector<4x128xbf16>, vector<8x128xf32> -> vector<8x128xf32>
    %c0_3 = arith.constant 0 : index
    %c0_4 = arith.constant 0 : index
    %4 = vector.load %arg3[%c0_3, %c0_4] : memref<1x128xf32, #tpu.memory_space<vmem>>, vector<1x128xf32>
    %5 = vector.broadcast %4 : vector<1x128xf32> to vector<8x128xf32>
    %6 = arith.addf %3, %5 : vector<8x128xf32>
    %7 = math.sin %6 : vector<8x128xf32>
    %8 = arith.truncf %7 : vector<8x128xf32> to vector<8x128xbf16>
    %c0_5 = arith.constant 0 : index
    %c0_6 = arith.constant 0 : index
    %9 = vector.load %arg4[%c0_5, %c0_6] : memref<128x128xbf16, #tpu.memory_space<vmem>>, vector<128x128xbf16>
    %cst_7 = arith.constant dense<0.000000e+00> : vector<8x128xf32>
    %10 = tpu.matmul %8, %9, %cst_7 {dimension_numbers = #tpu.dot_dimension_numbers<[1], [0], [0], [1], [0, 0, 1, 1], [], []>} : vector<8x128xbf16>, vector<128x128xbf16>, vector<8x128xf32> -> vector<8x128xf32>
    %c0_8 = arith.constant 0 : index
    %c0_9 = arith.constant 0 : index
    %11 = vector.load %arg5[%c0_8, %c0_9] : memref<1x128xf32, #tpu.memory_space<vmem>>, vector<1x128xf32>
    %12 = vector.broadcast %11 : vector<1x128xf32> to vector<8x128xf32>
    %13 = arith.addf %10, %12 : vector<8x128xf32>
    %14 = math.sin %13 : vector<8x128xf32>
    %15 = arith.truncf %14 : vector<8x128xf32> to vector<8x128xbf16>
    %c0_10 = arith.constant 0 : index
    %c0_11 = arith.constant 0 : index
    %16 = vector.load %arg6[%c0_10, %c0_11] : memref<128x128xbf16, #tpu.memory_space<vmem>>, vector<128x128xbf16>
    %cst_12 = arith.constant dense<0.000000e+00> : vector<8x128xf32>
    %17 = tpu.matmul %15, %16, %cst_12 {dimension_numbers = #tpu.dot_dimension_numbers<[1], [0], [0], [1], [0, 0, 1, 1], [], []>} : vector<8x128xbf16>, vector<128x128xbf16>, vector<8x128xf32> -> vector<8x128xf32>
    %c0_13 = arith.constant 0 : index
    %c0_14 = arith.constant 0 : index
    %18 = vector.load %arg7[%c0_13, %c0_14] : memref<1x128xf32, #tpu.memory_space<vmem>>, vector<1x128xf32>
    %19 = vector.broadcast %18 : vector<1x128xf32> to vector<8x128xf32>
    %20 = arith.addf %17, %19 : vector<8x128xf32>
    %21 = math.sin %20 : vector<8x128xf32>
    %22 = arith.truncf %21 : vector<8x128xf32> to vector<8x128xbf16>
    %c0_15 = arith.constant 0 : index
    %c0_16 = arith.constant 0 : index
    %23 = vector.load %arg8[%c0_15, %c0_16] : memref<128x128xbf16, #tpu.memory_space<vmem>>, vector<128x128xbf16>
    %cst_17 = arith.constant dense<0.000000e+00> : vector<8x128xf32>
    %24 = tpu.matmul %22, %23, %cst_17 {dimension_numbers = #tpu.dot_dimension_numbers<[1], [0], [0], [1], [0, 0, 1, 1], [], []>} : vector<8x128xbf16>, vector<128x128xbf16>, vector<8x128xf32> -> vector<8x128xf32>
    %c0_18 = arith.constant 0 : index
    %c0_19 = arith.constant 0 : index
    %25 = vector.load %arg9[%c0_18, %c0_19] : memref<1x128xf32, #tpu.memory_space<vmem>>, vector<1x128xf32>
    %26 = vector.broadcast %25 : vector<1x128xf32> to vector<8x128xf32>
    %27 = arith.addf %24, %26 : vector<8x128xf32>
    %28 = math.sin %27 : vector<8x128xf32>
    %c0_20 = arith.constant 0 : index
    %c0_21 = arith.constant 0 : index
    %29 = vector.load %arg10[%c0_20, %c0_21] : memref<128x8xf32, #tpu.memory_space<vmem>>, vector<128x8xf32>
    %30 = arith.truncf %29 : vector<128x8xf32> to vector<128x8xbf16>
    %31 = arith.truncf %28 : vector<8x128xf32> to vector<8x128xbf16>
    %cst_22 = arith.constant dense<0.000000e+00> : vector<8x8xf32>
    %32 = tpu.matmul %31, %30, %cst_22 {dimension_numbers = #tpu.dot_dimension_numbers<[1], [0], [0], [1], [0, 0, 1, 1], [], []>} : vector<8x128xbf16>, vector<128x8xbf16>, vector<8x8xf32> -> vector<8x8xf32>
    %c0_23 = arith.constant 0 : index
    %c0_24 = arith.constant 0 : index
    %33 = vector.load %arg11[%c0_23, %c0_24] : memref<1x8xf32, #tpu.memory_space<vmem>>, vector<1x8xf32>
    %34 = vector.broadcast %33 : vector<1x8xf32> to vector<8x8xf32>
    %35 = arith.addf %32, %34 : vector<8x8xf32>
    %c0_25 = arith.constant 0 : index
    %c0_26 = arith.constant 0 : index
    %36 = vector.load %arg12[%c0_25, %c0_26] : memref<8x8xf32, #tpu.memory_space<vmem>>, vector<8x8xf32>
    tpu.vector_store %arg12[%c0_25, %c0_26], %35 {strides = array<i32>} : memref<8x8xf32, #tpu.memory_space<vmem>>, vector<8x8xf32>,
    return
  }
  func.func @transform_0(%arg0: i32) -> (i32, i32) {
    %c0_i32 = arith.constant 0 : i32
    %c0_i32_0 = arith.constant 0 : i32
    return %arg0, %c0_i32 : i32, i32
  }
  func.func @transform_1(%arg0: i32) -> (i32, i32) {
    %c0_i32 = arith.constant 0 : i32
    %c0_i32_0 = arith.constant 0 : i32
    %c0_i32_1 = arith.constant 0 : i32
    return %c0_i32, %c0_i32_0 : i32, i32
  }
  func.func @transform_2(%arg0: i32) -> (i32, i32) {
    %c0_i32 = arith.constant 0 : i32
    %c0_i32_0 = arith.constant 0 : i32
    %c0_i32_1 = arith.constant 0 : i32
    return %c0_i32, %c0_i32_0 : i32, i32
  }
  func.func @transform_3(%arg0: i32) -> (i32, i32) {
    %c0_i32 = arith.constant 0 : i32
    %c0_i32_0 = arith.constant 0 : i32
    %c0_i32_1 = arith.constant 0 : i32
    return %c0_i32, %c0_i32_0 : i32, i32
  }
  func.func @transform_4(%arg0: i32) -> (i32, i32) {
    %c0_i32 = arith.constant 0 : i32
    %c0_i32_0 = arith.constant 0 : i32
    %c0_i32_1 = arith.constant 0 : i32
    return %c0_i32, %c0_i32_0 : i32, i32
  }
  func.func @transform_5(%arg0: i32) -> (i32, i32) {
    %c0_i32 = arith.constant 0 : i32
    %c0_i32_0 = arith.constant 0 : i32
    %c0_i32_1 = arith.constant 0 : i32
    return %c0_i32, %c0_i32_0 : i32, i32
  }
  func.func @transform_6(%arg0: i32) -> (i32, i32) {
    %c0_i32 = arith.constant 0 : i32
    %c0_i32_0 = arith.constant 0 : i32
    %c0_i32_1 = arith.constant 0 : i32
    return %c0_i32, %c0_i32_0 : i32, i32
  }
  func.func @transform_7(%arg0: i32) -> (i32, i32) {
    %c0_i32 = arith.constant 0 : i32
    %c0_i32_0 = arith.constant 0 : i32
    %c0_i32_1 = arith.constant 0 : i32
    return %c0_i32, %c0_i32_0 : i32, i32
  }
  func.func @transform_8(%arg0: i32) -> (i32, i32) {
    %c0_i32 = arith.constant 0 : i32
    %c0_i32_0 = arith.constant 0 : i32
    %c0_i32_1 = arith.constant 0 : i32
    return %c0_i32, %c0_i32_0 : i32, i32
  }
  func.func @transform_9(%arg0: i32) -> (i32, i32) {
    %c0_i32 = arith.constant 0 : i32
    %c0_i32_0 = arith.constant 0 : i32
    %c0_i32_1 = arith.constant 0 : i32
    return %c0_i32, %c0_i32_0 : i32, i32
  }
  func.func @transform_10(%arg0: i32) -> (i32, i32) {
    %c0_i32 = arith.constant 0 : i32
    %c0_i32_0 = arith.constant 0 : i32
    %c0_i32_1 = arith.constant 0 : i32
    return %c0_i32, %c0_i32_0 : i32, i32
  }
  func.func @transform_11(%arg0: i32) -> (i32, i32) {
    %c0_i32 = arith.constant 0 : i32
    %c0_i32_0 = arith.constant 0 : i32
    return %arg0, %c0_i32 : i32, i32
  }
}

</mosaic_0001>

<bundles_post_ra>
// kernel: fourier_features_forward.3
= control target key start
LH: loop header
LB: loop body
LE: loop exit
PB: predicated region body
PF: predicated region fallthrough
CT: control target
= control target key end

     0   :  { %vm54_vm0 = vcmask 1041408   ;;  %v1195_v2 = vmov 0.0   ;;  %vm1196_vm1 = vmmov 0   ;;  %vm50_vm2 = vcmask 31744   ;;  %s1579_s0 = inlined_call_operand.vmem [shape: f32[8,4], index: 0, kind: input, shape index: {}]   ;;  %s1580_s1 = inlined_call_operand.vmem [shape: bf16[4,128], index: 1, kind: input, shape index: {}]   ;;  %s1581_s2 = inlined_call_operand.vmem [shape: f32[1,128], index: 2, kind: input, shape index: {}]   ;;  %s1582_s3 = inlined_call_operand.vmem [shape: bf16[128,128], index: 3, kind: input, shape index: {}]   ;;  %s1583_s4 = inlined_call_operand.vmem [shape: f32[1,128], index: 4, kind: input, shape index: {}]   ;;  %s1584_s5 = inlined_call_operand.vmem [shape: bf16[128,128], index: 5, kind: input, shape index: {}]   ;;  %s1585_s6 = inlined_call_operand.vmem [shape: f32[1,128], index: 6, kind: input, shape index: {}]   ;;  %s1586_s7 = inlined_call_operand.vmem [shape: bf16[128,128], index: 7, kind: input, shape index: {}]   ;;  %s1587_s8 = inlined_call_operand.vmem [shape: f32[1,128], index: 8, kind: input, shape index: {}]   ;;  %s1588_s9 = inlined_call_operand.vmem [shape: f32[128,8], index: 9, kind: input, shape index: {}]   ;;  %s1589_s10 = inlined_call_operand.vmem [shape: f32[1,8], index: 10, kind: input, shape index: {}]   ;;  %s1590_s11 = inlined_call_operand.hbm [shape: f32[8,8], index: 11, kind: output, shape index: {}]  }
   0x1   :  { %v42_v0 = vld [vmem:[%s1580_s1] sm:$0x3]  ;;  %1022 = vmatprep.subr.bf16.mxu0 %v1195_v2  ;;  %1024 = vmatprep.mubr.msk.bf16.mxu0 %vm1196_vm1, %v1195_v2 }
   0x2   :  { %v40_v1 = vld [vmem:[%s1579_s0] sm:$0xff]  ;;  %v56_v3 = vsel %vm54_vm0, %v42_v0, 0  ;;  %1028 = vmatprep.subr.bf16.mxu1 %v1195_v2  ;;  %1044 = vmatprep.mubr.msk.bf16.mxu1 %vm1196_vm1, %v1195_v2 }
   0x3   :  { %v41_v4 = vpack.c.bf16 %v40_v1, %v40_v1  ;;  %1023 = vmatpush3.bf16.msra.mxu0 %v56_v3 }
   0x4   :  { %1048 = vmatprep.subr.bf16.mxu0 %v1195_v2 }
   0x6   :  { %1025 = vmatmul.mubr.msk.bf16.vlgmr.msra.gmra.mxu0 %vm50_vm2, %v41_v4 }
   0x7   :  { %1064 = vmatprep.mubr.msk.bf16.mxu0 %vm1196_vm1, %v1195_v2 }
   0x8   :  { %16 = vsyncpa [#allocation3], 0  ;;  %v1133_v5 = vld [vmem:[%s1582_s3 + $0x38] sm:$0xff]   ;;  %v1134_v6 = vld [vmem:[%s1582_s3 + $0x30] sm:$0xff]   ;;  %v1197_v29 = vmov 683565275  }
   0x9   :  { %1029 = vmatpush3.bf16.msra.mxu1 %v1133_v5  ;;  %v1135_v7 = vld [vmem:[%s1582_s3 + $0x28] sm:$0xff]   ;;  %v1136_v8 = vld [vmem:[%s1582_s3 + $0x20] sm:$0xff]   ;;  %v1137_v9 = vld [vmem:[%s1582_s3 + $0x18] sm:$0xff]   ;;  %v1198_v31 = vmov 2475754826   ;;  %s1203_s30 = smov [#allocation2]  }
   0xa   :  { %1030 = vmatprep.subr.bf16.mxu1 %v1195_v2  ;;  %v1138_v10 = vld [vmem:[%s1582_s3 + $0x10] sm:$0xff]   ;;  %v1139_v11 = vld [vmem:[%s1582_s3 + $0x8] sm:$0xff]   ;;  %v1140_v12 = vld [vmem:[%s1582_s3] sm:$0xff]   ;;  %v1199_v34 = vmov 2131351028   ;;  %s930_s12 = sshll.u32 %s1203_s30, 4  ;;  %s931_s12 = int_to_ptr.vmem [resolvable:$true] %s930_s12 }
   0xb   :  { %v938_v13 = vld [vmem:[%s1581_s2] ss:$0 sm:$0xff]  ;;  %v1200_v37 = vmov 2102212464   ;;  %v1201_v40 = vmov 920167782   ;;  %p1178_p1 = scmp.lt.s32.totalorder %s931_s12, %s931_s12 }
   0xc   :  { %v1202_v43 = vmov 1326507024  }
   0xd   :  { %1031 = vmatpush3.bf16.msra.mxu1 %v1134_v6 }
   0xe   :  { %1032 = vmatprep.subr.bf16.mxu1 %v1195_v2 }
  0x11   :  { %1033 = vmatpush3.bf16.msra.mxu1 %v1135_v7 }
  0x12   :  { %1034 = vmatprep.subr.bf16.mxu1 %v1195_v2 }
  0x15   :  { %1035 = vmatpush3.bf16.msra.mxu1 %v1136_v8 }
  0x16   :  { %1036 = vmatprep.subr.bf16.mxu1 %v1195_v2 }
  0x19   :  { %1037 = vmatpush3.bf16.msra.mxu1 %v1137_v9 }
  0x1a   :  { %1038 = vmatprep.subr.bf16.mxu1 %v1195_v2 }
  0x1d   :  { %1039 = vmatpush3.bf16.msra.mxu1 %v1138_v10 }
  0x1e   :  { %1040 = vmatprep.subr.bf16.mxu1 %v1195_v2 }
  0x21   :  { %1041 = vmatpush3.bf16.msra.mxu1 %v1139_v11 }
  0x22   :  { %1042 = vmatprep.subr.bf16.mxu1 %v1195_v2 }
  0x25   :  { %1043 = vmatpush3.bf16.msra.mxu1 %v1140_v12 }
  0x26   :  { %1068 = vmatprep.subr.bf16.mxu1 %v1195_v2 }
  0xc6   :  { %v92_v14 = vpop.f32.mrf.mxu0 }
  0xc7   :  { %v1314_v15 = vadd.f32 %v938_v13, %v92_v14 }
  0xc8   :  { %v1026_v16 = vpop.f32.mrf.mxu0 }
  0xc9   :  { %v101_v17 = vand.u32 2139095040, %v1314_v15  ;;  %v98_v23 = vand.u32 2147483647, %v1314_v15  ;;  %vm100_vm10 = vcmp.lt.s32.totalorder %v1314_v15, 0  ;;  %vm190_vm15 = vweird.f32 %v1314_v15 }
  0xca   :  { %v95_v18 = vpop.f32.mrf.mxu0 }
  0xcb   :  { %v102_v19 = vshrl.u32 %v101_v17, 23  ;;  %v105_v26 = vand.u32 8388607, %v98_v23  ;;  %vm99_vm11 = vcmp.le.f32.partialorder %v98_v23, 0.7853982 }
  0xcc   :  { %v1027_v20 = vpop.f32.mrf.mxu0 }
  0xcd   :  { %v940_v21 = vadd.s32 4294967169, %v102_v19  ;;  %v106_v45 = vor.u32 8388608, %v105_v26 }
  0xcf   :  { %v108_v22 = vadd.s32 1, %v940_v21  ;;  %v146_v59 = vshll.u32 %v106_v45, 8 }
  0xd1   :  { %vm109_vm3 = vcmp.gt.s32.totalorder %v108_v22, 0 }
  0xd2   :  { %v110_v24 = vsel %vm109_vm3, %v108_v22, 0 }
  0xd3   :  { %v112_v25 = vand.u32 31, %v110_v24  ;;  %v111_v28 = vshrl.u32 %v110_v24, 5 }
  0xd5   :  { %v113_v27 = vsub.s32 32, %v112_v25  ;;  %v115_v30 = vshll.u32 %v1197_v29, %v112_v25  ;;  %v118_v32 = vshll.u32 %v1198_v31, %v112_v25  ;;  %v121_v36 = vshll.u32 %v1199_v34, %v112_v25 }
  0xd6   :  { %v124_v39 = vshll.u32 %v1200_v37, %v112_v25  ;;  %v127_v42 = vshll.u32 %v1201_v40, %v112_v25  ;;  %vm130_vm4 = vcmp.lt.s32.totalorder %v111_v28, 1  ;;  %vm133_vm5 = vcmp.lt.s32.totalorder %v111_v28, 4 }
  0xd7   :  { %v116_v33 = vshrl.u32 %v1198_v31, %v113_v27  ;;  %v119_v35 = vshrl.u32 %v1199_v34, %v113_v27  ;;  %v122_v38 = vshrl.u32 %v1200_v37, %v113_v27  ;;  %v125_v41 = vshrl.u32 %v1201_v40, %v113_v27 }
  0xd8   :  { %v128_v44 = vshrl.u32 %v1202_v43, %v113_v27  ;;  %v114_v54 = vshrl.u32 %v1197_v29, %v113_v27  ;;  %vm132_vm6 = vcmp.lt.s32.totalorder %v111_v28, 3  ;;  %vm131_vm7 = vcmp.lt.s32.totalorder %v111_v28, 2 }
  0xd9   :  { %v117_v46 = vor.u32 %v116_v33, %v115_v30  ;;  %v120_v47 = vor.u32 %v119_v35, %v118_v32  ;;  %v123_v48 = vor.u32 %v122_v38, %v121_v36  ;;  %v126_v49 = vor.u32 %v125_v41, %v124_v39 }
  0xda   :  { %v129_v50 = vor.u32 %v128_v44, %v127_v42 }
  0xdb   :  { %v135_v51 = vsel %vm133_vm5, %v123_v48, 2102212464  ;;  %v138_v52 = vsel %vm130_vm4, %v117_v46, %v120_v47  ;;  %v142_v53 = vsel %vm130_vm4, %v120_v47, %v123_v48  ;;  %v139_v55 = vsel %vm133_vm5, %v126_v49, 920167782 }
  0xdc   :  { %v143_v56 = vsel %vm133_vm5, %v129_v50, 1326507024  ;;  %v140_v57 = vsel %vm132_vm6, %v123_v48, %v139_v55  ;;  %v134_v60 = vsel %vm130_vm4, %v114_v54, %v117_v46  ;;  %v136_v61 = vsel %vm132_vm6, %v120_v47, %v135_v51  ;;  %v1141_v55 = vld [vmem:[%s1584_s5 + $0x38] sm:$0xff]  }
  0xdd   :  { %v144_v58 = vsel %vm132_vm6, %v126_v49, %v143_v56  ;;  %v141_v62 = vsel %vm131_vm7, %v138_v52, %v140_v57  ;;  %v137_v5 = vsel %vm131_vm7, %v134_v60, %v136_v61  ;;  %1049 = vmatpush3.bf16.msra.mxu0 %v1141_v55  ;;  %v1142_v56 = vld [vmem:[%s1584_s5 + $0x30] sm:$0xff]   ;;  %v1144_v57 = vld [vmem:[%s1584_s5 + $0x20] sm:$0xff]   ;;  %v1147_v60 = vld [vmem:[%s1584_s5 + $0x8] sm:$0xff]  }
  0xde   :  { %v145_v63 = vsel %vm131_vm7, %v142_v53, %v144_v58  ;;  %v1334_v3 = vmul.u32.u64.low %v146_v59, %v141_v62  ;;  %v1335_v4 = vmul.u32.u64.high %v146_v59, %v141_v62, %v1334_v3  ;;  %v153_v7 = vmul.u32 %v146_v59, %v137_v5  ;;  %1050 = vmatprep.subr.bf16.mxu0 %v1195_v2  ;;  %v1145_v58 = vld [vmem:[%s1584_s5 + $0x18] sm:$0xff]   ;;  %v1148_v61 = vld [vmem:[%s1584_s5] sm:$0xff]  }
  0xdf   :  { %v1331_v0 = vmul.u32.u64.low %v146_v59, %v145_v63  ;;  %v1332_v1 = vmul.u32.u64.high %v146_v59, %v145_v63, %v1331_v0  ;;  %v1146_v59 = vld [vmem:[%s1584_s5 + $0x10] sm:$0xff]   ;;  %v944_v62 = vld [vmem:[%s1583_s4] ss:$0 sm:$0xff]  ;;  %s1173_s4 = scalar_lea.vmem %s931_s12, 128 }
  0xe0   :  { %v156_v6 = vadd.s32 1, %v1335_v4  ;;  %p1174_p0 = scmp.ne.s32.totalorder %s931_s12, %s1173_s4  ;;  %p1179_p2 = scmp.lt.s32.totalorder %s1173_s4, %s1173_s4 }
  0xe1   :  { %vm155_vm8 = vc.u32 %v1332_v1, %v1334_v3  ;;  %v154_v20 = vadd.s32 %v1334_v3, %v1332_v1  ;;  %1051 = vmatpush3.bf16.msra.mxu0 %v1142_v56 }
  0xe2   :  { %v157_v8 = vsel %vm155_vm8, %v156_v6, %v1335_v4  ;;  %1052 = vmatprep.subr.bf16.mxu0 %v1195_v2  ;;  %p1180_p3 = por %p1179_p2, %p1178_p1 }
  0xe3   :  { %v158_v9 = vadd.s32 %v157_v8, %v153_v7 }
  0xe4   :  { %p1181_p4 = pnand %p1180_p3, %p1174_p0 }
  0xe5   :  { %v159_v10 = vadd.s32 536870912, %v158_v9 }
  0xe7   :  { %v160_v11 = vshrl.u32 %v159_v10, 30 }
  0xe9   :  { %v161_v12 = vshll.u32 %v160_v11, 30  ;;  %v184_v38 = vsub.s32 4, %v160_v11 }
  0xeb   :  { %v162_v13 = vsub.s32 %v158_v9, %v161_v12  ;;  %v185_v42 = vsel %vm100_vm10, %v184_v38, %v160_v11 }
  0xec   :  { %v187_v44 = vsel %vm99_vm11, 0, %v185_v42 }
  0xed   :  { %v164_v14 = vsub.s32 0, %v162_v13  ;;  %v191_v45 = vadd.s32 3, %v187_v44 }
  0xef   :  { %v941_v16 = vmin.u32 %v164_v14, %v162_v13  ;;  %v192_v46 = vand.u32 3, %v191_v45 }
  0xf1   :  { %v166_v17 = vclz %v941_v16  ;;  %vm197_vm12 = vcmp.eq.s32.totalorder %v192_v46, 2  ;;  %vm194_vm13 = vcmp.eq.s32.totalorder %v192_v46, 0  ;;  %vm193_vm14 = vcmp.lt.s32.totalorder %v192_v46, 2 }
  0xf3   :  { %v942_v18 = vadd.s32 4294967294, %v166_v17 }
  0xf5   :  { %vm943_vm9 = vcmp.lt.s32.totalorder %v942_v18, 0 }
  0xf6   :  { %v169_v19 = vsel %vm943_vm9, 0, %v942_v18 }
  0xf7   :  { %v170_v21 = vsub.s32 32, %v169_v19  ;;  %v174_v22 = vsub.s32 4294967266, %v169_v19  ;;  %v171_v24 = vshll.u32 %v162_v13, %v169_v19 }
  0xf9   :  { %v172_v25 = vshrl.u32 %v154_v20, %v170_v21  ;;  %v175_v26 = vadd.s32 127, %v174_v22 }
  0xfb   :  { %v173_v27 = vor.u32 %v172_v25, %v171_v24  ;;  %v176_v28 = vshll.u32 %v175_v26, 23 }
  0xfd   :  { %v177_v30 = vor.u32 4788187, %v176_v28  ;;  %v180_v33 = vcvt.s32.f32 %v173_v27 }
  0xff   :  { %v178_v32 = vand.u32 2147483647, %v177_v30 }
 0x101   :  { %v181_v35 = vmul.f32 %v180_v33, %v178_v32 }
 0x103   :  { %v182_v36 = vxor.u32 2147483648, %v181_v35 }
 0x105   :  { %v183_v39 = vsel %vm100_vm10, %v182_v36, %v181_v35 }
 0x106   :  { %v186_v41 = vsel %vm99_vm11, %v1314_v15, %v183_v39  ;;  %v1143_v15 = vld [vmem:[%s1584_s5 + $0x28] sm:$0xff]  }
 0x107   :  { %1157 = vcosq.f32 %v186_v41  ;;  %1053 = vmatpush3.bf16.msra.mxu0 %v1143_v15 }
 0x108   :  { %1159 = vsinq.f32 %v186_v41  ;;  %1054 = vmatprep.subr.bf16.mxu0 %v1195_v2 }
 0x10b   :  { %1055 = vmatpush3.bf16.msra.mxu0 %v1144_v57 }
 0x10c   :  { %1056 = vmatprep.subr.bf16.mxu0 %v1195_v2 }
 0x10f   :  { %1057 = vmatpush3.bf16.msra.mxu0 %v1145_v58 }
 0x110   :  { %1058 = vmatprep.subr.bf16.mxu0 %v1195_v2 }
 0x113   :  { %1059 = vmatpush3.bf16.msra.mxu0 %v1146_v59 }
 0x114   :  { %v1158_v47 = vpop.eup %1157  ;;  %1060 = vmatprep.subr.bf16.mxu0 %v1195_v2 }
 0x115   :  { %v1160_v48 = vpop.eup %1159  ;;  %v198_v49 = vxor.u32 2147483648, %v1158_v47 }
 0x116   :  { %v195_v50 = vxor.u32 2147483648, %v1160_v48 }
 0x117   :  { %v199_v51 = vsel %vm197_vm12, %v198_v49, %v1160_v48  ;;  %1061 = vmatpush3.bf16.msra.mxu0 %v1147_v60 }
 0x118   :  { %v196_v52 = vsel %vm194_vm13, %v1158_v47, %v195_v50  ;;  %1062 = vmatprep.subr.bf16.mxu0 %v1195_v2 }
 0x119   :  { %v200_v23 = vsel %vm193_vm14, %v196_v52, %v199_v51 }
 0x11a   :  { %v201_v53 = vsel %vm190_vm15, nan, %v200_v23 }
 0x11b   :  { %v202_v54 = vpack.c.bf16 %v201_v53, %v201_v53  ;;  %1063 = vmatpush3.bf16.msra.mxu0 %v1148_v61 }
 0x11c   :  { %1088 = vmatprep.subr.bf16.mxu0 %v1195_v2 }
 0x11d   :  { %1045 = vmatmul.mubr.bf16.vlgmr.msra.gmra.mxu1 %v202_v54 }
 0x11e   :  { %1084 = vmatprep.mubr.msk.bf16.mxu1 %vm1196_vm1, %v1195_v2 }
 0x1dd   :  { %v308_v63 = vpop.f32.mrf.mxu1 }
 0x1de   :  { %v1383_v0 = vadd.f32 %v944_v62, %v308_v63 }
 0x1df   :  { %v1046_v1 = vpop.f32.mrf.mxu1 }
 0x1e0   :  { %v317_v3 = vand.u32 2139095040, %v1383_v0  ;;  %v314_v9 = vand.u32 2147483647, %v1383_v0  ;;  %vm316_vm8 = vcmp.lt.s32.totalorder %v1383_v0, 0  ;;  %vm406_vm13 = vweird.f32 %v1383_v0 }
 0x1e1   :  { %v311_v4 = vpop.f32.mrf.mxu1 }
 0x1e2   :  { %v318_v5 = vshrl.u32 %v317_v3, 23  ;;  %v321_v12 = vand.u32 8388607, %v314_v9  ;;  %vm315_vm9 = vcmp.le.f32.partialorder %v314_v9, 0.7853982 }
 0x1e3   :  { %v1047_v6 = vpop.f32.mrf.mxu1 }
 0x1e4   :  { %v953_v7 = vadd.s32 4294967169, %v318_v5  ;;  %v322_v27 = vor.u32 8388608, %v321_v12 }
 0x1e6   :  { %v324_v8 = vadd.s32 1, %v953_v7  ;;  %v362_v47 = vshll.u32 %v322_v27, 8 }
 0x1e8   :  { %vm325_vm0 = vcmp.gt.s32.totalorder %v324_v8, 0 }
 0x1e9   :  { %v326_v10 = vsel %vm325_vm0, %v324_v8, 0 }
 0x1ea   :  { %v328_v11 = vand.u32 31, %v326_v10  ;;  %v327_v14 = vshrl.u32 %v326_v10, 5 }
 0x1ec   :  { %v329_v13 = vsub.s32 32, %v328_v11  ;;  %v331_v16 = vshll.u32 %v1197_v29, %v328_v11  ;;  %v334_v17 = vshll.u32 %v1198_v31, %v328_v11  ;;  %v337_v20 = vshll.u32 %v1199_v34, %v328_v11 }
 0x1ed   :  { %v340_v22 = vshll.u32 %v1200_v37, %v328_v11  ;;  %v343_v25 = vshll.u32 %v1201_v40, %v328_v11  ;;  %vm346_vm2 = vcmp.lt.s32.totalorder %v327_v14, 1  ;;  %vm349_vm3 = vcmp.lt.s32.totalorder %v327_v14, 4 }
 0x1ee   :  { %v332_v18 = vshrl.u32 %v1198_v31, %v329_v13  ;;  %v335_v19 = vshrl.u32 %v1199_v34, %v329_v13  ;;  %v338_v21 = vshrl.u32 %v1200_v37, %v329_v13  ;;  %v341_v24 = vshrl.u32 %v1201_v40, %v329_v13 }
 0x1ef   :  { %v344_v26 = vshrl.u32 %v1202_v43, %v329_v13  ;;  %v330_v41 = vshrl.u32 %v1197_v29, %v329_v13  ;;  %vm348_vm4 = vcmp.lt.s32.totalorder %v327_v14, 3  ;;  %vm347_vm5 = vcmp.lt.s32.totalorder %v327_v14, 2 }
 0x1f0   :  { %v333_v28 = vor.u32 %v332_v18, %v331_v16  ;;  %v336_v30 = vor.u32 %v335_v19, %v334_v17  ;;  %v339_v32 = vor.u32 %v338_v21, %v337_v20  ;;  %v342_v33 = vor.u32 %v341_v24, %v340_v22 }
 0x1f1   :  { %v345_v35 = vor.u32 %v344_v26, %v343_v25 }
 0x1f2   :  { %v351_v36 = vsel %vm349_vm3, %v339_v32, 2102212464  ;;  %v354_v38 = vsel %vm346_vm2, %v333_v28, %v336_v30  ;;  %v358_v39 = vsel %vm346_vm2, %v336_v30, %v339_v32  ;;  %v355_v42 = vsel %vm349_vm3, %v342_v33, 920167782 }
 0x1f3   :  { %v359_v44 = vsel %vm349_vm3, %v345_v35, 1326507024  ;;  %v356_v45 = vsel %vm348_vm4, %v339_v32, %v355_v42  ;;  %v350_v48 = vsel %vm346_vm2, %v330_v41, %v333_v28  ;;  %v352_v49 = vsel %vm348_vm4, %v336_v30, %v351_v36  ;;  %v1149_v42 = vld [vmem:[%s1586_s7 + $0x38] sm:$0xff]  }
 0x1f4   :  { %v360_v46 = vsel %vm348_vm4, %v342_v33, %v359_v44  ;;  %v357_v50 = vsel %vm347_vm5, %v354_v38, %v356_v45  ;;  %v353_v55 = vsel %vm347_vm5, %v350_v48, %v352_v49  ;;  %1069 = vmatpush3.bf16.msra.mxu1 %v1149_v42  ;;  %v1150_v44 = vld [vmem:[%s1586_s7 + $0x30] sm:$0xff]   ;;  %v1152_v45 = vld [vmem:[%s1586_s7 + $0x20] sm:$0xff]   ;;  %v1155_v48 = vld [vmem:[%s1586_s7 + $0x8] sm:$0xff]  }
 0x1f5   :  { %v361_v51 = vsel %vm347_vm5, %v358_v39, %v360_v46  ;;  %v1403_v53 = vmul.u32.u64.low %v362_v47, %v357_v50  ;;  %v1404_v54 = vmul.u32.u64.high %v362_v47, %v357_v50, %v1403_v53  ;;  %v369_v15 = vmul.u32 %v362_v47, %v353_v55  ;;  %1070 = vmatprep.subr.bf16.mxu1 %v1195_v2  ;;  %v1153_v46 = vld [vmem:[%s1586_s7 + $0x18] sm:$0xff]   ;;  %v1156_v49 = vld [vmem:[%s1586_s7] sm:$0xff]  }
 0x1f6   :  { %v1400_v52 = vmul.u32.u64.low %v362_v47, %v361_v51  ;;  %v1401_v23 = vmul.u32.u64.high %v362_v47, %v361_v51, %v1400_v52  ;;  %v1154_v47 = vld [vmem:[%s1586_s7 + $0x10] sm:$0xff]   ;;  %v957_v50 = vld [vmem:[%s1585_s6] ss:$0 sm:$0xff] }
 0x1f7   :  { %v372_v56 = vadd.s32 1, %v1404_v54 }
 0x1f8   :  { %vm371_vm6 = vc.u32 %v1401_v23, %v1403_v53  ;;  %v370_v6 = vadd.s32 %v1403_v53, %v1401_v23  ;;  %1071 = vmatpush3.bf16.msra.mxu1 %v1150_v44 }
 0x1f9   :  { %v373_v57 = vsel %vm371_vm6, %v372_v56, %v1404_v54  ;;  %1072 = vmatprep.subr.bf16.mxu1 %v1195_v2 }
 0x1fa   :  { %v374_v58 = vadd.s32 %v373_v57, %v369_v15 }
 0x1fc   :  { %v375_v59 = vadd.s32 536870912, %v374_v58 }
 0x1fe   :  { %v376_v60 = vshrl.u32 %v375_v59, 30 }
 0x200   :  { %v377_v61 = vshll.u32 %v376_v60, 30  ;;  %v400_v21 = vsub.s32 4, %v376_v60 }
 0x202   :  { %v378_v62 = vsub.s32 %v374_v58, %v377_v61  ;;  %v401_v25 = vsel %vm316_vm8, %v400_v21, %v376_v60 }
 0x203   :  { %v403_v26 = vsel %vm315_vm9, 0, %v401_v25 }
 0x204   :  { %v380_v63 = vsub.s32 0, %v378_v62  ;;  %v407_v27 = vadd.s32 3, %v403_v26 }
 0x206   :  { %v954_v1 = vmin.u32 %v380_v63, %v378_v62  ;;  %v408_v28 = vand.u32 3, %v407_v27 }
 0x208   :  { %v382_v3 = vclz %v954_v1  ;;  %vm413_vm10 = vcmp.eq.s32.totalorder %v408_v28, 2  ;;  %vm410_vm11 = vcmp.eq.s32.totalorder %v408_v28, 0  ;;  %vm409_vm12 = vcmp.lt.s32.totalorder %v408_v28, 2 }
 0x20a   :  { %v955_v4 = vadd.s32 4294967294, %v382_v3 }
 0x20c   :  { %vm956_vm7 = vcmp.lt.s32.totalorder %v955_v4, 0 }
 0x20d   :  { %v385_v5 = vsel %vm956_vm7, 0, %v955_v4 }
 0x20e   :  { %v386_v7 = vsub.s32 32, %v385_v5  ;;  %v390_v8 = vsub.s32 4294967266, %v385_v5  ;;  %v387_v10 = vshll.u32 %v378_v62, %v385_v5 }
 0x210   :  { %v388_v11 = vshrl.u32 %v370_v6, %v386_v7  ;;  %v391_v12 = vadd.s32 127, %v390_v8 }
 0x212   :  { %v389_v13 = vor.u32 %v388_v11, %v387_v10  ;;  %v392_v14 = vshll.u32 %v391_v12, 23 }
 0x214   :  { %v393_v16 = vor.u32 4788187, %v392_v14  ;;  %v396_v18 = vcvt.s32.f32 %v389_v13 }
 0x216   :  { %v394_v17 = vand.u32 2147483647, %v393_v16 }
 0x218   :  { %v397_v19 = vmul.f32 %v396_v18, %v394_v17 }
 0x21a   :  { %v398_v20 = vxor.u32 2147483648, %v397_v19 }
 0x21c   :  { %v399_v22 = vsel %vm316_vm8, %v398_v20, %v397_v19 }
 0x21d   :  { %v402_v24 = vsel %vm315_vm9, %v1383_v0, %v399_v22  ;;  %v1151_v0 = vld [vmem:[%s1586_s7 + $0x28] sm:$0xff]  }
 0x21e   :  { %1161 = vcosq.f32 %v402_v24  ;;  %1073 = vmatpush3.bf16.msra.mxu1 %v1151_v0 }
 0x21f   :  { %1163 = vsinq.f32 %v402_v24  ;;  %1074 = vmatprep.subr.bf16.mxu1 %v1195_v2 }
 0x222   :  { %1075 = vmatpush3.bf16.msra.mxu1 %v1152_v45 }
 0x223   :  { %1076 = vmatprep.subr.bf16.mxu1 %v1195_v2 }
 0x226   :  { %1077 = vmatpush3.bf16.msra.mxu1 %v1153_v46 }
 0x227   :  { %1078 = vmatprep.subr.bf16.mxu1 %v1195_v2 }
 0x22a   :  { %1079 = vmatpush3.bf16.msra.mxu1 %v1154_v47 }
 0x22b   :  { %v1162_v30 = vpop.eup %1161  ;;  %1080 = vmatprep.subr.bf16.mxu1 %v1195_v2 }
 0x22c   :  { %v1164_v32 = vpop.eup %1163  ;;  %v414_v33 = vxor.u32 2147483648, %v1162_v30 }
 0x22d   :  { %v411_v35 = vxor.u32 2147483648, %v1164_v32 }
 0x22e   :  { %v415_v36 = vsel %vm413_vm10, %v414_v33, %v1164_v32  ;;  %1081 = vmatpush3.bf16.msra.mxu1 %v1155_v48 }
 0x22f   :  { %v412_v38 = vsel %vm410_vm11, %v1162_v30, %v411_v35  ;;  %1082 = vmatprep.subr.bf16.mxu1 %v1195_v2 }
 0x230   :  { %v416_v9 = vsel %vm409_vm12, %v412_v38, %v415_v36 }
 0x231   :  { %v417_v39 = vsel %vm406_vm13, nan, %v416_v9 }
 0x232   :  { %v418_v41 = vpack.c.bf16 %v417_v39, %v417_v39  ;;  %1083 = vmatpush3.bf16.msra.mxu1 %v1156_v49 }
 0x234   :  { %1065 = vmatmul.mubr.bf16.vlgmr.msra.gmra.mxu0 %v418_v41 }
 0x235   :  { %1104 = vmatprep.mubr.msk.bf16.mxu0 %vm1196_vm1, %v1195_v2 }
 0x2f4   :  { %v524_v51 = vpop.f32.mrf.mxu0 }
 0x2f5   :  { %v1451_v52 = vadd.f32 %v957_v50, %v524_v51 }
 0x2f6   :  { %v1066_v23 = vpop.f32.mrf.mxu0 }
 0x2f7   :  { %v533_v53 = vand.u32 2139095040, %v1451_v52  ;;  %v530_v58 = vand.u32 2147483647, %v1451_v52  ;;  %vm532_vm5 = vcmp.lt.s32.totalorder %v1451_v52, 0  ;;  %vm622_vm10 = vweird.f32 %v1451_v52 }
 0x2f8   :  { %v527_v54 = vpop.f32.mrf.mxu0 }
 0x2f9   :  { %v534_v55 = vshrl.u32 %v533_v53, 23  ;;  %v537_v61 = vand.u32 8388607, %v530_v58  ;;  %vm531_vm6 = vcmp.le.f32.partialorder %v530_v58, 0.7853982 }
 0x2fa   :  { %v1067_v56 = vpop.f32.mrf.mxu0 }
 0x2fb   :  { %v966_v15 = vadd.s32 4294967169, %v534_v55  ;;  %v538_v13 = vor.u32 8388608, %v537_v61 }
 0x2fd   :  { %v540_v57 = vadd.s32 1, %v966_v15  ;;  %v578_v30 = vshll.u32 %v538_v13, 8 }
 0x2ff   :  { %vm541_vm1 = vcmp.gt.s32.totalorder %v540_v57, 0 }
 0x300   :  { %v542_v59 = vsel %vm541_vm1, %v540_v57, 0 }
 0x301   :  { %v544_v60 = vand.u32 31, %v542_v59  ;;  %v543_v63 = vshrl.u32 %v542_v59, 5 }
 0x303   :  { %v545_v62 = vsub.s32 32, %v544_v60  ;;  %v547_v1 = vshll.u32 %v1197_v29, %v544_v60  ;;  %v550_v3 = vshll.u32 %v1198_v31, %v544_v60  ;;  %v553_v6 = vshll.u32 %v1199_v34, %v544_v60 }
 0x304   :  { %v556_v8 = vshll.u32 %v1200_v37, %v544_v60  ;;  %v559_v11 = vshll.u32 %v1201_v40, %v544_v60  ;;  %vm562_vm14 = vcmp.lt.s32.totalorder %v543_v63, 1  ;;  %vm565_vm15 = vcmp.lt.s32.totalorder %v543_v63, 4 }
 0x305   :  { %v548_v4 = vshrl.u32 %v1198_v31, %v545_v62  ;;  %v551_v5 = vshrl.u32 %v1199_v34, %v545_v62  ;;  %v554_v7 = vshrl.u32 %v1200_v37, %v545_v62  ;;  %v557_v10 = vshrl.u32 %v1201_v40, %v545_v62 }
 0x306   :  { %v560_v12 = vshrl.u32 %v1202_v43, %v545_v62  ;;  %v546_v24 = vshrl.u32 %v1197_v29, %v545_v62  ;;  %vm564_vm0 = vcmp.lt.s32.totalorder %v543_v63, 3  ;;  %vm563_vm2 = vcmp.lt.s32.totalorder %v543_v63, 2 }
 0x307   :  { %v549_v14 = vor.u32 %v548_v4, %v547_v1  ;;  %v552_v16 = vor.u32 %v551_v5, %v550_v3  ;;  %v555_v17 = vor.u32 %v554_v7, %v553_v6  ;;  %v558_v18 = vor.u32 %v557_v10, %v556_v8 }
 0x308   :  { %v561_v19 = vor.u32 %v560_v12, %v559_v11 }
 0x309   :  { %v567_v20 = vsel %vm565_vm15, %v555_v17, 2102212464  ;;  %v570_v21 = vsel %vm562_vm14, %v549_v14, %v552_v16  ;;  %v574_v22 = vsel %vm562_vm14, %v552_v16, %v555_v17  ;;  %v571_v25 = vsel %vm565_vm15, %v558_v18, 920167782 }
 0x30a   :  { %v575_v26 = vsel %vm565_vm15, %v561_v19, 1326507024  ;;  %v572_v27 = vsel %vm564_vm0, %v555_v17, %v571_v25  ;;  %v566_v32 = vsel %vm562_vm14, %v546_v24, %v549_v14  ;;  %v568_v33 = vsel %vm564_vm0, %v552_v16, %v567_v20  ;;  %v864_v25 = vld [vmem:[%s1588_s9 + $0x70] sm:$0xff] }
 0x30b   :  { %v576_v28 = vsel %vm564_vm0, %v558_v18, %v575_v26  ;;  %v573_v35 = vsel %vm563_vm2, %v570_v21, %v572_v27  ;;  %v569_v42 = vsel %vm563_vm2, %v566_v32, %v568_v33  ;;  %v865_v26 = vld [vmem:[%s1588_s9 + $0x78] sm:$0xff]  ;;  %v860_v32 = vld [vmem:[%s1588_s9 + $0x50] sm:$0xff] }
 0x30c   :  { %v577_v36 = vsel %vm563_vm2, %v574_v22, %v576_v28  ;;  %v1471_v39 = vmul.u32.u64.low %v578_v30, %v573_v35  ;;  %v1472_v41 = vmul.u32.u64.high %v578_v30, %v573_v35, %v1471_v39  ;;  %v585_v0 = vmul.u32 %v578_v30, %v569_v42  ;;  %v863_v28 = vld [vmem:[%s1588_s9 + $0x68] sm:$0xff]  ;;  %v861_v33 = vld [vmem:[%s1588_s9 + $0x58] sm:$0xff] }
 0x30d   :  { %v1468_v38 = vmul.u32.u64.low %v578_v30, %v577_v36  ;;  %v1469_v9 = vmul.u32.u64.high %v578_v30, %v577_v36, %v1468_v38  ;;  %v873_v27 = vpack.c.bf16 %v865_v26, %v864_v25  ;;  %v871_v35 = vpack.c.bf16 %v861_v33, %v860_v32  ;;  %v858_v36 = vld [vmem:[%s1588_s9 + $0x40] sm:$0xff] }
 0x30e   :  { %v588_v44 = vadd.s32 1, %v1472_v41  ;;  %v859_v38 = vld [vmem:[%s1588_s9 + $0x48] sm:$0xff] }
 0x30f   :  { %vm587_vm3 = vc.u32 %v1469_v9, %v1471_v39  ;;  %v586_v56 = vadd.s32 %v1471_v39, %v1469_v9  ;;  %1089 = vmatpush3.bf16.msra.mxu0 %v873_v27  ;;  %v856_v9 = vld [vmem:[%s1588_s9 + $0x30] sm:$0xff]  ;;  %v870_v39 = vpack.c.bf16 %v859_v38, %v858_v36 }
 0x310   :  { %v589_v45 = vsel %vm587_vm3, %v588_v44, %v1472_v41  ;;  %1090 = vmatprep.subr.bf16.mxu0 %v1195_v2  ;;  %v857_v41 = vld [vmem:[%s1588_s9 + $0x38] sm:$0xff]  ;;  %v854_v44 = vld [vmem:[%s1588_s9 + $0x20] sm:$0xff] }
 0x311   :  { %v590_v46 = vadd.s32 %v589_v45, %v585_v0  ;;  %v869_v42 = vpack.c.bf16 %v857_v41, %v856_v9  ;;  %v855_v0 = vld [vmem:[%s1588_s9 + $0x28] sm:$0xff] }
 0x312   :  { %v868_v45 = vpack.c.bf16 %v855_v0, %v854_v44 }
 0x313   :  { %v591_v47 = vadd.s32 536870912, %v590_v46 }
 0x315   :  { %v592_v48 = vshrl.u32 %v591_v47, 30  ;;  %v853_v47 = vld [vmem:[%s1588_s9 + $0x18] sm:$0xff] }
 0x317   :  { %v593_v49 = vshll.u32 %v592_v48, 30  ;;  %v616_v7 = vsub.s32 4, %v592_v48 }
 0x319   :  { %v594_v50 = vsub.s32 %v590_v46, %v593_v49  ;;  %v617_v11 = vsel %vm532_vm5, %v616_v7, %v592_v48  ;;  %v852_v46 = vld [vmem:[%s1588_s9 + $0x10] sm:$0xff]  ;;  %v850_v49 = vld [vmem:[%s1588_s9] sm:$0xff] }
 0x31a   :  { %v619_v12 = vsel %vm531_vm6, 0, %v617_v11  ;;  %v867_v48 = vpack.c.bf16 %v853_v47, %v852_v46 }
 0x31b   :  { %v596_v51 = vsub.s32 0, %v594_v50  ;;  %v623_v13 = vadd.s32 3, %v619_v12 }
 0x31d   :  { %v967_v23 = vmin.u32 %v596_v51, %v594_v50  ;;  %v624_v14 = vand.u32 3, %v623_v13 }
 0x31f   :  { %v598_v53 = vclz %v967_v23  ;;  %vm629_vm7 = vcmp.eq.s32.totalorder %v624_v14, 2  ;;  %vm626_vm8 = vcmp.eq.s32.totalorder %v624_v14, 0  ;;  %vm625_vm9 = vcmp.lt.s32.totalorder %v624_v14, 2  ;;  %v970_v23 = vld [vmem:[%s1587_s8] ss:$0 sm:$0xff] }
 0x321   :  { %v968_v54 = vadd.s32 4294967294, %v598_v53 }
 0x323   :  { %vm969_vm4 = vcmp.lt.s32.totalorder %v968_v54, 0 }
 0x324   :  { %v601_v55 = vsel %vm969_vm4, 0, %v968_v54 }
 0x325   :  { %v602_v15 = vsub.s32 32, %v601_v55  ;;  %v606_v57 = vsub.s32 4294967266, %v601_v55  ;;  %v603_v59 = vshll.u32 %v594_v50, %v601_v55  ;;  %v851_v50 = vld [vmem:[%s1588_s9 + $0x8] sm:$0xff] }
 0x326   :  { %v866_v51 = vpack.c.bf16 %v851_v50, %v850_v49 }
 0x327   :  { %v604_v60 = vshrl.u32 %v586_v56, %v602_v15  ;;  %v607_v61 = vadd.s32 127, %v606_v57 }
 0x329   :  { %v605_v62 = vor.u32 %v604_v60, %v603_v59  ;;  %v608_v63 = vshll.u32 %v607_v61, 23 }
 0x32b   :  { %v609_v1 = vor.u32 4788187, %v608_v63  ;;  %v612_v4 = vcvt.s32.f32 %v605_v62 }
 0x32d   :  { %v610_v3 = vand.u32 2147483647, %v609_v1 }
 0x32f   :  { %v613_v5 = vmul.f32 %v612_v4, %v610_v3 }
 0x331   :  { %v614_v6 = vxor.u32 2147483648, %v613_v5 }
 0x333   :  { %v615_v8 = vsel %vm532_vm5, %v614_v6, %v613_v5 }
 0x334   :  { %v618_v10 = vsel %vm531_vm6, %v1451_v52, %v615_v8  ;;  %v862_v52 = vld [vmem:[%s1588_s9 + $0x60] sm:$0xff] }
 0x335   :  { %1165 = vcosq.f32 %v618_v10  ;;  %v872_v30 = vpack.c.bf16 %v863_v28, %v862_v52 }
 0x336   :  { %1167 = vsinq.f32 %v618_v10 }
 0x337   :  { %1091 = vmatpush3.bf16.msra.mxu0 %v872_v30 }
 0x338   :  { %1092 = vmatprep.subr.bf16.mxu0 %v1195_v2 }
 0x33b   :  { %1093 = vmatpush3.bf16.msra.mxu0 %v871_v35 }
 0x33c   :  { %1094 = vmatprep.subr.bf16.mxu0 %v1195_v2 }
 0x33f   :  { %1095 = vmatpush3.bf16.msra.mxu0 %v870_v39 }
 0x340   :  { %1096 = vmatprep.subr.bf16.mxu0 %v1195_v2 }
 0x342   :  { %v1166_v16 = vpop.eup %1165 }
 0x343   :  { %v1168_v17 = vpop.eup %1167  ;;  %v630_v18 = vxor.u32 2147483648, %v1166_v16  ;;  %1097 = vmatpush3.bf16.msra.mxu0 %v869_v42 }
 0x344   :  { %v627_v19 = vxor.u32 2147483648, %v1168_v17  ;;  %1098 = vmatprep.subr.bf16.mxu0 %v1195_v2 }
 0x345   :  { %v631_v20 = vsel %vm629_vm7, %v630_v18, %v1168_v17 }
 0x346   :  { %v628_v21 = vsel %vm626_vm8, %v1166_v16, %v627_v19  ;;  %vm922_vm8 = vcmask 64512  }
 0x347   :  { %v632_v58 = vsel %vm625_vm9, %v628_v21, %v631_v20  ;;  %1099 = vmatpush3.bf16.msra.mxu0 %v868_v45 }
 0x348   :  { %v633_v22 = vsel %vm622_vm10, nan, %v632_v58  ;;  %1100 = vmatprep.subr.bf16.mxu0 %v1195_v2 }
 0x349   :  { %v634_v24 = vpack.c.bf16 %v633_v22, %v633_v22 }
 0x34b   :  { %1085 = vmatmul.mubr.bf16.vlgmr.msra.gmra.mxu1 %v634_v24  ;;  %1101 = vmatpush3.bf16.msra.mxu0 %v867_v48 }
 0x34c   :  { %1102 = vmatprep.subr.bf16.mxu0 %v1195_v2 }
 0x34f   :  { %1103 = vmatpush3.bf16.msra.mxu0 %v866_v51 }
 0x40b   :  { %v740_v53 = vpop.f32.mrf.mxu1 }
 0x40c   :  { %v1541_v54 = vadd.f32 %v970_v23, %v740_v53 }
 0x40d   :  { %v1086_v55 = vpop.f32.mrf.mxu1 }
 0x40e   :  { %v749_v56 = vand.u32 2139095040, %v1541_v54  ;;  %v746_v62 = vand.u32 2147483647, %v1541_v54  ;;  %vm748_vm2 = vcmp.lt.s32.totalorder %v1541_v54, 0  ;;  %vm838_vm7 = vweird.f32 %v1541_v54 }
 0x40f   :  { %v743_v15 = vpop.f32.mrf.mxu1 }
 0x410   :  { %v750_v57 = vshrl.u32 %v749_v56, 23  ;;  %v753_v1 = vand.u32 8388607, %v746_v62  ;;  %vm747_vm3 = vcmp.le.f32.partialorder %v746_v62, 0.7853982 }
 0x411   :  { %v1087_v59 = vpop.f32.mrf.mxu1 }
 0x412   :  { %v979_v60 = vadd.s32 4294967169, %v750_v57  ;;  %v754_v17 = vor.u32 8388608, %v753_v1 }
 0x414   :  { %v756_v61 = vadd.s32 1, %v979_v60 }
 0x416   :  { %vm757_vm11 = vcmp.gt.s32.totalorder %v756_v61, 0 }
 0x417   :  { %v758_v2 = vsel %vm757_vm11, %v756_v61, 0 }
 0x418   :  { %v760_v63 = vand.u32 31, %v758_v2  ;;  %v759_v4 = vshrl.u32 %v758_v2, 5 }
 0x41a   :  { %v761_v3 = vsub.s32 32, %v760_v63  ;;  %v763_v5 = vshll.u32 %v1197_v29, %v760_v63  ;;  %v766_v6 = vshll.u32 %v1198_v31, %v760_v63  ;;  %v769_v10 = vshll.u32 %v1199_v34, %v760_v63 }
 0x41b   :  { %v772_v12 = vshll.u32 %v1200_v37, %v760_v63  ;;  %v775_v14 = vshll.u32 %v1201_v40, %v760_v63  ;;  %vm778_vm12 = vcmp.lt.s32.totalorder %v759_v4, 1  ;;  %vm781_vm13 = vcmp.lt.s32.totalorder %v759_v4, 4 }
 0x41c   :  { %v764_v7 = vshrl.u32 %v1198_v31, %v761_v3  ;;  %v767_v8 = vshrl.u32 %v1199_v34, %v761_v3  ;;  %v770_v11 = vshrl.u32 %v1200_v37, %v761_v3  ;;  %v773_v13 = vshrl.u32 %v1201_v40, %v761_v3 }
 0x41d   :  { %v776_v16 = vshrl.u32 %v1202_v43, %v761_v3  ;;  %v762_v24 = vshrl.u32 %v1197_v29, %v761_v3  ;;  %vm780_vm1 = vcmp.lt.s32.totalorder %v759_v4, 3  ;;  %vm779_vm14 = vcmp.lt.s32.totalorder %v759_v4, 2 }
 0x41e   :  { %v765_v18 = vor.u32 %v764_v7, %v763_v5  ;;  %v768_v19 = vor.u32 %v767_v8, %v766_v6  ;;  %v771_v20 = vor.u32 %v770_v11, %v769_v10  ;;  %v774_v21 = vor.u32 %v773_v13, %v772_v12 }
 0x41f   :  { %v777_v31 = vor.u32 %v776_v16, %v775_v14  ;;  %v794_v43 = vshll.u32 %v754_v17, 8 }
 0x420   :  { %v783_v58 = vsel %vm781_vm13, %v771_v20, 2102212464  ;;  %v786_v34 = vsel %vm778_vm12, %v765_v18, %v768_v19  ;;  %v790_v22 = vsel %vm778_vm12, %v768_v19, %v771_v20  ;;  %v787_v37 = vsel %vm781_vm13, %v774_v21, 920167782 }
 0x421   :  { %v791_v25 = vsel %vm781_vm13, %v777_v31, 1326507024  ;;  %v788_v40 = vsel %vm780_vm1, %v771_v20, %v787_v37  ;;  %v782_v27 = vsel %vm778_vm12, %v762_v24, %v765_v18  ;;  %v784_v52 = vsel %vm780_vm1, %v768_v19, %v783_v58  ;;  %v983_v20 = vld [vmem:[%s1589_s10] ss:$0 sm:$0xff] }
 0x422   :  { %v792_v26 = vsel %vm780_vm1, %v774_v21, %v791_v25  ;;  %v789_v28 = vsel %vm779_vm14, %v786_v34, %v788_v40  ;;  %v785_v38 = vsel %vm779_vm14, %v782_v27, %v784_v52 }
 0x423   :  { %v793_v30 = vsel %vm779_vm14, %v790_v22, %v792_v26  ;;  %v1561_v35 = vmul.u32.u64.low %v794_v43, %v789_v28  ;;  %v1562_v36 = vmul.u32.u64.high %v794_v43, %v789_v28, %v1561_v35  ;;  %v801_v9 = vmul.u32 %v794_v43, %v785_v38 }
 0x424   :  { %v1558_v32 = vmul.u32.u64.low %v794_v43, %v793_v30  ;;  %v1559_v33 = vmul.u32.u64.high %v794_v43, %v793_v30, %v1558_v32 }
 0x425   :  { %v804_v29 = vadd.s32 1, %v1562_v36 }
 0x426   :  { %vm803_vm15 = vc.u32 %v1559_v33, %v1561_v35  ;;  %v802_v51 = vadd.s32 %v1561_v35, %v1559_v33 }
 0x427   :  { %v805_v39 = vsel %vm803_vm15, %v804_v29, %v1562_v36 }
 0x428   :  { %v806_v41 = vadd.s32 %v805_v39, %v801_v9 }
 0x42a   :  { %v807_v42 = vadd.s32 536870912, %v806_v41 }
 0x42c   :  { %v808_v44 = vshrl.u32 %v807_v42, 30 }
 0x42e   :  { %v809_v0 = vshll.u32 %v808_v44, 30  ;;  %v832_v3 = vsub.s32 4, %v808_v44 }
 0x430   :  { %v810_v45 = vsub.s32 %v806_v41, %v809_v0  ;;  %v833_v6 = vsel %vm748_vm2, %v832_v3, %v808_v44 }
 0x431   :  { %v835_v7 = vsel %vm747_vm3, 0, %v833_v6 }
 0x432   :  { %v812_v46 = vsub.s32 0, %v810_v45  ;;  %v839_v8 = vadd.s32 3, %v835_v7 }
 0x434   :  { %v980_v47 = vmin.u32 %v812_v46, %v810_v45  ;;  %v840_v10 = vand.u32 3, %v839_v8 }
 0x436   :  { %v814_v48 = vclz %v980_v47  ;;  %vm845_vm4 = vcmp.eq.s32.totalorder %v840_v10, 2  ;;  %vm842_vm5 = vcmp.eq.s32.totalorder %v840_v10, 0  ;;  %vm841_vm6 = vcmp.lt.s32.totalorder %v840_v10, 2 }
 0x438   :  { %v981_v49 = vadd.s32 4294967294, %v814_v48 }
 0x43a   :  { %vm982_vm0 = vcmp.lt.s32.totalorder %v981_v49, 0 }
 0x43b   :  { %v817_v50 = vsel %vm982_vm0, 0, %v981_v49 }
 0x43c   :  { %v818_v23 = vsub.s32 32, %v817_v50  ;;  %v822_v53 = vsub.s32 4294967266, %v817_v50  ;;  %v819_v55 = vshll.u32 %v810_v45, %v817_v50 }
 0x43e   :  { %v820_v56 = vshrl.u32 %v802_v51, %v818_v23  ;;  %v823_v15 = vadd.s32 127, %v822_v53 }
 0x440   :  { %v821_v57 = vor.u32 %v820_v56, %v819_v55  ;;  %v824_v59 = vshll.u32 %v823_v15, 23 }
 0x442   :  { %v825_v60 = vor.u32 4788187, %v824_v59  ;;  %v828_v2 = vcvt.s32.f32 %v821_v57 }
 0x444   :  { %v826_v61 = vand.u32 2147483647, %v825_v60 }
 0x446   :  { %v829_v63 = vmul.f32 %v828_v2, %v826_v61 }
 0x448   :  { %v830_v1 = vxor.u32 2147483648, %v829_v63 }
 0x44a   :  { %v831_v4 = vsel %vm748_vm2, %v830_v1, %v829_v63 }
 0x44b   :  { %v834_v5 = vsel %vm747_vm3, %v1541_v54, %v831_v4 }
 0x44c   :  { %1169 = vcosq.f32 %v834_v5 }
 0x44d   :  { %1171 = vsinq.f32 %v834_v5 }
 0x459   :  { %v1170_v11 = vpop.eup %1169 }
 0x45a   :  { %v1172_v12 = vpop.eup %1171  ;;  %v846_v13 = vxor.u32 2147483648, %v1170_v11 }
 0x45b   :  { %v843_v14 = vxor.u32 2147483648, %v1172_v12 }
 0x45c   :  { %v847_v16 = vsel %vm845_vm4, %v846_v13, %v1172_v12 }
 0x45d   :  { %v844_v17 = vsel %vm842_vm5, %v1170_v11, %v843_v14 }
 0x45e   :  { %v848_v62 = vsel %vm841_vm6, %v844_v17, %v847_v16 }
 0x45f   :  { %v849_v18 = vsel %vm838_vm7, nan, %v848_v62 }
 0x460   :  { %v874_v19 = vpack.c.bf16 %v849_v18, %v849_v18 }
 0x462   :  { %1105 = vmatmul.mubr.bf16.vlgmr.msra.gmra.mxu0 %v874_v19 }
 0x522   :  { %v916_v21 = vpop.f32.mrf.mxu0 }
 0x523   :  { %v917_v31 = vadd.f32 %v983_v20, %v916_v21 }
 0x524   :  { %v1106_v58 = vpop.f32.mrf.mxu0 }
 0x525   :  { %923 = vst.msk [vmem:[#allocation2] sm:$0xff] %vm922_vm8, %v917_v31 }
 0x526   :  { %v919_v34 = vpop.f32.mrf.mxu0 }
 0x527   :  { %1184 = shalt.err (!%p1181_p4)
}
 0x528   :  { %933 = dma.vmem_to_hbm [thread:$0]  %s931_s12, 128, %s1590_s11, [#allocation3]   ;;  %v1107_v54 = vpop.f32.mrf.mxu0 }
 0x529   :  { %1193 = dma.done.wait [#allocation3], 128  }
 0x52a   :  { %1194 = vsyncadd [#allocation3], 4294967168 }
 0x52b   :  { %937 = vsyncpa [#allocation3], 1 }

// kernel: fourier_features_forward.2
= control target key start
LH: loop header
LB: loop body
LE: loop exit
PB: predicated region body
PF: predicated region fallthrough
CT: control target
= control target key end

     0   :  { %s4086_s6 = inlined_call_operand.vmem [shape: f32[1024,8], index: 6, kind: input, shape index: {}]   ;;  %s4087_s0 = inlined_call_operand.<no memory space> [shape: f32[1], index: 0, kind: input, shape index: {}]   ;;  %s4088_s1 = inlined_call_operand.vmem [shape: f32[1,512], index: 1, kind: input, shape index: {}]   ;;  %s4089_s2 = inlined_call_operand.vmem [shape: f32[128,1024], index: 2, kind: input, shape index: {}]   ;;  %s4090_s3 = inlined_call_operand.vmem [shape: f32[1,1024], index: 3, kind: input, shape index: {}]   ;;  %s4091_s4 = inlined_call_operand.vmem [shape: f32[128,8], index: 4, kind: input, shape index: {}]   ;;  %s4092_s7 = inlined_call_operand.vmem [shape: f32[128,8], index: 7, kind: output, shape index: {0}]   ;;  %s4093_s5 = inlined_call_operand.vmem [shape: f32[1,8], index: 5, kind: input, shape index: {}]   ;;  %s4094_s8 = inlined_call_operand.vmem [shape: f32[1,8], index: 8, kind: output, shape index: {1}]  }
   0x1   :  { %v601_v0 = vld [vmem:[%s4086_s6 + $0xf8] sm:$0xff]  ;;  %v600_v3 = vld [vmem:[%s4086_s6 + $0xf0] sm:$0xff]  ;;  %v599_v7 = vld [vmem:[%s4086_s6 + $0xe8] sm:$0xff]  ;;  %v31_v44 = vstv %s4087_s0 }
   0x2   :  { %v585_v1 = vld [vmem:[%s4086_s6 + $0x78] sm:$0xff]  ;;  %1831 = vmatprep.subr.mxu0 %v601_v0  ;;  %v584_v5 = vld [vmem:[%s4086_s6 + $0x70] sm:$0xff]  ;;  %v583_v9 = vld [vmem:[%s4086_s6 + $0x68] sm:$0xff] }
   0x3   :  { %v633_v2 = vld [vmem:[%s4086_s6 + $0x1f8] sm:$0xff]  ;;  %1832 = vmatpush3.msra.mxu0 %v585_v1  ;;  %v632_v6 = vld [vmem:[%s4086_s6 + $0x1f0] sm:$0xff]  ;;  %v631_v10 = vld [vmem:[%s4086_s6 + $0x1e8] sm:$0xff] }
   0x4   :  { %1911 = vmatprep.subr.mxu1 %v633_v2  ;;  %v617_v4 = vld [vmem:[%s4086_s6 + $0x178] sm:$0xff]  ;;  %v616_v8 = vld [vmem:[%s4086_s6 + $0x170] sm:$0xff]  ;;  %1833 = vmatprep.subr.mxu0 %v600_v3  ;;  %v598_v11 = vld [vmem:[%s4086_s6 + $0xe0] sm:$0xff] }
   0x5   :  { %1912 = vmatpush3.msra.mxu1 %v617_v4  ;;  %1834 = vmatpush3.msra.mxu0 %v584_v5  ;;  %v615_v12 = vld [vmem:[%s4086_s6 + $0x168] sm:$0xff]  ;;  %v630_v13 = vld [vmem:[%s4086_s6 + $0x1e0] sm:$0xff]  ;;  %v597_v16 = vld [vmem:[%s4086_s6 + $0xd8] sm:$0xff] }
   0x6   :  { %1913 = vmatprep.subr.mxu1 %v632_v6  ;;  %1835 = vmatprep.subr.mxu0 %v599_v7  ;;  %v582_v14 = vld [vmem:[%s4086_s6 + $0x60] sm:$0xff]  ;;  %v629_v17 = vld [vmem:[%s4086_s6 + $0x1d8] sm:$0xff]  ;;  %v596_v20 = vld [vmem:[%s4086_s6 + $0xd0] sm:$0xff] }
   0x7   :  { %1914 = vmatpush3.msra.mxu1 %v616_v8  ;;  %v614_v15 = vld [vmem:[%s4086_s6 + $0x160] sm:$0xff]  ;;  %1836 = vmatpush3.msra.mxu0 %v583_v9  ;;  %v581_v18 = vld [vmem:[%s4086_s6 + $0x58] sm:$0xff]  ;;  %v628_v21 = vld [vmem:[%s4086_s6 + $0x1d0] sm:$0xff] }
   0x8   :  { %1915 = vmatprep.subr.mxu1 %v631_v10  ;;  %1837 = vmatprep.subr.mxu0 %v598_v11  ;;  %v613_v19 = vld [vmem:[%s4086_s6 + $0x158] sm:$0xff]  ;;  %v580_v22 = vld [vmem:[%s4086_s6 + $0x50] sm:$0xff]  ;;  %v595_v24 = vld [vmem:[%s4086_s6 + $0xc8] sm:$0xff] }
   0x9   :  { %1916 = vmatpush3.msra.mxu1 %v615_v12  ;;  %1838 = vmatpush3.msra.mxu0 %v582_v14  ;;  %v612_v23 = vld [vmem:[%s4086_s6 + $0x150] sm:$0xff]  ;;  %v627_v25 = vld [vmem:[%s4086_s6 + $0x1c8] sm:$0xff]  ;;  %v594_v28 = vld [vmem:[%s4086_s6 + $0xc0] sm:$0xff] }
   0xa   :  { %1917 = vmatprep.subr.mxu1 %v630_v13  ;;  %1839 = vmatprep.subr.mxu0 %v597_v16  ;;  %v579_v26 = vld [vmem:[%s4086_s6 + $0x48] sm:$0xff]  ;;  %v626_v29 = vld [vmem:[%s4086_s6 + $0x1c0] sm:$0xff]  ;;  %v593_v32 = vld [vmem:[%s4086_s6 + $0xb8] sm:$0xff]  ;;  %v2306_v16 = vmov 683565275  }
   0xb   :  { %1918 = vmatpush3.msra.mxu1 %v614_v15  ;;  %1840 = vmatpush3.msra.mxu0 %v581_v18  ;;  %v611_v27 = vld [vmem:[%s4086_s6 + $0x148] sm:$0xff]  ;;  %v578_v30 = vld [vmem:[%s4086_s6 + $0x40] sm:$0xff]  ;;  %v625_v33 = vld [vmem:[%s4086_s6 + $0x1b8] sm:$0xff]  ;;  %v2307_v18 = vmov 2475754826  }
   0xc   :  { %1919 = vmatprep.subr.mxu1 %v629_v17  ;;  %1841 = vmatprep.subr.mxu0 %v596_v20  ;;  %v610_v31 = vld [vmem:[%s4086_s6 + $0x140] sm:$0xff]  ;;  %v577_v34 = vld [vmem:[%s4086_s6 + $0x38] sm:$0xff]  ;;  %v592_v36 = vld [vmem:[%s4086_s6 + $0xb0] sm:$0xff]  ;;  %v2308_v20 = vmov 2131351028  }
   0xd   :  { %1920 = vmatpush3.msra.mxu1 %v613_v19  ;;  %1842 = vmatpush3.msra.mxu0 %v580_v22  ;;  %v609_v35 = vld [vmem:[%s4086_s6 + $0x138] sm:$0xff]  ;;  %v624_v37 = vld [vmem:[%s4086_s6 + $0x1b0] sm:$0xff]  ;;  %v591_v40 = vld [vmem:[%s4086_s6 + $0xa8] sm:$0xff]  ;;  %v2309_v22 = vmov 2102212464  }
   0xe   :  { %1921 = vmatprep.subr.mxu1 %v628_v21  ;;  %1843 = vmatprep.subr.mxu0 %v595_v24  ;;  %v576_v38 = vld [vmem:[%s4086_s6 + $0x30] sm:$0xff]  ;;  %v623_v41 = vld [vmem:[%s4086_s6 + $0x1a8] sm:$0xff]  ;;  %v590_v45 = vld [vmem:[%s4086_s6 + $0xa0] sm:$0xff]  ;;  %v2310_v24 = vmov 920167782  }
   0xf   :  { %1922 = vmatpush3.msra.mxu1 %v612_v23  ;;  %1844 = vmatpush3.msra.mxu0 %v579_v26  ;;  %v608_v39 = vld [vmem:[%s4086_s6 + $0x130] sm:$0xff]  ;;  %v575_v42 = vld [vmem:[%s4086_s6 + $0x28] sm:$0xff]  ;;  %v622_v46 = vld [vmem:[%s4086_s6 + $0x1a0] sm:$0xff] }
  0x10   :  { %1923 = vmatprep.subr.mxu1 %v627_v25  ;;  %1845 = vmatprep.subr.mxu0 %v594_v28  ;;  %v607_v43 = vld [vmem:[%s4086_s6 + $0x128] sm:$0xff]  ;;  %v574_v47 = vld [vmem:[%s4086_s6 + $0x20] sm:$0xff]  ;;  %v589_v50 = vld [vmem:[%s4086_s6 + $0x98] sm:$0xff] }
  0x11   :  { %1924 = vmatpush3.msra.mxu1 %v611_v27  ;;  %1846 = vmatpush3.msra.mxu0 %v578_v30  ;;  %v606_v48 = vld [vmem:[%s4086_s6 + $0x120] sm:$0xff]  ;;  %v621_v51 = vld [vmem:[%s4086_s6 + $0x198] sm:$0xff]  ;;  %v588_v55 = vld [vmem:[%s4086_s6 + $0x90] sm:$0xff] }
  0x12   :  { %1925 = vmatprep.subr.mxu1 %v626_v29  ;;  %1847 = vmatprep.subr.mxu0 %v593_v32  ;;  %v30_v49 = vld [vmem:[%s4088_s1] sm:$0xf]  ;;  %v573_v53 = vld [vmem:[%s4086_s6 + $0x18] sm:$0xff]  ;;  %v620_v56 = vld [vmem:[%s4086_s6 + $0x190] sm:$0xff] }
  0x13   :  { %1926 = vmatpush3.msra.mxu1 %v610_v31  ;;  %1848 = vmatpush3.msra.mxu0 %v577_v34  ;;  %v2514_v52 = vmul.f32 %v31_v44, %v30_v49  ;;  %v605_v54 = vld [vmem:[%s4086_s6 + $0x118] sm:$0xff]  ;;  %v572_v58 = vld [vmem:[%s4086_s6 + $0x10] sm:$0xff]  ;;  %v587_v60 = vld [vmem:[%s4086_s6 + $0x88] sm:$0xff]  ;;  %v2311_v31 = vmov 1326507024  }
  0x14   :  { %1927 = vmatprep.subr.mxu1 %v625_v33  ;;  %1849 = vmatprep.subr.mxu0 %v592_v36  ;;  %v604_v59 = vld [vmem:[%s4086_s6 + $0x110] sm:$0xff]  ;;  %v619_v61 = vld [vmem:[%s4086_s6 + $0x188] sm:$0xff]  ;;  %v586_v2 = vld [vmem:[%s4086_s6 + $0x80] sm:$0xff] }
  0x15   :  { %1928 = vmatpush3.msra.mxu1 %v609_v35  ;;  %1850 = vmatpush3.msra.mxu0 %v576_v38  ;;  %v36_v57 = vand.u32 2139095040, %v2514_v52  ;;  %v571_v63 = vld [vmem:[%s4086_s6 + $0x8] sm:$0xff]  ;;  %v33_v1 = vand.u32 2147483647, %v2514_v52  ;;  %v618_v3 = vld [vmem:[%s4086_s6 + $0x180] sm:$0xff]  ;;  %v665_v8 = vld [vmem:[%s4086_s6 + $0x2f8] sm:$0xff]  ;;  %vm125_vm15 = vweird.f32 %v2514_v52 }
  0x16   :  { %1929 = vmatprep.subr.mxu1 %v624_v37  ;;  %1851 = vmatprep.subr.mxu0 %v591_v40  ;;  %v603_v0 = vld [vmem:[%s4086_s6 + $0x108] sm:$0xff]  ;;  %v570_v5 = vld [vmem:[%s4086_s6] sm:$0xff]  ;;  %v697_v9 = vld [vmem:[%s4086_s6 + $0x3f8] sm:$0xff]  ;;  %vm35_vm7 = vcmp.lt.s32.totalorder %v2514_v52, 0 }
  0x17   :  { %1930 = vmatpush3.msra.mxu1 %v608_v39  ;;  %1852 = vmatpush3.msra.mxu0 %v575_v42  ;;  %v37_v62 = vshrl.u32 %v36_v57, 23  ;;  %v602_v6 = vld [vmem:[%s4086_s6 + $0x100] sm:$0xff]  ;;  %v40_v10 = vand.u32 8388607, %v33_v1  ;;  %vm34_vm8 = vcmp.le.f32.partialorder %v33_v1, 0.7853982 }
  0x18   :  { %1931 = vmatprep.subr.mxu1 %v623_v41  ;;  %1853 = vmatprep.subr.mxu0 %v590_v45 }
  0x19   :  { %1932 = vmatpush3.msra.mxu1 %v607_v43  ;;  %1854 = vmatpush3.msra.mxu0 %v574_v47  ;;  %v1823_v4 = vadd.s32 4294967169, %v37_v62  ;;  %v41_v13 = vor.u32 8388608, %v40_v10 }
  0x1a   :  { %1933 = vmatprep.subr.mxu1 %v622_v46  ;;  %1855 = vmatprep.subr.mxu0 %v589_v50 }
  0x1b   :  { %1934 = vmatpush3.msra.mxu1 %v606_v48  ;;  %1856 = vmatpush3.msra.mxu0 %v573_v53  ;;  %v43_v7 = vadd.s32 1, %v1823_v4  ;;  %v81_v33 = vshll.u32 %v41_v13, 8 }
  0x1c   :  { %1935 = vmatprep.subr.mxu1 %v621_v51  ;;  %1857 = vmatprep.subr.mxu0 %v588_v55 }
  0x1d   :  { %1936 = vmatpush3.msra.mxu1 %v605_v54  ;;  %1858 = vmatpush3.msra.mxu0 %v572_v58  ;;  %vm44_vm0 = vcmp.gt.s32.totalorder %v43_v7, 0 }
  0x1e   :  { %1937 = vmatprep.subr.mxu1 %v620_v56  ;;  %1859 = vmatprep.subr.mxu0 %v587_v60  ;;  %v45_v11 = vsel %vm44_vm0, %v43_v7, 0  ;;  %vm1294_vm0 = vcmask 64512  }
  0x1f   :  { %1938 = vmatpush3.msra.mxu1 %v604_v59  ;;  %1860 = vmatpush3.msra.mxu0 %v571_v63  ;;  %v47_v12 = vand.u32 31, %v45_v11  ;;  %v46_v14 = vshrl.u32 %v45_v11, 5 }
  0x20   :  { %1939 = vmatprep.subr.mxu1 %v619_v61  ;;  %1861 = vmatprep.subr.mxu0 %v586_v2 }
  0x21   :  { %1940 = vmatpush3.msra.mxu1 %v603_v0  ;;  %1862 = vmatpush3.msra.mxu0 %v570_v5  ;;  %v48_v15 = vsub.s32 32, %v47_v12  ;;  %v50_v17 = vshll.u32 %v2306_v16, %v47_v12  ;;  %v53_v19 = vshll.u32 %v2307_v18, %v47_v12  ;;  %v56_v21 = vshll.u32 %v2308_v20, %v47_v12 }
  0x22   :  { %1941 = vmatprep.subr.mxu1 %v618_v3  ;;  %1991 = vmatprep.subr.mxu0 %v665_v8  ;;  %v59_v23 = vshll.u32 %v2309_v22, %v47_v12  ;;  %v62_v25 = vshll.u32 %v2310_v24, %v47_v12  ;;  %vm65_vm1 = vcmp.lt.s32.totalorder %v46_v14, 1  ;;  %vm68_vm2 = vcmp.lt.s32.totalorder %v46_v14, 4 }
  0x23   :  { %1942 = vmatpush3.msra.mxu1 %v602_v6  ;;  %v49_v26 = vshrl.u32 %v2306_v16, %v48_v15  ;;  %v51_v27 = vshrl.u32 %v2307_v18, %v48_v15  ;;  %v54_v28 = vshrl.u32 %v2308_v20, %v48_v15  ;;  %v57_v29 = vshrl.u32 %v2309_v22, %v48_v15 }
  0x24   :  { %2071 = vmatprep.subr.mxu1 %v697_v9  ;;  %v60_v30 = vshrl.u32 %v2310_v24, %v48_v15  ;;  %v63_v32 = vshrl.u32 %v2311_v31, %v48_v15  ;;  %vm66_vm3 = vcmp.lt.s32.totalorder %v46_v14, 2  ;;  %vm67_vm4 = vcmp.lt.s32.totalorder %v46_v14, 3 }
  0x25   :  { %v52_v34 = vor.u32 %v51_v27, %v50_v17  ;;  %v55_v35 = vor.u32 %v54_v28, %v53_v19  ;;  %v58_v36 = vor.u32 %v57_v29, %v56_v21 }
  0x26   :  { %v61_v37 = vor.u32 %v60_v30, %v59_v23  ;;  %v64_v38 = vor.u32 %v63_v32, %v62_v25  ;;  %v241_v25 = vlaneseq }
  0x27   :  { %v69_v39 = vsel %vm65_vm1, %v49_v26, %v52_v34  ;;  %v70_v40 = vsel %vm68_vm2, %v58_v36, 2102212464  ;;  %v73_v41 = vsel %vm65_vm1, %v52_v34, %v55_v35  ;;  %v77_v42 = vsel %vm65_vm1, %v55_v35, %v58_v36 }
  0x28   :  { %v71_v43 = vsel %vm67_vm4, %v55_v35, %v70_v40  ;;  %v74_v44 = vsel %vm68_vm2, %v61_v37, 920167782  ;;  %v78_v45 = vsel %vm68_vm2, %v64_v38, 1326507024  ;;  %v2582_v28 = vshrl.u32 %v241_v25, 7  ;;  %v307_v25 = vld [vmem:[%s4089_s2 + $0xc8] sm:$0xff] }
  0x29   :  { %v75_v46 = vsel %vm67_vm4, %v58_v36, %v74_v44  ;;  %v79_v47 = vsel %vm67_vm4, %v61_v37, %v78_v45  ;;  %v72_v48 = vsel %vm66_vm3, %v69_v39, %v71_v43  ;;  %vm1813_vm1 = vcmask 57344  }
  0x2a   :  { %v76_v49 = vsel %vm66_vm3, %v73_v41, %v75_v46  ;;  %v80_v50 = vsel %vm66_vm3, %v77_v42, %v79_v47  ;;  %v88_v56 = vmul.u32 %v81_v33, %v72_v48  ;;  %v2585_v31 = vsub.s32 0, %v2582_v28  ;;  %v283_v47 = vld [vmem:[%s4089_s2 + $0x8] sm:$0xff]  ;;  %v285_v48 = vld [vmem:[%s4089_s2 + $0x18] sm:$0xff] }
  0x2b   :  { %v2568_v51 = vmul.u32.u64.low %v81_v33, %v80_v50  ;;  %v2569_v53 = vmul.u32.u64.high %v81_v33, %v80_v50, %v2568_v51  ;;  %v2571_v54 = vmul.u32.u64.low %v81_v33, %v76_v49  ;;  %v2572_v55 = vmul.u32.u64.high %v81_v33, %v76_v49, %v2571_v54  ;;  %v282_v49 = vld [vmem:[%s4089_s2] sm:$0xff] }
  0x2c   :  { %v2588_v33 = vsub.s32 1, %v2582_v28  ;;  %v2592_v36 = vsub.s32 3, %v2582_v28  ;;  %v2595_v39 = vsub.s32 2, %v2582_v28 }
  0x2d   :  { %vm90_vm5 = vc.u32 %v2569_v53, %v2571_v54  ;;  %v91_v57 = vadd.s32 1, %v2572_v55  ;;  %v89_v5 = vadd.s32 %v2571_v54, %v2569_v53 }
  0x2f   :  { %v92_v58 = vsel %vm90_vm5, %v91_v57, %v2572_v55 }
  0x30   :  { %v93_v59 = vadd.s32 %v92_v58, %v88_v56  ;;  %v284_v58 = vld [vmem:[%s4089_s2 + $0x10] sm:$0xff] }
  0x32   :  { %v94_v60 = vadd.s32 536870912, %v93_v59 }
  0x34   :  { %v95_v61 = vshrl.u32 %v94_v60, 30  ;;  %v293_v60 = vld [vmem:[%s4089_s2 + $0x58] sm:$0xff] }
  0x36   :  { %v96_v62 = vshll.u32 %v95_v61, 30  ;;  %v119_v18 = vsub.s32 4, %v95_v61 }
  0x38   :  { %v97_v63 = vsub.s32 %v93_v59, %v96_v62  ;;  %v120_v21 = vsel %vm35_vm7, %v119_v18, %v95_v61  ;;  %v291_v59 = vld [vmem:[%s4089_s2 + $0x48] sm:$0xff]  ;;  %v696_v18 = vld [vmem:[%s4086_s6 + $0x3f0] sm:$0xff] }
  0x39   :  { %v122_v23 = vsel %vm34_vm8, 0, %v120_v21  ;;  %v648_v21 = vld [vmem:[%s4086_s6 + $0x270] sm:$0xff] }
  0x3a   :  { %v99_v0 = vsub.s32 0, %v97_v63  ;;  %v126_v24 = vadd.s32 3, %v122_v23  ;;  %v230_v27 = vand.u32 3, %v122_v23 }
  0x3c   :  { %v1824_v2 = vmin.u32 %v99_v0, %v97_v63  ;;  %v127_v26 = vand.u32 3, %v126_v24  ;;  %vm235_vm10 = vcmp.eq.s32.totalorder %v230_v27, 2  ;;  %vm232_vm12 = vcmp.eq.s32.totalorder %v230_v27, 0 }
  0x3d   :  { %vm231_vm14 = vcmp.lt.s32.totalorder %v230_v27, 2  ;;  %v663_v27 = vld [vmem:[%s4086_s6 + $0x2e8] sm:$0xff] }
  0x3e   :  { %v101_v3 = vclz %v1824_v2  ;;  %vm132_vm9 = vcmp.eq.s32.totalorder %v127_v26, 2  ;;  %vm129_vm11 = vcmp.eq.s32.totalorder %v127_v26, 0  ;;  %vm128_vm13 = vcmp.lt.s32.totalorder %v127_v26, 2  ;;  %v309_v26 = vld [vmem:[%s4089_s2 + $0xd8] sm:$0xff] }
  0x40   :  { %v1825_v4 = vadd.s32 4294967294, %v101_v3 }
  0x42   :  { %vm1826_vm6 = vcmp.lt.s32.totalorder %v1825_v4, 0 }
  0x43   :  { %v104_v6 = vsel %vm1826_vm6, 0, %v1825_v4 }
  0x44   :  { %v105_v7 = vsub.s32 32, %v104_v6  ;;  %v106_v8 = vshll.u32 %v97_v63, %v104_v6  ;;  %v109_v9 = vsub.s32 4294967266, %v104_v6  ;;  %v290_v6 = vld [vmem:[%s4089_s2 + $0x40] sm:$0xff] }
  0x46   :  { %v107_v10 = vshrl.u32 %v89_v5, %v105_v7  ;;  %v110_v11 = vadd.s32 127, %v109_v9  ;;  %v292_v7 = vld [vmem:[%s4089_s2 + $0x50] sm:$0xff]  ;;  %v649_v9 = vld [vmem:[%s4086_s6 + $0x278] sm:$0xff] }
  0x48   :  { %v108_v12 = vor.u32 %v107_v10, %v106_v8  ;;  %v111_v13 = vshll.u32 %v110_v11, 23  ;;  %v681_v10 = vld [vmem:[%s4086_s6 + $0x378] sm:$0xff] }
  0x4a   :  { %v112_v14 = vor.u32 4788187, %v111_v13  ;;  %v115_v15 = vcvt.s32.f32 %v108_v12  ;;  %v299_v13 = vld [vmem:[%s4089_s2 + $0x88] sm:$0xff] }
  0x4c   :  { %v113_v16 = vand.u32 2147483647, %v112_v14  ;;  %v301_v14 = vld [vmem:[%s4089_s2 + $0x98] sm:$0xff] }
  0x4e   :  { %v116_v17 = vmul.f32 %v115_v15, %v113_v16  ;;  %v664_v15 = vld [vmem:[%s4086_s6 + $0x2f0] sm:$0xff] }
  0x50   :  { %v117_v19 = vxor.u32 2147483648, %v116_v17 }
  0x52   :  { %v118_v20 = vsel %vm35_vm7, %v117_v19, %v116_v17  ;;  %v298_v19 = vld [vmem:[%s4089_s2 + $0x80] sm:$0xff] }
  0x53   :  { %v121_v22 = vsel %vm34_vm8, %v2514_v52, %v118_v20  ;;  %v300_v20 = vld [vmem:[%s4089_s2 + $0x90] sm:$0xff] }
  0x54   :  { %2302 = vcosq.f32 %v121_v22 }
  0x55   :  { %2304 = vsinq.f32 %v121_v22  ;;  %v680_v22 = vld [vmem:[%s4086_s6 + $0x370] sm:$0xff] }
  0x61   :  { %v2303_v29 = vpop.eup %2302 }
  0x62   :  { %v2305_v30 = vpop.eup %2304  ;;  %v133_v1 = vxor.u32 2147483648, %v2303_v29 }
  0x63   :  { %v130_v32 = vxor.u32 2147483648, %v2305_v30 }
  0x64   :  { %v134_v34 = vsel %vm132_vm9, %v133_v1, %v2305_v30  ;;  %v237_v35 = vsel %vm235_vm10, %v133_v1, %v2305_v30  ;;  %v695_v1 = vld [vmem:[%s4086_s6 + $0x3e8] sm:$0xff] }
  0x65   :  { %v131_v37 = vsel %vm129_vm11, %v2303_v29, %v130_v32  ;;  %v234_v38 = vsel %vm232_vm12, %v2303_v29, %v130_v32  ;;  %v306_v32 = vld [vmem:[%s4089_s2 + $0xc0] sm:$0xff] }
  0x66   :  { %v135_v40 = vsel %vm128_vm13, %v131_v37, %v134_v34  ;;  %v238_v41 = vsel %vm231_vm14, %v234_v38, %v237_v35  ;;  %v308_v34 = vld [vmem:[%s4089_s2 + $0xd0] sm:$0xff]  ;;  %v647_v35 = vld [vmem:[%s4086_s6 + $0x268] sm:$0xff] }
  0x67   :  { %v136_v42 = vsel %vm125_vm15, nan, %v135_v40  ;;  %v239_v43 = vsel %vm125_vm15, nan, %v238_v41  ;;  %v679_v37 = vld [vmem:[%s4086_s6 + $0x368] sm:$0xff] }
  0x68   :  { %v2598_v44 = vrot.slane %v136_v42, %v2588_v33  ;;  %v2601_v45 = vrot.slane %v239_v43, %v2585_v31  ;;  %v2604_v52 = vrot.slane %v136_v42, %v2592_v36  ;;  %v2607_v46 = vrot.slane %v136_v42, %v2585_v31  ;;  %v315_v41 = vld [vmem:[%s4089_s2 + $0x108] sm:$0xff] }
  0x69   :  { %v2619_v50 = vrot.slane %v136_v42, %v2595_v39  ;;  %v2622_v51 = vrot.slane %v239_v43, %v2588_v33  ;;  %v2625_v53 = vrot.slane %v239_v43, %v2592_v36  ;;  %v2628_v54 = vrot.slane %v239_v43, %v2595_v39  ;;  %v317_v42 = vld [vmem:[%s4089_s2 + $0x118] sm:$0xff]  ;;  %v662_v43 = vld [vmem:[%s4086_s6 + $0x2e0] sm:$0xff] }
  0x6a   :  { %v2632_v55 = vrot.slane %v2598_v44, %v2585_v31  ;;  %v2636_v56 = vrot.slane %v2604_v52, %v2585_v31  ;;  %v2640_v57 = vrot.slane %v2607_v46, %v2585_v31  ;;  %v2653_v61 = vrot.slane %v2601_v45, %v2585_v31 }
  0x6b   :  { %v2657_v62 = vrot.slane %v2619_v50, %v2585_v31  ;;  %v2661_v63 = vrot.slane %v2622_v51, %v2585_v31  ;;  %v2665_v0 = vrot.slane %v2625_v53, %v2585_v31  ;;  %v2669_v2 = vrot.slane %v2628_v54, %v2585_v31 }
  0x6c   :  { %v443_v3 = vmul.f32 %v2632_v55, %v283_v47  ;;  %v445_v4 = vmul.f32 %v2636_v56, %v285_v48  ;;  %v442_v5 = vmul.f32 %v2640_v57, %v282_v49  ;;  %v451_v11 = vmul.f32 %v2632_v55, %v291_v59  ;;  %v694_v49 = vld [vmem:[%s4086_s6 + $0x3e0] sm:$0xff]  ;;  %v316_v59 = vld [vmem:[%s4089_s2 + $0x110] sm:$0xff] }
  0x6d   :  { %v444_v8 = vmul.f32 %v2657_v62, %v284_v58  ;;  %v453_v12 = vmul.f32 %v2636_v56, %v293_v60  ;;  %v450_v16 = vmul.f32 %v2640_v57, %v290_v6  ;;  %v452_v17 = vmul.f32 %v2657_v62, %v292_v7  ;;  %v314_v58 = vld [vmem:[%s4089_s2 + $0x100] sm:$0xff]  ;;  %v323_v6 = vld [vmem:[%s4089_s2 + $0x148] sm:$0xff]  ;;  %v325_v7 = vld [vmem:[%s4089_s2 + $0x158] sm:$0xff] }
  0x6e   :  { %778 = vmatprep.mubr.f32.mxu0 %v443_v3  ;;  %923 = vmatprep.mubr.f32.mxu1 %v445_v4  ;;  %v459_v23 = vmul.f32 %v2632_v55, %v299_v13  ;;  %v461_v24 = vmul.f32 %v2636_v56, %v301_v14  ;;  %v458_v29 = vmul.f32 %v2640_v57, %v298_v19  ;;  %v646_v60 = vld [vmem:[%s4086_s6 + $0x260] sm:$0xff]  ;;  %v324_v13 = vld [vmem:[%s4089_s2 + $0x150] sm:$0xff]  ;;  %v645_v14 = vld [vmem:[%s4086_s6 + $0x258] sm:$0xff] }
  0x6f   :  { %779 = vmatmul.mubr.f32.vlgmr.msra.gmra.mxu0 %v442_v5  ;;  %924 = vmatmul.mubr.f32.vlgmr.msra.gmra.mxu1 %v444_v8  ;;  %v460_v30 = vmul.f32 %v2657_v62, %v300_v20  ;;  %v467_v38 = vmul.f32 %v2632_v55, %v307_v25  ;;  %v469_v40 = vmul.f32 %v2636_v56, %v309_v26  ;;  %v678_v3 = vld [vmem:[%s4086_s6 + $0x360] sm:$0xff]  ;;  %v661_v8 = vld [vmem:[%s4086_s6 + $0x2d8] sm:$0xff]  ;;  %v660_v20 = vld [vmem:[%s4086_s6 + $0x2d0] sm:$0xff] }
  0x70   :  { %1992 = vmatpush3.msra.mxu0 %v649_v9  ;;  %2072 = vmatpush3.msra.mxu1 %v681_v10  ;;  %v466_v47 = vmul.f32 %v2640_v57, %v306_v32  ;;  %v468_v48 = vmul.f32 %v2657_v62, %v308_v34  ;;  %v475_v4 = vmul.f32 %v2632_v55, %v315_v41  ;;  %v333_v19 = vld [vmem:[%s4089_s2 + $0x198] sm:$0xff]  ;;  %v332_v25 = vld [vmem:[%s4089_s2 + $0x190] sm:$0xff]  ;;  %v659_v34 = vld [vmem:[%s4086_s6 + $0x2c8] sm:$0xff] }
  0x71   :  { %783 = vmatprep.mubr.f32.mxu0 %v451_v11  ;;  %928 = vmatprep.mubr.f32.mxu1 %v453_v12  ;;  %v477_v5 = vmul.f32 %v2636_v56, %v317_v42  ;;  %v474_v9 = vmul.f32 %v2640_v57, %v314_v58  ;;  %v476_v10 = vmul.f32 %v2657_v62, %v316_v59  ;;  %v693_v11 = vld [vmem:[%s4086_s6 + $0x3d8] sm:$0xff]  ;;  %v322_v12 = vld [vmem:[%s4089_s2 + $0x140] sm:$0xff]  ;;  %v644_v26 = vld [vmem:[%s4086_s6 + $0x250] sm:$0xff] }
  0x72   :  { %1993 = vmatprep.subr.mxu0 %v664_v15  ;;  %2073 = vmatprep.subr.mxu1 %v696_v18  ;;  %v677_v15 = vld [vmem:[%s4086_s6 + $0x358] sm:$0xff]  ;;  %v331_v18 = vld [vmem:[%s4089_s2 + $0x188] sm:$0xff]  ;;  %v340_v41 = vld [vmem:[%s4089_s2 + $0x1d0] sm:$0xff] }
  0x73   :  { %784 = vmatmul.mubr.f32.gmra.mxu0 %v450_v16  ;;  %929 = vmatmul.mubr.f32.gmra.mxu1 %v452_v17  ;;  %v483_v16 = vmul.f32 %v2632_v55, %v323_v6  ;;  %v485_v17 = vmul.f32 %v2636_v56, %v325_v7  ;;  %v341_v32 = vld [vmem:[%s4089_s2 + $0x1d8] sm:$0xff]  ;;  %v643_v42 = vld [vmem:[%s4086_s6 + $0x248] sm:$0xff]  ;;  %v658_v59 = vld [vmem:[%s4086_s6 + $0x2c0] sm:$0xff] }
  0x74   :  { %1994 = vmatpush3.msra.mxu0 %v648_v21  ;;  %2074 = vmatpush3.msra.mxu1 %v680_v22  ;;  %v482_v21 = vmul.f32 %v2640_v57, %v322_v12  ;;  %v484_v22 = vmul.f32 %v2657_v62, %v324_v13  ;;  %v349_v58 = vld [vmem:[%s4089_s2 + $0x218] sm:$0xff]  ;;  %v348_v6 = vld [vmem:[%s4089_s2 + $0x210] sm:$0xff]  ;;  %v642_v7 = vld [vmem:[%s4086_s6 + $0x240] sm:$0xff] }
  0x75   :  { %788 = vmatprep.mubr.f32.mxu0 %v459_v23  ;;  %933 = vmatprep.mubr.f32.mxu1 %v461_v24  ;;  %v692_v23 = vld [vmem:[%s4086_s6 + $0x3d0] sm:$0xff]  ;;  %v330_v24 = vld [vmem:[%s4089_s2 + $0x180] sm:$0xff]  ;;  %v357_v12 = vld [vmem:[%s4089_s2 + $0x258] sm:$0xff] }
  0x76   :  { %1995 = vmatprep.subr.mxu0 %v663_v27  ;;  %2075 = vmatprep.subr.mxu1 %v695_v1  ;;  %v676_v27 = vld [vmem:[%s4086_s6 + $0x350] sm:$0xff]  ;;  %v339_v1 = vld [vmem:[%s4089_s2 + $0x1c8] sm:$0xff]  ;;  %v657_v13 = vld [vmem:[%s4086_s6 + $0x2b8] sm:$0xff] }
  0x77   :  { %789 = vmatmul.mubr.f32.gmra.mxu0 %v458_v29  ;;  %934 = vmatmul.mubr.f32.gmra.mxu1 %v460_v30  ;;  %v491_v29 = vmul.f32 %v2632_v55, %v331_v18  ;;  %v493_v30 = vmul.f32 %v2636_v56, %v333_v19  ;;  %v356_v18 = vld [vmem:[%s4089_s2 + $0x250] sm:$0xff]  ;;  %v2312_v19 = vmov 1966171168  }
  0x78   :  { %1996 = vmatpush3.msra.mxu0 %v647_v35  ;;  %2076 = vmatpush3.msra.mxu1 %v679_v37  ;;  %v490_v35 = vmul.f32 %v2640_v57, %v330_v24  ;;  %v492_v37 = vmul.f32 %v2657_v62, %v332_v25  ;;  %v517_v24 = vmul.f32 %v2636_v56, %v357_v12  ;;  %v363_v25 = vld [vmem:[%s4089_s2 + $0x288] sm:$0xff] }
  0x79   :  { %793 = vmatprep.mubr.f32.mxu0 %v467_v38  ;;  %938 = vmatprep.mubr.f32.mxu1 %v469_v40  ;;  %v691_v38 = vld [vmem:[%s4086_s6 + $0x3c8] sm:$0xff]  ;;  %v338_v40 = vld [vmem:[%s4089_s2 + $0x1c0] sm:$0xff]  ;;  %v1314_v12 = vcombine.low %v2601_v45, %v2622_v51 }
  0x7a   :  { %1997 = vmatprep.subr.mxu0 %v662_v43  ;;  %2077 = vmatprep.subr.mxu1 %v694_v49  ;;  %v675_v43 = vld [vmem:[%s4086_s6 + $0x348] sm:$0xff]  ;;  %v378_v45 = vld [vmem:[%s4089_s2 + $0x300] sm:$0xff] }
  0x7b   :  { %794 = vmatmul.mubr.f32.gmra.mxu0 %v466_v47  ;;  %939 = vmatmul.mubr.f32.gmra.mxu1 %v468_v48  ;;  %v499_v47 = vmul.f32 %v2632_v55, %v339_v1  ;;  %v501_v48 = vmul.f32 %v2636_v56, %v341_v32  ;;  %v347_v49 = vld [vmem:[%s4089_s2 + $0x208] sm:$0xff]  ;;  %v688_v1 = vld [vmem:[%s4086_s6 + $0x3b0] sm:$0xff]  ;;  %v362_v32 = vld [vmem:[%s4089_s2 + $0x280] sm:$0xff] }
  0x7c   :  { %1998 = vmatpush3.msra.mxu0 %v646_v60  ;;  %2078 = vmatpush3.msra.mxu1 %v678_v3  ;;  %v498_v60 = vmul.f32 %v2640_v57, %v338_v40  ;;  %v500_v3 = vmul.f32 %v2657_v62, %v340_v41  ;;  %v523_v40 = vmul.f32 %v2632_v55, %v363_v25 }
  0x7d   :  { %798 = vmatprep.mubr.f32.mxu0 %v475_v4  ;;  %943 = vmatprep.mubr.f32.mxu1 %v477_v5  ;;  %v690_v4 = vld [vmem:[%s4086_s6 + $0x3c0] sm:$0xff] }
  0x7e   :  { %1999 = vmatprep.subr.mxu0 %v661_v8  ;;  %2079 = vmatprep.subr.mxu1 %v693_v11  ;;  %v346_v5 = vld [vmem:[%s4089_s2 + $0x200] sm:$0xff]  ;;  %v355_v11 = vld [vmem:[%s4089_s2 + $0x248] sm:$0xff] }
  0x7f   :  { %799 = vmatmul.mubr.f32.gmra.mxu0 %v474_v9  ;;  %944 = vmatmul.mubr.f32.gmra.mxu1 %v476_v10  ;;  %v674_v8 = vld [vmem:[%s4086_s6 + $0x340] sm:$0xff]  ;;  %v507_v9 = vmul.f32 %v2632_v55, %v347_v49  ;;  %v509_v10 = vmul.f32 %v2636_v56, %v349_v58  ;;  %v687_v58 = vld [vmem:[%s4086_s6 + $0x3a8] sm:$0xff] }
  0x80   :  { %2000 = vmatpush3.msra.mxu0 %v645_v14  ;;  %2080 = vmatpush3.msra.mxu1 %v677_v15  ;;  %v506_v14 = vmul.f32 %v2640_v57, %v346_v5  ;;  %v508_v15 = vmul.f32 %v2657_v62, %v348_v6  ;;  %v671_v5 = vld [vmem:[%s4086_s6 + $0x328] sm:$0xff] }
  0x81   :  { %803 = vmatprep.mubr.f32.mxu0 %v483_v16  ;;  %948 = vmatprep.mubr.f32.mxu1 %v485_v17  ;;  %v689_v16 = vld [vmem:[%s4086_s6 + $0x3b8] sm:$0xff]  ;;  %v354_v17 = vld [vmem:[%s4089_s2 + $0x240] sm:$0xff] }
  0x82   :  { %2001 = vmatprep.subr.mxu0 %v660_v20  ;;  %2081 = vmatprep.subr.mxu1 %v692_v23  ;;  %v1317_v20 = vunpack.c.l.s4 %v2312_v19  ;;  %v515_v23 = vmul.f32 %v2632_v55, %v355_v11  ;;  %v1313_v11 = vcombine.low %v2619_v50, %v2604_v52  ;;  %v1315_v52 = vcombine.low %v2628_v54, %v2625_v53  ;;  %v670_v53 = vld [vmem:[%s4086_s6 + $0x320] sm:$0xff] }
  0x83   :  { %804 = vmatmul.mubr.f32.gmra.mxu0 %v482_v21  ;;  %949 = vmatmul.mubr.f32.gmra.mxu1 %v484_v22  ;;  %v641_v21 = vld [vmem:[%s4086_s6 + $0x238] sm:$0xff] }
  0x84   :  { %2002 = vmatpush3.msra.mxu0 %v644_v26  ;;  %2082 = vmatpush3.msra.mxu1 %v676_v27  ;;  %v673_v22 = vld [vmem:[%s4086_s6 + $0x338] sm:$0xff]  ;;  %v656_v27 = vld [vmem:[%s4086_s6 + $0x2b0] sm:$0xff] }
  0x85   :  { %808 = vmatprep.mubr.f32.mxu0 %v491_v29  ;;  %953 = vmatprep.mubr.f32.mxu1 %v493_v30  ;;  %v365_v26 = vld [vmem:[%s4089_s2 + $0x298] sm:$0xff]  ;;  %v514_v29 = vmul.f32 %v2640_v57, %v354_v17  ;;  %v516_v30 = vmul.f32 %v2657_v62, %v356_v18  ;;  %v638_v17 = vld [vmem:[%s4086_s6 + $0x220] sm:$0xff] }
  0x86   :  { %2003 = vmatprep.subr.mxu0 %v659_v34  ;;  %2083 = vmatprep.subr.mxu1 %v691_v38  ;;  %v364_v34 = vld [vmem:[%s4089_s2 + $0x290] sm:$0xff]  ;;  %v525_v41 = vmul.f32 %v2636_v56, %v365_v26  ;;  %v685_v26 = vld [vmem:[%s4086_s6 + $0x398] sm:$0xff] }
  0x87   :  { %809 = vmatmul.mubr.f32.gmra.mxu0 %v490_v35  ;;  %954 = vmatmul.mubr.f32.gmra.mxu1 %v492_v37  ;;  %v1318_v35 = vunpack.c.0.s8 %v1317_v20  ;;  %v640_v37 = vld [vmem:[%s4086_s6 + $0x230] sm:$0xff]  ;;  %v524_v49 = vmul.f32 %v2657_v62, %v364_v34  ;;  %v387_v20 = vld [vmem:[%s4089_s2 + $0x348] sm:$0xff]  ;;  %v669_v34 = vld [vmem:[%s4086_s6 + $0x318] sm:$0xff] }
  0x88   :  { %2004 = vmatpush3.msra.mxu0 %v643_v42  ;;  %2084 = vmatpush3.msra.mxu1 %v675_v43  ;;  %v672_v38 = vld [vmem:[%s4086_s6 + $0x330] sm:$0xff]  ;;  %v371_v42 = vld [vmem:[%s4089_s2 + $0x2c8] sm:$0xff]  ;;  %v373_v43 = vld [vmem:[%s4089_s2 + $0x2d8] sm:$0xff] }
  0x89   :  { %813 = vmatprep.mubr.f32.mxu0 %v499_v47  ;;  %958 = vmatprep.mubr.f32.mxu1 %v501_v48  ;;  %v655_v47 = vld [vmem:[%s4086_s6 + $0x2a8] sm:$0xff]  ;;  %v522_v48 = vmul.f32 %v2640_v57, %v362_v32  ;;  %v531_v6 = vmul.f32 %v2632_v55, %v371_v42  ;;  %v637_v32 = vld [vmem:[%s4086_s6 + $0x218] sm:$0xff] }
  0x8a   :  { %2005 = vmatprep.subr.mxu0 %v658_v59  ;;  %2085 = vmatprep.subr.mxu1 %v690_v4  ;;  %v370_v59 = vld [vmem:[%s4089_s2 + $0x2c0] sm:$0xff]  ;;  %v639_v4 = vld [vmem:[%s4086_s6 + $0x228] sm:$0xff]  ;;  %v397_v42 = vld [vmem:[%s4089_s2 + $0x398] sm:$0xff] }
  0x8b   :  { %814 = vmatmul.mubr.f32.gmra.mxu0 %v498_v60  ;;  %959 = vmatmul.mubr.f32.gmra.mxu1 %v500_v3  ;;  %v372_v60 = vld [vmem:[%s4089_s2 + $0x2d0] sm:$0xff]  ;;  %v1321_v3 = vsub.s32 %v1318_v35, %v2582_v28  ;;  %v547_v35 = vmul.f32 %v2632_v55, %v387_v20  ;;  %v286_v20 = vld [vmem:[%s4089_s2 + $0x20] sm:$0xff] }
  0x8c   :  { %2006 = vmatpush3.msra.mxu0 %v642_v7  ;;  %2086 = vmatpush3.msra.mxu1 %v674_v8  ;;  %v533_v7 = vmul.f32 %v2636_v56, %v373_v43  ;;  %v379_v8 = vld [vmem:[%s4089_s2 + $0x308] sm:$0xff]  ;;  %v1311_v43 = vld [vmem:[%s4090_s3] sm:$0xff] }
  0x8d   :  { %818 = vmatprep.mubr.f32.mxu0 %v507_v9  ;;  %963 = vmatprep.mubr.f32.mxu1 %v509_v10  ;;  %v381_v9 = vld [vmem:[%s4089_s2 + $0x318] sm:$0xff]  ;;  %v1312_v10 = vcombine.low %v2607_v46, %v2598_v44  ;;  %v686_v44 = vld [vmem:[%s4086_s6 + $0x3a0] sm:$0xff]  ;;  %v380_v46 = vld [vmem:[%s4089_s2 + $0x310] sm:$0xff]  ;;  %v1329_v51 = vrot.slane %v1313_v11, %v1321_v3  ;;  %v539_v54 = vmul.f32 %v2632_v55, %v379_v8 }
  0x8e   :  { %2007 = vmatprep.subr.mxu0 %v657_v13  ;;  %2087 = vmatprep.subr.mxu1 %v689_v16  ;;  %v654_v13 = vld [vmem:[%s4086_s6 + $0x2a0] sm:$0xff]  ;;  %v1336_v16 = vrot.slane %v1314_v12, %v1321_v3  ;;  %v541_v18 = vmul.f32 %v2636_v56, %v381_v9  ;;  %v1343_v19 = vrot.slane %v1315_v52, %v1321_v3  ;;  %v405_v11 = vld [vmem:[%s4089_s2 + $0x3d8] sm:$0xff]  ;;  %v3085_v12 = vld [vmem:[%s4086_s6 + $0x288] sm:$0xff] }
  0x8f   :  { %819 = vmatmul.mubr.f32.gmra.mxu0 %v506_v14  ;;  %964 = vmatmul.mubr.f32.gmra.mxu1 %v508_v15  ;;  %v530_v14 = vmul.f32 %v2640_v57, %v370_v59  ;;  %v532_v15 = vmul.f32 %v2657_v62, %v372_v60  ;;  %v1322_v50 = vrot.slane %v1312_v10, %v1321_v3  ;;  %v396_v59 = vld [vmem:[%s4089_s2 + $0x390] sm:$0xff]  ;;  %v403_v10 = vld [vmem:[%s4089_s2 + $0x3c8] sm:$0xff]  ;;  %v402_v52 = vld [vmem:[%s4089_s2 + $0x3c0] sm:$0xff] }
  0x90   :  { %2008 = vmatpush3.msra.mxu0 %v641_v21  ;;  %2088 = vmatpush3.msra.mxu1 %v673_v22  ;;  %v389_v21 = vld [vmem:[%s4089_s2 + $0x358] sm:$0xff]  ;;  %v540_v25 = vmul.f32 %v2657_v62, %v380_v46  ;;  %v556_v9 = vmul.f32 %v2657_v62, %v396_v59  ;;  %v304_v59 = vld [vmem:[%s4089_s2 + $0xb0] sm:$0xff] }
  0x91   :  { %823 = vmatprep.mubr.f32.mxu0 %v515_v23  ;;  %968 = vmatprep.mubr.f32.mxu1 %v517_v24  ;;  %v1344_v22 = vcombine.low %v1322_v50, %v1329_v51  ;;  %v653_v23 = vld [vmem:[%s4086_s6 + $0x298] sm:$0xff]  ;;  %v538_v24 = vmul.f32 %v2640_v57, %v378_v45  ;;  %v404_v45 = vld [vmem:[%s4089_s2 + $0x3d0] sm:$0xff]  ;;  %v3111_v50 = vld [vmem:[%s4086_s6 + $0x208] sm:$0xff] }
  0x92   :  { %2009 = vmatprep.subr.mxu0 %v656_v27  ;;  %2089 = vmatprep.subr.mxu1 %v688_v1  ;;  %v1345_v27 = vcombine.low %v1336_v16, %v1343_v19  ;;  %v3116_v51 = vld [vmem:[%s4086_s6 + $0x308] sm:$0xff]  ;;  %v563_v16 = vmul.f32 %v2632_v55, %v403_v10  ;;  %v3138_v19 = vld [vmem:[%s4086_s6 + $0x380] sm:$0xff]  ;;  %v313_v10 = vld [vmem:[%s4089_s2 + $0xf8] sm:$0xff] }
  0x93   :  { %824 = vmatmul.mubr.f32.gmra.mxu0 %v514_v29  ;;  %969 = vmatmul.mubr.f32.gmra.mxu1 %v516_v30  ;;  %v386_v29 = vld [vmem:[%s4089_s2 + $0x340] sm:$0xff]  ;;  %v388_v30 = vld [vmem:[%s4089_s2 + $0x350] sm:$0xff]  ;;  %v1352_v1 = vrot.slane %v1344_v22, %v1321_v3 }
  0x94   :  { %2010 = vmatpush3.msra.mxu0 %v640_v37  ;;  %2090 = vmatpush3.msra.mxu1 %v672_v38  ;;  %v549_v37 = vmul.f32 %v2636_v56, %v389_v21  ;;  %v652_v38 = vld [vmem:[%s4086_s6 + $0x290] sm:$0xff] }
  0x95   :  { %828 = vmatprep.mubr.f32.mxu0 %v523_v40  ;;  %973 = vmatprep.mubr.f32.mxu1 %v525_v41  ;;  %v1359_v40 = vrot.slane %v1345_v27, %v1321_v3  ;;  %v395_v41 = vld [vmem:[%s4089_s2 + $0x388] sm:$0xff]  ;;  %v3062_v3 = vld [vmem:[%s4086_s6 + $0x210] sm:$0xff]  ;;  %v446_v27 = vmul.f32 %v2653_v61, %v286_v20  ;;  %v473_v20 = vmul.f32 %v2665_v0, %v313_v10 }
  0x96   :  { %2011 = vmatprep.subr.mxu0 %v655_v47  ;;  %2091 = vmatprep.subr.mxu1 %v687_v58  ;;  %v546_v47 = vmul.f32 %v2640_v57, %v386_v29  ;;  %v394_v58 = vld [vmem:[%s4089_s2 + $0x380] sm:$0xff]  ;;  %v288_v21 = vld [vmem:[%s4089_s2 + $0x30] sm:$0xff] }
  0x97   :  { %829 = vmatmul.mubr.f32.gmra.mxu0 %v522_v48  ;;  %974 = vmatmul.mubr.f32.gmra.mxu1 %v524_v49  ;;  %v548_v48 = vmul.f32 %v2657_v62, %v388_v30  ;;  %v3051_v49 = vld [vmem:[%s4086_s6 + $0x390] sm:$0xff]  ;;  %v1360_v60 = vcombine.low %v1352_v1, %v1359_v40  ;;  %v554_v8 = vmul.f32 %v2640_v57, %v394_v58  ;;  %v1426_v30 = vld [vmem:[%s4086_s6 + $0x1f8] sm:$0xff]  ;;  %v294_v1 = vld [vmem:[%s4089_s2 + $0x60] sm:$0xff] }
  0x98   :  { %2012 = vmatpush3.msra.mxu0 %v639_v4  ;;  %2092 = vmatpush3.msra.mxu1 %v671_v5  ;;  %v3067_v4 = vld [vmem:[%s4086_s6 + $0x310] sm:$0xff]  ;;  %v555_v5 = vmul.f32 %v2632_v55, %v395_v41  ;;  %v3131_v55 = vld [vmem:[%s4086_s6 + $0x280] sm:$0xff]  ;;  %v448_v29 = vmul.f32 %v2669_v2, %v288_v21  ;;  %v303_v40 = vld [vmem:[%s4089_s2 + $0xa8] sm:$0xff] }
  0x99   :  { %833 = vmatprep.mubr.f32.mxu0 %v531_v6  ;;  %978 = vmatprep.mubr.f32.mxu1 %v533_v7  ;;  %v557_v6 = vmul.f32 %v2636_v56, %v397_v42  ;;  %v3071_v7 = vmul.f32 %v1360_v60, %v1311_v43  ;;  %v305_v41 = vld [vmem:[%s4089_s2 + $0xb8] sm:$0xff]  ;;  %v1393_v42 = vld [vmem:[%s4086_s6 + $0xf0] sm:$0xff]  ;;  %v454_v43 = vmul.f32 %v2653_v61, %v294_v1  ;;  %v302_v58 = vld [vmem:[%s4089_s2 + $0xa0] sm:$0xff] }
  0x9a   :  { %2013 = vmatprep.subr.mxu0 %v654_v13  ;;  %2093 = vmatprep.subr.mxu1 %v686_v44  ;;  %v3090_v13 = vld [vmem:[%s4086_s6 + $0x388] sm:$0xff]  ;;  %v1377_v60 = vld [vmem:[%s4086_s6 + $0x70] sm:$0xff]  ;;  %v1407_v1 = vld [vmem:[%s4086_s6 + $0x160] sm:$0xff] }
  0x9b   :  { %834 = vmatmul.mubr.f32.gmra.mxu0 %v530_v14  ;;  %979 = vmatmul.mubr.f32.gmra.mxu1 %v532_v15  ;;  %v1500_v14 = vrot.slane %v3071_v7, %v2588_v33  ;;  %v1508_v15 = vrot.slane %v3071_v7, %v2592_v36  ;;  %v1496_v44 = vrot.slane %v3071_v7, %v2585_v31  ;;  %v319_v21 = vld [vmem:[%s4089_s2 + $0x128] sm:$0xff]  ;;  %v1489_v33 = vld [vmem:[%s4086_s6 + $0x3f0] sm:$0xff] }
  0x9c   :  { %2014 = vmatpush3.msra.mxu0 %v638_v17  ;;  %2094 = vmatpush3.msra.mxu1 %v670_v53  ;;  %v1504_v46 = vrot.slane %v3071_v7, %v2595_v39  ;;  %v565_v17 = vmul.f32 %v2636_v56, %v405_v11  ;;  %v287_v53 = vld [vmem:[%s4089_s2 + $0x28] sm:$0xff]  ;;  %v562_v56 = vmul.f32 %v2640_v57, %v402_v52  ;;  %v3151_v57 = vld [vmem:[%s4086_s6 + $0x200] sm:$0xff]  ;;  %v1441_v36 = vld [vmem:[%s4086_s6 + $0x270] sm:$0xff] }
  0x9d   :  { %838 = vmatprep.mubr.f32.mxu0 %v539_v54  ;;  %983 = vmatprep.mubr.f32.mxu1 %v541_v18  ;;  %v289_v54 = vld [vmem:[%s4089_s2 + $0x38] sm:$0xff]  ;;  %v564_v18 = vmul.f32 %v2657_v62, %v404_v45  ;;  %v3156_v62 = vld [vmem:[%s4086_s6 + $0x300] sm:$0xff]  ;;  %v447_v22 = vmul.f32 %v2661_v63, %v287_v53  ;;  %v1392_v11 = vld [vmem:[%s4086_s6 + $0xe8] sm:$0xff]  ;;  %v462_v52 = vmul.f32 %v2653_v61, %v302_v58 }
  0x9e   :  { %2015 = vmatprep.subr.mxu0 %v653_v23  ;;  %2095 = vmatprep.subr.mxu1 %v685_v26  ;;  %v449_v23 = vmul.f32 %v2665_v0, %v289_v54  ;;  %v1394_v26 = vld [vmem:[%s4086_s6 + $0xf8] sm:$0xff]  ;;  %v464_v45 = vmul.f32 %v2669_v2, %v304_v59  ;;  %v312_v53 = vld [vmem:[%s4089_s2 + $0xf0] sm:$0xff]  ;;  %v1376_v54 = vld [vmem:[%s4086_s6 + $0x68] sm:$0xff] }
  0x9f   :  { %839 = vmatmul.mubr.f32.gmra.mxu0 %v538_v24  ;;  %984 = vmatmul.mubr.f32.gmra.mxu1 %v540_v25  ;;  %v295_v24 = vld [vmem:[%s4089_s2 + $0x68] sm:$0xff]  ;;  %v297_v25 = vld [vmem:[%s4089_s2 + $0x78] sm:$0xff] }
  0xa0   :  { %2016 = vmatpush3.msra.mxu0 %v637_v32  ;;  %2096 = vmatpush3.msra.mxu1 %v669_v34  ;;  %v296_v32 = vld [vmem:[%s4089_s2 + $0x70] sm:$0xff]  ;;  %v1378_v34 = vld [vmem:[%s4086_s6 + $0x78] sm:$0xff]  ;;  %v1488_v31 = vld [vmem:[%s4086_s6 + $0x3e8] sm:$0xff] }
  0xa1   :  { %843 = vmatprep.mubr.f32.mxu0 %v547_v35  ;;  %988 = vmatprep.mubr.f32.mxu1 %v549_v37  ;;  %v1410_v35 = vld [vmem:[%s4086_s6 + $0x178] sm:$0xff]  ;;  %v455_v37 = vmul.f32 %v2661_v63, %v295_v24  ;;  %v1440_v39 = vld [vmem:[%s4086_s6 + $0x268] sm:$0xff] }
  0xa2   :  { %2017 = vmatprep.subr.mxu0 %v652_v38  ;;  %2097 = vmatprep.subr.mxu1 %v3051_v49  ;;  %v457_v38 = vmul.f32 %v2665_v0, %v297_v25  ;;  %v472_v25 = vmul.f32 %v2669_v2, %v312_v53  ;;  %v1406_v58 = vld [vmem:[%s4086_s6 + $0x158] sm:$0xff] }
  0xa3   :  { %844 = vmatmul.mubr.f32.gmra.mxu0 %v546_v47  ;;  %989 = vmatmul.mubr.f32.gmra.mxu1 %v548_v48  ;;  %v456_v47 = vmul.f32 %v2669_v2, %v296_v32  ;;  %v1425_v48 = vld [vmem:[%s4086_s6 + $0x1f0] sm:$0xff]  ;;  %v479_v32 = vmul.f32 %v2661_v63, %v319_v21 }
  0xa4   :  { %2018 = vmatpush3.msra.mxu0 %v3062_v3  ;;  %2098 = vmatpush3.msra.mxu1 %v3067_v4 }
  0xa5   :  { %848 = vmatprep.mubr.f32.mxu0 %v555_v5  ;;  %993 = vmatprep.mubr.f32.mxu1 %v557_v6  ;;  %v1409_v5 = vld [vmem:[%s4086_s6 + $0x170] sm:$0xff]  ;;  %v463_v6 = vmul.f32 %v2661_v63, %v303_v40 }
  0xa6   :  { %2019 = vmatprep.subr.mxu0 %v3085_v12  ;;  %2099 = vmatprep.subr.mxu1 %v3090_v13 }
  0xa7   :  { %849 = vmatmul.mubr.f32.gmra.mxu0 %v554_v8  ;;  %994 = vmatmul.mubr.f32.gmra.mxu1 %v556_v9  ;;  %v465_v8 = vmul.f32 %v2665_v0, %v305_v41  ;;  %v311_v9 = vld [vmem:[%s4089_s2 + $0xe8] sm:$0xff] }
  0xa8   :  { %2020 = vmatpush3.msra.mxu0 %v3111_v50  ;;  %2100 = vmatpush3.msra.mxu1 %v3116_v51 }
  0xa9   :  { %853 = vmatprep.mubr.f32.mxu0 %v563_v16  ;;  %998 = vmatprep.mubr.f32.mxu1 %v565_v17  ;;  %v1424_v16 = vld [vmem:[%s4086_s6 + $0x1e8] sm:$0xff]  ;;  %v310_v17 = vld [vmem:[%s4089_s2 + $0xe0] sm:$0xff] }
  0xaa   :  { %2021 = vmatprep.subr.mxu0 %v3131_v55  ;;  %2101 = vmatprep.subr.mxu1 %v3138_v19  ;;  %v470_v24 = vmul.f32 %v2653_v61, %v310_v17  ;;  %v1405_v17 = vld [vmem:[%s4086_s6 + $0x150] sm:$0xff] }
  0xab   :  { %854 = vmatmul.mubr.f32.gmra.mxu0 %v562_v56  ;;  %999 = vmatmul.mubr.f32.gmra.mxu1 %v564_v18  ;;  %v1408_v56 = vld [vmem:[%s4086_s6 + $0x168] sm:$0xff]  ;;  %v471_v18 = vmul.f32 %v2661_v63, %v311_v9 }
  0xac   :  { %2022 = vmatpush3.msra.mxu0 %v3151_v57  ;;  %2102 = vmatpush3.msra.mxu1 %v3156_v62 }
  0xad   :  { %1068 = vmatprep.mubr.f32.mxu0 %v447_v22  ;;  %1213 = vmatprep.mubr.f32.mxu1 %v449_v23  ;;  %v321_v22 = vld [vmem:[%s4089_s2 + $0x138] sm:$0xff]  ;;  %v1391_v23 = vld [vmem:[%s4086_s6 + $0xe0] sm:$0xff] }
  0xae   :  { %2151 = vmatprep.subr.mxu0 %v1394_v26  ;;  %2186 = vmatprep.subr.mxu1 %v1426_v30  ;;  %v1423_v26 = vld [vmem:[%s4086_s6 + $0x1e0] sm:$0xff] }
  0xaf   :  { %1069 = vmatmul.mubr.f32.vlgmr.msra.gmra.mxu0 %v446_v27  ;;  %1214 = vmatmul.mubr.f32.vlgmr.msra.gmra.mxu1 %v448_v29  ;;  %v318_v27 = vld [vmem:[%s4089_s2 + $0x120] sm:$0xff]  ;;  %v320_v29 = vld [vmem:[%s4089_s2 + $0x130] sm:$0xff] }
  0xb0   :  { %2152 = vmatpush3.msra.mxu0 %v1378_v34  ;;  %2187 = vmatpush3.msra.mxu1 %v1410_v35  ;;  %v1375_v30 = vld [vmem:[%s4086_s6 + $0x60] sm:$0xff]  ;;  %v481_v34 = vmul.f32 %v2665_v0, %v321_v22  ;;  %v327_v35 = vld [vmem:[%s4089_s2 + $0x168] sm:$0xff]  ;;  %v478_v40 = vmul.f32 %v2653_v61, %v318_v27  ;;  %v480_v41 = vmul.f32 %v2669_v2, %v320_v29 }
  0xb1   :  { %1073 = vmatprep.mubr.f32.mxu0 %v455_v37  ;;  %1218 = vmatprep.mubr.f32.mxu1 %v457_v38  ;;  %v329_v37 = vld [vmem:[%s4089_s2 + $0x178] sm:$0xff]  ;;  %v487_v59 = vmul.f32 %v2661_v63, %v327_v35  ;;  %v1404_v27 = vld [vmem:[%s4086_s6 + $0x148] sm:$0xff] }
  0xb2   :  { %2153 = vmatprep.subr.mxu0 %v1393_v42  ;;  %2188 = vmatprep.subr.mxu1 %v1425_v48  ;;  %v1390_v38 = vld [vmem:[%s4086_s6 + $0xd8] sm:$0xff] }
  0xb3   :  { %1074 = vmatmul.mubr.f32.gmra.mxu0 %v454_v43  ;;  %1219 = vmatmul.mubr.f32.gmra.mxu1 %v456_v47  ;;  %v1422_v42 = vld [vmem:[%s4086_s6 + $0x1d8] sm:$0xff]  ;;  %v326_v43 = vld [vmem:[%s4089_s2 + $0x160] sm:$0xff]  ;;  %v328_v47 = vld [vmem:[%s4089_s2 + $0x170] sm:$0xff] }
  0xb4   :  { %2154 = vmatpush3.msra.mxu0 %v1377_v60  ;;  %2189 = vmatpush3.msra.mxu1 %v1409_v5  ;;  %v1374_v48 = vld [vmem:[%s4086_s6 + $0x58] sm:$0xff]  ;;  %v489_v60 = vmul.f32 %v2665_v0, %v329_v37  ;;  %v335_v5 = vld [vmem:[%s4089_s2 + $0x1a8] sm:$0xff]  ;;  %v486_v9 = vmul.f32 %v2653_v61, %v326_v43  ;;  %v488_v10 = vmul.f32 %v2669_v2, %v328_v47  ;;  %v1403_v43 = vld [vmem:[%s4086_s6 + $0x140] sm:$0xff] }
  0xb5   :  { %1078 = vmatprep.mubr.f32.mxu0 %v463_v6  ;;  %1223 = vmatprep.mubr.f32.mxu1 %v465_v8  ;;  %v337_v6 = vld [vmem:[%s4089_s2 + $0x1b8] sm:$0xff]  ;;  %v1389_v8 = vld [vmem:[%s4086_s6 + $0xd0] sm:$0xff]  ;;  %v495_v53 = vmul.f32 %v2661_v63, %v335_v5 }
  0xb6   :  { %2155 = vmatprep.subr.mxu0 %v1392_v11  ;;  %2190 = vmatprep.subr.mxu1 %v1424_v16  ;;  %v1421_v11 = vld [vmem:[%s4086_s6 + $0x1d0] sm:$0xff] }
  0xb7   :  { %1079 = vmatmul.mubr.f32.gmra.mxu0 %v462_v52  ;;  %1224 = vmatmul.mubr.f32.gmra.mxu1 %v464_v45  ;;  %v334_v52 = vld [vmem:[%s4089_s2 + $0x1a0] sm:$0xff]  ;;  %v336_v45 = vld [vmem:[%s4089_s2 + $0x1b0] sm:$0xff] }
  0xb8   :  { %2156 = vmatpush3.msra.mxu0 %v1376_v54  ;;  %2191 = vmatpush3.msra.mxu1 %v1408_v56  ;;  %v1373_v16 = vld [vmem:[%s4086_s6 + $0x50] sm:$0xff]  ;;  %v497_v54 = vmul.f32 %v2665_v0, %v337_v6  ;;  %v343_v56 = vld [vmem:[%s4089_s2 + $0x1e8] sm:$0xff]  ;;  %v494_v21 = vmul.f32 %v2653_v61, %v334_v52  ;;  %v496_v22 = vmul.f32 %v2669_v2, %v336_v45  ;;  %v1402_v52 = vld [vmem:[%s4086_s6 + $0x138] sm:$0xff] }
  0xb9   :  { %1083 = vmatprep.mubr.f32.mxu0 %v471_v18  ;;  %1228 = vmatprep.mubr.f32.mxu1 %v473_v20  ;;  %v345_v18 = vld [vmem:[%s4089_s2 + $0x1f8] sm:$0xff]  ;;  %v1388_v20 = vld [vmem:[%s4086_s6 + $0xc8] sm:$0xff]  ;;  %v503_v29 = vmul.f32 %v2661_v63, %v343_v56 }
  0xba   :  { %2157 = vmatprep.subr.mxu0 %v1391_v23  ;;  %2192 = vmatprep.subr.mxu1 %v1423_v26  ;;  %v1420_v23 = vld [vmem:[%s4086_s6 + $0x1c8] sm:$0xff] }
  0xbb   :  { %1084 = vmatmul.mubr.f32.gmra.mxu0 %v470_v24  ;;  %1229 = vmatmul.mubr.f32.gmra.mxu1 %v472_v25  ;;  %v342_v24 = vld [vmem:[%s4089_s2 + $0x1e0] sm:$0xff]  ;;  %v344_v25 = vld [vmem:[%s4089_s2 + $0x1f0] sm:$0xff]  ;;  %v1372_v26 = vld [vmem:[%s4086_s6 + $0x48] sm:$0xff] }
  0xbc   :  { %2158 = vmatpush3.msra.mxu0 %v1375_v30  ;;  %2193 = vmatpush3.msra.mxu1 %v1407_v1  ;;  %v505_v30 = vmul.f32 %v2665_v0, %v345_v18  ;;  %v351_v1 = vld [vmem:[%s4089_s2 + $0x228] sm:$0xff]  ;;  %v502_v35 = vmul.f32 %v2653_v61, %v342_v24  ;;  %v504_v37 = vmul.f32 %v2669_v2, %v344_v25  ;;  %v1401_v24 = vld [vmem:[%s4086_s6 + $0x130] sm:$0xff] }
  0xbd   :  { %1088 = vmatprep.mubr.f32.mxu0 %v479_v32  ;;  %1233 = vmatprep.mubr.f32.mxu1 %v481_v34  ;;  %v353_v32 = vld [vmem:[%s4089_s2 + $0x238] sm:$0xff]  ;;  %v1387_v34 = vld [vmem:[%s4086_s6 + $0xc0] sm:$0xff]  ;;  %v511_v47 = vmul.f32 %v2661_v63, %v351_v1 }
  0xbe   :  { %2159 = vmatprep.subr.mxu0 %v1390_v38  ;;  %2194 = vmatprep.subr.mxu1 %v1422_v42  ;;  %v1419_v38 = vld [vmem:[%s4086_s6 + $0x1c0] sm:$0xff] }
  0xbf   :  { %1089 = vmatmul.mubr.f32.gmra.mxu0 %v478_v40  ;;  %1234 = vmatmul.mubr.f32.gmra.mxu1 %v480_v41  ;;  %v350_v40 = vld [vmem:[%s4089_s2 + $0x220] sm:$0xff]  ;;  %v352_v41 = vld [vmem:[%s4089_s2 + $0x230] sm:$0xff] }
  0xc0   :  { %2160 = vmatpush3.msra.mxu0 %v1374_v48  ;;  %2195 = vmatpush3.msra.mxu1 %v1406_v58  ;;  %v1371_v42 = vld [vmem:[%s4086_s6 + $0x40] sm:$0xff]  ;;  %v513_v48 = vmul.f32 %v2665_v0, %v353_v32  ;;  %v359_v58 = vld [vmem:[%s4089_s2 + $0x268] sm:$0xff]  ;;  %v510_v5 = vmul.f32 %v2653_v61, %v350_v40  ;;  %v512_v6 = vmul.f32 %v2669_v2, %v352_v41 }
  0xc1   :  { %1093 = vmatprep.mubr.f32.mxu0 %v487_v59  ;;  %1238 = vmatprep.mubr.f32.mxu1 %v489_v60  ;;  %v361_v59 = vld [vmem:[%s4089_s2 + $0x278] sm:$0xff]  ;;  %v519_v45 = vmul.f32 %v2661_v63, %v359_v58  ;;  %v1400_v40 = vld [vmem:[%s4086_s6 + $0x128] sm:$0xff] }
  0xc2   :  { %2161 = vmatprep.subr.mxu0 %v1389_v8  ;;  %2196 = vmatprep.subr.mxu1 %v1421_v11  ;;  %v1386_v60 = vld [vmem:[%s4086_s6 + $0xb8] sm:$0xff] }
  0xc3   :  { %1094 = vmatmul.mubr.f32.gmra.mxu0 %v486_v9  ;;  %1239 = vmatmul.mubr.f32.gmra.mxu1 %v488_v10  ;;  %v1418_v8 = vld [vmem:[%s4086_s6 + $0x1b8] sm:$0xff]  ;;  %v358_v9 = vld [vmem:[%s4089_s2 + $0x260] sm:$0xff]  ;;  %v360_v10 = vld [vmem:[%s4089_s2 + $0x270] sm:$0xff] }
  0xc4   :  { %2162 = vmatpush3.msra.mxu0 %v1373_v16  ;;  %2197 = vmatpush3.msra.mxu1 %v1405_v17  ;;  %v1370_v11 = vld [vmem:[%s4086_s6 + $0x38] sm:$0xff]  ;;  %v521_v16 = vmul.f32 %v2665_v0, %v361_v59  ;;  %v367_v17 = vld [vmem:[%s4089_s2 + $0x2a8] sm:$0xff]  ;;  %v518_v56 = vmul.f32 %v2653_v61, %v358_v9  ;;  %v520_v18 = vmul.f32 %v2669_v2, %v360_v10  ;;  %v1399_v9 = vld [vmem:[%s4086_s6 + $0x120] sm:$0xff] }
  0xc5   :  { %1098 = vmatprep.mubr.f32.mxu0 %v495_v53  ;;  %1243 = vmatprep.mubr.f32.mxu1 %v497_v54  ;;  %v369_v53 = vld [vmem:[%s4089_s2 + $0x2b8] sm:$0xff]  ;;  %v1385_v54 = vld [vmem:[%s4086_s6 + $0xb0] sm:$0xff]  ;;  %v527_v25 = vmul.f32 %v2661_v63, %v367_v17 }
  0xc6   :  { %2163 = vmatprep.subr.mxu0 %v1388_v20  ;;  %2198 = vmatprep.subr.mxu1 %v1420_v23  ;;  %v1417_v20 = vld [vmem:[%s4086_s6 + $0x1b0] sm:$0xff] }
  0xc7   :  { %1099 = vmatmul.mubr.f32.gmra.mxu0 %v494_v21  ;;  %1244 = vmatmul.mubr.f32.gmra.mxu1 %v496_v22  ;;  %v366_v21 = vld [vmem:[%s4089_s2 + $0x2a0] sm:$0xff]  ;;  %v368_v22 = vld [vmem:[%s4089_s2 + $0x2b0] sm:$0xff] }
  0xc8   :  { %2164 = vmatpush3.msra.mxu0 %v1372_v26  ;;  %2199 = vmatpush3.msra.mxu1 %v1404_v27  ;;  %v1369_v23 = vld [vmem:[%s4086_s6 + $0x30] sm:$0xff]  ;;  %v529_v26 = vmul.f32 %v2665_v0, %v369_v53  ;;  %v375_v27 = vld [vmem:[%s4089_s2 + $0x2e8] sm:$0xff]  ;;  %v526_v1 = vmul.f32 %v2653_v61, %v366_v21  ;;  %v528_v32 = vmul.f32 %v2669_v2, %v368_v22  ;;  %v1398_v21 = vld [vmem:[%s4086_s6 + $0x118] sm:$0xff] }
  0xc9   :  { %1103 = vmatprep.mubr.f32.mxu0 %v503_v29  ;;  %1248 = vmatprep.mubr.f32.mxu1 %v505_v30  ;;  %v377_v29 = vld [vmem:[%s4089_s2 + $0x2f8] sm:$0xff]  ;;  %v1384_v30 = vld [vmem:[%s4086_s6 + $0xa8] sm:$0xff]  ;;  %v535_v41 = vmul.f32 %v2661_v63, %v375_v27 }
  0xca   :  { %2165 = vmatprep.subr.mxu0 %v1387_v34  ;;  %2200 = vmatprep.subr.mxu1 %v1419_v38  ;;  %v1416_v34 = vld [vmem:[%s4086_s6 + $0x1a8] sm:$0xff] }
  0xcb   :  { %1104 = vmatmul.mubr.f32.gmra.mxu0 %v502_v35  ;;  %1249 = vmatmul.mubr.f32.gmra.mxu1 %v504_v37  ;;  %v374_v35 = vld [vmem:[%s4089_s2 + $0x2e0] sm:$0xff]  ;;  %v376_v37 = vld [vmem:[%s4089_s2 + $0x2f0] sm:$0xff]  ;;  %v1368_v38 = vld [vmem:[%s4086_s6 + $0x28] sm:$0xff] }
  0xcc   :  { %2166 = vmatpush3.msra.mxu0 %v1371_v42  ;;  %2201 = vmatpush3.msra.mxu1 %v1403_v43  ;;  %v537_v42 = vmul.f32 %v2665_v0, %v377_v29  ;;  %v383_v43 = vld [vmem:[%s4089_s2 + $0x328] sm:$0xff]  ;;  %v534_v58 = vmul.f32 %v2653_v61, %v374_v35  ;;  %v536_v59 = vmul.f32 %v2669_v2, %v376_v37  ;;  %v1397_v35 = vld [vmem:[%s4086_s6 + $0x110] sm:$0xff] }
  0xcd   :  { %1108 = vmatprep.mubr.f32.mxu0 %v511_v47  ;;  %1253 = vmatprep.mubr.f32.mxu1 %v513_v48  ;;  %v385_v47 = vld [vmem:[%s4089_s2 + $0x338] sm:$0xff]  ;;  %v1383_v48 = vld [vmem:[%s4086_s6 + $0xa0] sm:$0xff]  ;;  %v543_v10 = vmul.f32 %v2661_v63, %v383_v43 }
  0xce   :  { %2167 = vmatprep.subr.mxu0 %v1386_v60  ;;  %2202 = vmatprep.subr.mxu1 %v1418_v8  ;;  %v1415_v60 = vld [vmem:[%s4086_s6 + $0x1a0] sm:$0xff] }
  0xcf   :  { %1109 = vmatmul.mubr.f32.gmra.mxu0 %v510_v5  ;;  %1254 = vmatmul.mubr.f32.gmra.mxu1 %v512_v6  ;;  %v382_v5 = vld [vmem:[%s4089_s2 + $0x320] sm:$0xff]  ;;  %v384_v6 = vld [vmem:[%s4089_s2 + $0x330] sm:$0xff] }
  0xd0   :  { %2168 = vmatpush3.msra.mxu0 %v1370_v11  ;;  %2203 = vmatpush3.msra.mxu1 %v1402_v52  ;;  %v1367_v8 = vld [vmem:[%s4086_s6 + $0x20] sm:$0xff]  ;;  %v545_v11 = vmul.f32 %v2665_v0, %v385_v47  ;;  %v391_v52 = vld [vmem:[%s4089_s2 + $0x368] sm:$0xff]  ;;  %v542_v17 = vmul.f32 %v2653_v61, %v382_v5  ;;  %v544_v53 = vmul.f32 %v2669_v2, %v384_v6 }
  0xd1   :  { %1113 = vmatprep.mubr.f32.mxu0 %v519_v45  ;;  %1258 = vmatprep.mubr.f32.mxu1 %v521_v16  ;;  %v393_v45 = vld [vmem:[%s4089_s2 + $0x378] sm:$0xff]  ;;  %v551_v22 = vmul.f32 %v2661_v63, %v391_v52  ;;  %v1396_v5 = vld [vmem:[%s4086_s6 + $0x108] sm:$0xff]  ;;  %v1411_v52 = vld [vmem:[%s4086_s6 + $0x180] sm:$0xff] }
  0xd2   :  { %2169 = vmatprep.subr.mxu0 %v1385_v54  ;;  %2204 = vmatprep.subr.mxu1 %v1417_v20  ;;  %v1382_v16 = vld [vmem:[%s4086_s6 + $0x98] sm:$0xff] }
  0xd3   :  { %1114 = vmatmul.mubr.f32.gmra.mxu0 %v518_v56  ;;  %1259 = vmatmul.mubr.f32.gmra.mxu1 %v520_v18  ;;  %v1414_v54 = vld [vmem:[%s4086_s6 + $0x198] sm:$0xff]  ;;  %v390_v56 = vld [vmem:[%s4089_s2 + $0x360] sm:$0xff]  ;;  %v392_v18 = vld [vmem:[%s4089_s2 + $0x370] sm:$0xff] }
  0xd4   :  { %2170 = vmatpush3.msra.mxu0 %v1369_v23  ;;  %2205 = vmatpush3.msra.mxu1 %v1401_v24  ;;  %v1366_v20 = vld [vmem:[%s4086_s6 + $0x18] sm:$0xff]  ;;  %v553_v23 = vmul.f32 %v2665_v0, %v393_v45  ;;  %v399_v24 = vld [vmem:[%s4089_s2 + $0x3a8] sm:$0xff]  ;;  %v550_v27 = vmul.f32 %v2653_v61, %v390_v56  ;;  %v552_v29 = vmul.f32 %v2669_v2, %v392_v18  ;;  %v1471_v56 = vld [vmem:[%s4086_s6 + $0x360] sm:$0xff] }
  0xd5   :  { %1118 = vmatprep.mubr.f32.mxu0 %v527_v25  ;;  %1263 = vmatprep.mubr.f32.mxu1 %v529_v26  ;;  %v401_v25 = vld [vmem:[%s4089_s2 + $0x3b8] sm:$0xff]  ;;  %v1381_v26 = vld [vmem:[%s4086_s6 + $0x90] sm:$0xff]  ;;  %v559_v37 = vmul.f32 %v2661_v63, %v399_v24 }
  0xd6   :  { %2171 = vmatprep.subr.mxu0 %v1384_v30  ;;  %2206 = vmatprep.subr.mxu1 %v1416_v34  ;;  %v1413_v30 = vld [vmem:[%s4086_s6 + $0x190] sm:$0xff]  ;;  %v1442_v45 = vld [vmem:[%s4086_s6 + $0x278] sm:$0xff] }
  0xd7   :  { %1119 = vmatmul.mubr.f32.gmra.mxu0 %v526_v1  ;;  %1264 = vmatmul.mubr.f32.gmra.mxu1 %v528_v32  ;;  %v398_v1 = vld [vmem:[%s4089_s2 + $0x3a0] sm:$0xff]  ;;  %v400_v32 = vld [vmem:[%s4089_s2 + $0x3b0] sm:$0xff]  ;;  %v1454_v18 = vld [vmem:[%s4086_s6 + $0x2d8] sm:$0xff] }
  0xd8   :  { %2172 = vmatpush3.msra.mxu0 %v1368_v38  ;;  %2207 = vmatpush3.msra.mxu1 %v1400_v40  ;;  %v1365_v34 = vld [vmem:[%s4086_s6 + $0x10] sm:$0xff]  ;;  %v561_v38 = vmul.f32 %v2665_v0, %v401_v25  ;;  %v407_v40 = vld [vmem:[%s4089_s2 + $0x3e8] sm:$0xff]  ;;  %v558_v43 = vmul.f32 %v2653_v61, %v398_v1  ;;  %v560_v47 = vmul.f32 %v2669_v2, %v400_v32  ;;  %v1451_v32 = vld [vmem:[%s4086_s6 + $0x2c0] sm:$0xff] }
  0xd9   :  { %1123 = vmatprep.mubr.f32.mxu0 %v535_v41  ;;  %1268 = vmatprep.mubr.f32.mxu1 %v537_v42  ;;  %v409_v41 = vld [vmem:[%s4089_s2 + $0x3f8] sm:$0xff]  ;;  %v1380_v42 = vld [vmem:[%s4086_s6 + $0x88] sm:$0xff]  ;;  %v567_v6 = vmul.f32 %v2661_v63, %v407_v40  ;;  %v1363_v63 = vld [vmem:[%s4086_s6] sm:$0xff] }
  0xda   :  { %2173 = vmatprep.subr.mxu0 %v1383_v48  ;;  %2208 = vmatprep.subr.mxu1 %v1415_v60  ;;  %v1412_v48 = vld [vmem:[%s4086_s6 + $0x188] sm:$0xff]  ;;  %v1485_v24 = vld [vmem:[%s4086_s6 + $0x3d0] sm:$0xff]  ;;  %v1482_v40 = vld [vmem:[%s4086_s6 + $0x3b8] sm:$0xff] }
  0xdb   :  { %1124 = vmatmul.mubr.f32.gmra.mxu0 %v534_v58  ;;  %1269 = vmatmul.mubr.f32.gmra.mxu1 %v536_v59  ;;  %v406_v58 = vld [vmem:[%s4089_s2 + $0x3e0] sm:$0xff]  ;;  %v408_v59 = vld [vmem:[%s4089_s2 + $0x3f0] sm:$0xff]  ;;  %v1364_v60 = vld [vmem:[%s4086_s6 + $0x8] sm:$0xff] }
  0xdc   :  { %2174 = vmatpush3.msra.mxu0 %v1367_v8  ;;  %2209 = vmatpush3.msra.mxu1 %v1399_v9  ;;  %v569_v8 = vmul.f32 %v2665_v0, %v409_v41  ;;  %v1379_v9 = vld [vmem:[%s4086_s6 + $0x80] sm:$0xff]  ;;  %v1437_v25 = vld [vmem:[%s4086_s6 + $0x250] sm:$0xff]  ;;  %v1468_v1 = vld [vmem:[%s4086_s6 + $0x348] sm:$0xff] }
  0xdd   :  { %1128 = vmatprep.mubr.f32.mxu0 %v543_v10  ;;  %1273 = vmatprep.mubr.f32.mxu1 %v545_v11  ;;  %v566_v10 = vmul.f32 %v2653_v61, %v406_v58  ;;  %v568_v11 = vmul.f32 %v2669_v2, %v408_v59  ;;  %v1395_v0 = vld [vmem:[%s4086_s6 + $0x100] sm:$0xff]  ;;  %v1458_v61 = vld [vmem:[%s4086_s6 + $0x2f8] sm:$0xff]  ;;  %v1465_v58 = vld [vmem:[%s4086_s6 + $0x330] sm:$0xff] }
  0xde   :  { %2175 = vmatprep.subr.mxu0 %v1382_v16  ;;  %2210 = vmatprep.subr.mxu1 %v1414_v54  ;;  %v1490_v2 = vld [vmem:[%s4086_s6 + $0x3f8] sm:$0xff]  ;;  %v1439_v54 = vld [vmem:[%s4086_s6 + $0x260] sm:$0xff]  ;;  %v1448_v59 = vld [vmem:[%s4086_s6 + $0x2a8] sm:$0xff] }
  0xdf   :  { %1129 = vmatmul.mubr.f32.gmra.mxu0 %v542_v17  ;;  %1274 = vmatmul.mubr.f32.gmra.mxu1 %v544_v53  ;;  %v1474_v16 = vld [vmem:[%s4086_s6 + $0x378] sm:$0xff]  ;;  %v1457_v17 = vld [vmem:[%s4086_s6 + $0x2f0] sm:$0xff]  ;;  %v1487_v53 = vld [vmem:[%s4086_s6 + $0x3e0] sm:$0xff] }
  0xe0   :  { %2176 = vmatpush3.msra.mxu0 %v1366_v20  ;;  %2211 = vmatpush3.msra.mxu1 %v1398_v21  ;;  %v1486_v20 = vld [vmem:[%s4086_s6 + $0x3d8] sm:$0xff] }
  0xe1   :  { %1133 = vmatprep.mubr.f32.mxu0 %v551_v22  ;;  %1278 = vmatprep.mubr.f32.mxu1 %v553_v23  ;;  %v1438_v21 = vld [vmem:[%s4086_s6 + $0x258] sm:$0xff]  ;;  %v1453_v23 = vld [vmem:[%s4086_s6 + $0x2d0] sm:$0xff] }
  0xe2   :  { %2177 = vmatprep.subr.mxu0 %v1381_v26  ;;  %2212 = vmatprep.subr.mxu1 %v1413_v30  ;;  %v1470_v22 = vld [vmem:[%s4086_s6 + $0x358] sm:$0xff]  ;;  %v1469_v26 = vld [vmem:[%s4086_s6 + $0x350] sm:$0xff]  ;;  %v1436_v30 = vld [vmem:[%s4086_s6 + $0x248] sm:$0xff] }
  0xe3   :  { %1134 = vmatmul.mubr.f32.gmra.mxu0 %v550_v27  ;;  %1279 = vmatmul.mubr.f32.gmra.mxu1 %v552_v29  ;;  %v1452_v27 = vld [vmem:[%s4086_s6 + $0x2c8] sm:$0xff]  ;;  %v1434_v41 = vld [vmem:[%s4086_s6 + $0x238] sm:$0xff] }
  0xe4   :  { %2178 = vmatpush3.msra.mxu0 %v1365_v34  ;;  %2213 = vmatpush3.msra.mxu1 %v1397_v35  ;;  %v1484_v29 = vld [vmem:[%s4086_s6 + $0x3c8] sm:$0xff]  ;;  %v1483_v34 = vld [vmem:[%s4086_s6 + $0x3c0] sm:$0xff] }
  0xe5   :  { %1138 = vmatprep.mubr.f32.mxu0 %v559_v37  ;;  %1283 = vmatprep.mubr.f32.mxu1 %v561_v38  ;;  %v1435_v35 = vld [vmem:[%s4086_s6 + $0x240] sm:$0xff]  ;;  %v1450_v38 = vld [vmem:[%s4086_s6 + $0x2b8] sm:$0xff] }
  0xe6   :  { %2179 = vmatprep.subr.mxu0 %v1380_v42  ;;  %2214 = vmatprep.subr.mxu1 %v1412_v48  ;;  %v1467_v37 = vld [vmem:[%s4086_s6 + $0x340] sm:$0xff]  ;;  %v1466_v42 = vld [vmem:[%s4086_s6 + $0x338] sm:$0xff]  ;;  %v1433_v48 = vld [vmem:[%s4086_s6 + $0x230] sm:$0xff] }
  0xe7   :  { %1139 = vmatmul.mubr.f32.gmra.mxu0 %v558_v43  ;;  %1284 = vmatmul.mubr.f32.gmra.mxu1 %v560_v47  ;;  %v1449_v43 = vld [vmem:[%s4086_s6 + $0x2b0] sm:$0xff] }
  0xe8   :  { %2180 = vmatpush3.msra.mxu0 %v1364_v60  ;;  %2215 = vmatpush3.msra.mxu1 %v1396_v5  ;;  %v1481_v47 = vld [vmem:[%s4086_s6 + $0x3b0] sm:$0xff]  ;;  %v1480_v60 = vld [vmem:[%s4086_s6 + $0x3a8] sm:$0xff] }
  0xe9   :  { %1143 = vmatprep.mubr.f32.mxu0 %v567_v6  ;;  %1288 = vmatprep.mubr.f32.mxu1 %v569_v8  ;;  %v1432_v5 = vld [vmem:[%s4086_s6 + $0x228] sm:$0xff]  ;;  %v1447_v8 = vld [vmem:[%s4086_s6 + $0x2a0] sm:$0xff] }
  0xea   :  { %2181 = vmatprep.subr.mxu0 %v1379_v9  ;;  %2216 = vmatprep.subr.mxu1 %v1411_v52  ;;  %v1464_v6 = vld [vmem:[%s4086_s6 + $0x328] sm:$0xff]  ;;  %v1479_v9 = vld [vmem:[%s4086_s6 + $0x3a0] sm:$0xff]  ;;  %v1446_v52 = vld [vmem:[%s4086_s6 + $0x298] sm:$0xff] }
  0xeb   :  { %1144 = vmatmul.mubr.f32.gmra.mxu0 %v566_v10  ;;  %1289 = vmatmul.mubr.f32.gmra.mxu1 %v568_v11  ;;  %v1431_v10 = vld [vmem:[%s4086_s6 + $0x220] sm:$0xff] }
  0xec   :  { %2182 = vmatpush3.msra.mxu0 %v1363_v63  ;;  %2217 = vmatpush3.msra.mxu1 %v1395_v0  ;;  %v1463_v11 = vld [vmem:[%s4086_s6 + $0x320] sm:$0xff]  ;;  %v1478_v63 = vld [vmem:[%s4086_s6 + $0x398] sm:$0xff] }
  0xed   :  { %1597 = vmatprep.mubr.f32.mxu0 %v1500_v14  ;;  %1667 = vmatprep.mubr.f32.mxu1 %v1508_v15  ;;  %v1473_v14 = vld [vmem:[%s4086_s6 + $0x370] sm:$0xff]  ;;  %v1456_v15 = vld [vmem:[%s4086_s6 + $0x2e8] sm:$0xff]  ;;  %v1430_v0 = vld [vmem:[%s4086_s6 + $0x218] sm:$0xff] }
  0xee   :  { %2221 = vmatprep.subr.mxu0 %v1458_v61  ;;  %2256 = vmatprep.subr.mxu1 %v1490_v2  ;;  %v1462_v61 = vld [vmem:[%s4086_s6 + $0x318] sm:$0xff]  ;;  %v1445_v2 = vld [vmem:[%s4086_s6 + $0x290] sm:$0xff] }
  0xef   :  { %1598 = vmatmul.mubr.f32.vlgmr.msra.gmra.mxu0 %v1496_v44  ;;  %1668 = vmatmul.mubr.f32.vlgmr.msra.gmra.mxu1 %v1504_v46  ;;  %v1472_v44 = vld [vmem:[%s4086_s6 + $0x368] sm:$0xff]  ;;  %v1455_v46 = vld [vmem:[%s4086_s6 + $0x2e0] sm:$0xff] }
  0xf0   :  { %2222 = vmatpush3.msra.mxu0 %v1442_v45  ;;  %2257 = vmatpush3.msra.mxu1 %v1474_v16  ;;  %v1515_v45 = vsub.s32 5, %v2582_v28  ;;  %v1523_v16 = vsub.s32 7, %v2582_v28 }
  0xf1   :  { %2223 = vmatprep.subr.mxu0 %v1457_v17  ;;  %2258 = vmatprep.subr.mxu1 %v1489_v33  ;;  %v1511_v17 = vsub.s32 4, %v2582_v28  ;;  %v1519_v33 = vsub.s32 6, %v2582_v28 }
  0xf2   :  { %2224 = vmatpush3.msra.mxu0 %v1441_v36  ;;  %2259 = vmatpush3.msra.mxu1 %v1473_v14  ;;  %v1516_v36 = vrot.slane %v3071_v7, %v1515_v45  ;;  %v1524_v14 = vrot.slane %v3071_v7, %v1523_v16 }
  0xf3   :  { %2225 = vmatprep.subr.mxu0 %v1456_v15  ;;  %2260 = vmatprep.subr.mxu1 %v1488_v31  ;;  %v1512_v28 = vrot.slane %v3071_v7, %v1511_v17 }
  0xf4   :  { %2226 = vmatpush3.msra.mxu0 %v1440_v39  ;;  %2261 = vmatpush3.msra.mxu1 %v1472_v44 }
  0xf5   :  { %2227 = vmatprep.subr.mxu0 %v1455_v46  ;;  %2262 = vmatprep.subr.mxu1 %v1487_v53 }
  0xf6   :  { %2228 = vmatpush3.msra.mxu0 %v1439_v54  ;;  %2263 = vmatpush3.msra.mxu1 %v1471_v56 }
  0xf7   :  { %2229 = vmatprep.subr.mxu0 %v1454_v18  ;;  %2264 = vmatprep.subr.mxu1 %v1486_v20 }
  0xf8   :  { %2230 = vmatpush3.msra.mxu0 %v1438_v21  ;;  %2265 = vmatpush3.msra.mxu1 %v1470_v22 }
  0xf9   :  { %2231 = vmatprep.subr.mxu0 %v1453_v23  ;;  %2266 = vmatprep.subr.mxu1 %v1485_v24 }
  0xfa   :  { %2232 = vmatpush3.msra.mxu0 %v1437_v25  ;;  %2267 = vmatpush3.msra.mxu1 %v1469_v26 }
  0xfb   :  { %2233 = vmatprep.subr.mxu0 %v1452_v27  ;;  %2268 = vmatprep.subr.mxu1 %v1484_v29 }
  0xfc   :  { %2234 = vmatpush3.msra.mxu0 %v1436_v30  ;;  %2269 = vmatpush3.msra.mxu1 %v1468_v1 }
  0xfd   :  { %2235 = vmatprep.subr.mxu0 %v1451_v32  ;;  %2270 = vmatprep.subr.mxu1 %v1483_v34 }
  0xfe   :  { %2236 = vmatpush3.msra.mxu0 %v1435_v35  ;;  %2271 = vmatpush3.msra.mxu1 %v1467_v37 }
  0xff   :  { %2237 = vmatprep.subr.mxu0 %v1450_v38  ;;  %2272 = vmatprep.subr.mxu1 %v1482_v40 }
 0x100   :  { %2238 = vmatpush3.msra.mxu0 %v1434_v41  ;;  %2273 = vmatpush3.msra.mxu1 %v1466_v42 }
 0x101   :  { %2239 = vmatprep.subr.mxu0 %v1449_v43  ;;  %2274 = vmatprep.subr.mxu1 %v1481_v47 }
 0x102   :  { %2240 = vmatpush3.msra.mxu0 %v1433_v48  ;;  %2275 = vmatpush3.msra.mxu1 %v1465_v58 }
 0x103   :  { %2241 = vmatprep.subr.mxu0 %v1448_v59  ;;  %2276 = vmatprep.subr.mxu1 %v1480_v60 }
 0x104   :  { %2242 = vmatpush3.msra.mxu0 %v1432_v5  ;;  %2277 = vmatpush3.msra.mxu1 %v1464_v6 }
 0x105   :  { %2243 = vmatprep.subr.mxu0 %v1447_v8  ;;  %2278 = vmatprep.subr.mxu1 %v1479_v9 }
 0x106   :  { %2244 = vmatpush3.msra.mxu0 %v1431_v10  ;;  %2279 = vmatpush3.msra.mxu1 %v1463_v11 }
 0x107   :  { %2245 = vmatprep.subr.mxu0 %v1446_v52  ;;  %2280 = vmatprep.subr.mxu1 %v1478_v63 }
 0x108   :  { %2246 = vmatpush3.msra.mxu0 %v1430_v0  ;;  %2281 = vmatpush3.msra.mxu1 %v1462_v61 }
 0x109   :  { %2247 = vmatprep.subr.mxu0 %v1445_v2  ;;  %2282 = vmatprep.subr.mxu1 %v3051_v49  ;;  %v1520_v49 = vrot.slane %v3071_v7, %v1519_v33 }
 0x10a   :  { %2248 = vmatpush3.msra.mxu0 %v3062_v3  ;;  %2283 = vmatpush3.msra.mxu1 %v3067_v4 }
 0x10b   :  { %2249 = vmatprep.subr.mxu0 %v3085_v12  ;;  %2284 = vmatprep.subr.mxu1 %v3090_v13 }
 0x10c   :  { %2250 = vmatpush3.msra.mxu0 %v3111_v50  ;;  %2285 = vmatpush3.msra.mxu1 %v3116_v51 }
 0x10d   :  { %2251 = vmatprep.subr.mxu0 %v3131_v55  ;;  %2286 = vmatprep.subr.mxu1 %v3138_v19 }
 0x10e   :  { %2252 = vmatpush3.msra.mxu0 %v3151_v57  ;;  %1737 = vmatprep.mubr.f32.mxu0 %v1516_v36 }
 0x10f   :  { %2287 = vmatpush3.msra.mxu1 %v3156_v62  ;;  %1807 = vmatprep.mubr.f32.mxu1 %v1524_v14  ;;  %v698_v14 = vld [vmem:[%s4091_s4] sm:$0xff] }
 0x110   :  { %1738 = vmatmul.mubr.f32.vlgmr.msra.gmra.mxu0 %v1512_v28  ;;  %1808 = vmatmul.mubr.f32.vlgmr.msra.gmra.mxu1 %v1520_v49 }
 0x12f   :  { %v1863_v3 = vpop.f32.mrf.mxu0  ;;  %v3788_v4 = vpop.f32.mrf.mxu1 }
 0x131   :  { %v1864_v12 = vpop.f32.mrf.mxu0  ;;  %v3790_v13 = vpop.f32.mrf.mxu1 }
 0x132   :  { %v1865_v36 = vadd.f32 %v1864_v12, %v1863_v3  ;;  %v1945_v12 = vadd.f32 %v3790_v13, %v3788_v4 }
 0x133   :  { %v1866_v50 = vpop.f32.mrf.mxu0  ;;  %v3792_v7 = vpop.f32.mrf.mxu1 }
 0x135   :  { %v1867_v51 = vpop.f32.mrf.mxu0  ;;  %v3794_v55 = vpop.f32.mrf.mxu1 }
 0x137   :  { %v3796_v19 = vpop.f32.mrf.mxu0  ;;  %v3798_v57 = vpop.f32.mrf.mxu1 }
 0x139   :  { %v3800_v62 = vpop.f32.mrf.mxu0  ;;  %v3802_v15 = vpop.f32.mrf.mxu1 }
 0x13b   :  { %v3804_v31 = vpop.f32.mrf.mxu0  ;;  %v3806_v39 = vpop.f32.mrf.mxu1 }
 0x13d   :  { %v3808_v44 = vpop.f32.mrf.mxu0  ;;  %v3810_v46 = vpop.f32.mrf.mxu1 }
 0x13f   :  { %v3812_v53 = vpop.f32.mrf.mxu0  ;;  %v3814_v54 = vpop.f32.mrf.mxu1 }
 0x141   :  { %v3816_v56 = vpop.f32.mrf.mxu0  ;;  %v3818_v18 = vpop.f32.mrf.mxu1 }
 0x143   :  { %v3820_v20 = vpop.f32.mrf.mxu0  ;;  %v3822_v21 = vpop.f32.mrf.mxu1 }
 0x145   :  { %v3824_v22 = vpop.f32.mrf.mxu0  ;;  %v3826_v23 = vpop.f32.mrf.mxu1 }
 0x147   :  { %v3828_v24 = vpop.f32.mrf.mxu0  ;;  %v3830_v25 = vpop.f32.mrf.mxu1 }
 0x149   :  { %v3832_v26 = vpop.f32.mrf.mxu0  ;;  %v3834_v27 = vpop.f32.mrf.mxu1 }
 0x14b   :  { %v3836_v29 = vpop.f32.mrf.mxu0  ;;  %v3838_v30 = vpop.f32.mrf.mxu1 }
 0x14d   :  { %v3840_v1 = vpop.f32.mrf.mxu0  ;;  %v3842_v32 = vpop.f32.mrf.mxu1 }
 0x14f   :  { %v3844_v34 = vpop.f32.mrf.mxu0  ;;  %v3846_v35 = vpop.f32.mrf.mxu1 }
 0x151   :  { %v3848_v37 = vpop.f32.mrf.mxu0  ;;  %v3850_v38 = vpop.f32.mrf.mxu1 }
 0x153   :  { %v3852_v40 = vpop.f32.mrf.mxu0  ;;  %v3854_v41 = vpop.f32.mrf.mxu1 }
 0x155   :  { %v3856_v42 = vpop.f32.mrf.mxu0  ;;  %v3858_v43 = vpop.f32.mrf.mxu1 }
 0x157   :  { %v3860_v47 = vpop.f32.mrf.mxu0  ;;  %v3862_v48 = vpop.f32.mrf.mxu1 }
 0x159   :  { %v3864_v58 = vpop.f32.mrf.mxu0  ;;  %v3866_v59 = vpop.f32.mrf.mxu1 }
 0x15b   :  { %v3868_v60 = vpop.f32.mrf.mxu0  ;;  %v3870_v5 = vpop.f32.mrf.mxu1 }
 0x15d   :  { %v3872_v6 = vpop.f32.mrf.mxu0  ;;  %v3874_v8 = vpop.f32.mrf.mxu1 }
 0x15f   :  { %v3876_v9 = vpop.f32.mrf.mxu0  ;;  %v3878_v10 = vpop.f32.mrf.mxu1 }
 0x160   :  { %4095 = vst [vmem:[#allocation3_spill] sm:$0xff] %v3878_v10 }
 0x161   :  { %v3880_v11 = vpop.f32.mrf.mxu0  ;;  %v3882_v52 = vpop.f32.mrf.mxu1 }
 0x162   :  { %4096 = vst [vmem:[#allocation4_spill] sm:$0xff] %v3882_v52 }
 0x163   :  { %v3884_v63 = vpop.f32.mrf.mxu0  ;;  %v3886_v0 = vpop.f32.mrf.mxu1 }
 0x164   :  { %4097 = vst [vmem:[#allocation5_spill] sm:$0xff] %v3884_v63  ;;  %4098 = vst [vmem:[#allocation6_spill] sm:$0xff] %v3886_v0  ;;  %v1868_v0 = vadd.f32 %v1867_v51, %v1866_v50  ;;  %v1871_v50 = vadd.f32 %v3800_v62, %v3796_v19  ;;  %v1874_v19 = vadd.f32 %v3808_v44, %v3804_v31 }
 0x165   :  { %v3888_v61 = vpop.f32.mrf.mxu0  ;;  %v3890_v2 = vpop.f32.mrf.mxu1  ;;  %v1877_v31 = vadd.f32 %v3816_v56, %v3812_v53 }
 0x166   :  { %4099 = vst [vmem:[#allocation7_spill] sm:$0xff] %v3888_v61  ;;  %4100 = vst [vmem:[#allocation8_spill] sm:$0xff] %v3890_v2 }
 0x167   :  { %v3892_v45 = vpop.f32.mrf.mxu0  ;;  %v3894_v16 = vpop.f32.mrf.mxu1 }
 0x168   :  { %4101 = vst [vmem:[#allocation9_spill] sm:$0xff] %v3892_v45  ;;  %4102 = vst [vmem:[#allocation10_spill] sm:$0xff] %v3894_v16  ;;  %v781_v45 = vadd.f32 %v1865_v36, %v698_v14  ;;  %v699_v16 = vld [vmem:[%s4091_s4 + $0x8] sm:$0xff]  ;;  %v1948_v36 = vadd.f32 %v3794_v55, %v3792_v7  ;;  %v700_v14 = vld [vmem:[%s4091_s4 + $0x10] sm:$0xff] }
 0x169   :  { %v3896_v17 = vpop.f32.mrf.mxu0  ;;  %v3898_v33 = vpop.f32.mrf.mxu1  ;;  %v701_v7 = vld [vmem:[%s4091_s4 + $0x18] sm:$0xff] }
 0x16a   :  { %4103 = vst [vmem:[#allocation11_spill] sm:$0xff] %v3896_v17  ;;  %4104 = vst [vmem:[#allocation12_spill] sm:$0xff] %v3898_v33  ;;  %v786_v17 = vadd.f32 %v1868_v0, %v699_v16  ;;  %v926_v61 = vadd.f32 %v1945_v12, %v781_v45  ;;  %v791_v45 = vadd.f32 %v1871_v50, %v700_v14 }
 0x16b   :  { %v3903_v28 = vpop.f32.mrf.mxu0  ;;  %v3905_v49 = vpop.f32.mrf.mxu1  ;;  %v1954_v50 = vadd.f32 %v3810_v46, %v3806_v39  ;;  %v703_v39 = vld [vmem:[%s4091_s4 + $0x28] sm:$0xff] }
 0x16c   :  { %4105 = vst [vmem:[#allocation13_spill] sm:$0xff] %v3903_v28  ;;  %4106 = vst [vmem:[#allocation14_spill] sm:$0xff] %v3905_v49  ;;  %v931_v4 = vadd.f32 %v1948_v36, %v786_v17 }
 0x16d   :  { %v3907_v52 = vpop.f32.mrf.mxu0  ;;  %v3909_v2 = vpop.f32.mrf.mxu1 }
 0x16e   :  { %4107 = vst [vmem:[#allocation15_spill] sm:$0xff] %v3907_v52  ;;  %4108 = vst [vmem:[#allocation16_spill] sm:$0xff] %v3909_v2 }
 0x16f   :  { %v2023_v33 = vpop.f32.mrf.mxu0  ;;  %v2103_v3 = vpop.f32.mrf.mxu1 }
 0x171   :  { %v2024_v10 = vpop.f32.mrf.mxu0  ;;  %v2104_v28 = vpop.f32.mrf.mxu1 }
 0x172   :  { %v2025_v51 = vadd.f32 %v2024_v10, %v2023_v33  ;;  %v2105_v63 = vadd.f32 %v2104_v28, %v2103_v3  ;;  %v702_v28 = vld [vmem:[%s4091_s4 + $0x20] sm:$0xff] }
 0x173   :  { %v2026_v2 = vpop.f32.mrf.mxu0  ;;  %v2106_v49 = vpop.f32.mrf.mxu1 }
 0x174   :  { %v1071_v52 = vadd.f32 %v2025_v51, %v926_v61  ;;  %v1951_v61 = vadd.f32 %v3802_v15, %v3798_v57 }
 0x175   :  { %v2027_v13 = vpop.f32.mrf.mxu0  ;;  %v2107_v0 = vpop.f32.mrf.mxu1 }
 0x176   :  { %v1216_v62 = vadd.f32 %v2105_v63, %v1071_v52  ;;  %v2028_v10 = vadd.f32 %v2027_v13, %v2026_v2  ;;  %v2108_v33 = vadd.f32 %v2107_v0, %v2106_v49  ;;  %v936_v63 = vadd.f32 %v1951_v61, %v791_v45  ;;  %v704_v61 = vld [vmem:[%s4091_s4 + $0x30] sm:$0xff] }
 0x177   :  { %v2029_v55 = vpop.f32.mrf.mxu0  ;;  %v2109_v16 = vpop.f32.mrf.mxu1  ;;  %v796_v2 = vadd.f32 %v1874_v19, %v701_v7  ;;  %v801_v49 = vadd.f32 %v1877_v31, %v702_v28  ;;  %v1957_v45 = vadd.f32 %v3818_v18, %v3814_v54  ;;  %v1883_v54 = vadd.f32 %v3832_v26, %v3828_v24 }
 0x178   :  { %1295 = vst.msk [vmem:[%s4092_s7] sm:$0xff] %vm1294_vm0, %v1216_v62  ;;  %v1076_v17 = vadd.f32 %v2028_v10, %v931_v4  ;;  %v1880_v4 = vadd.f32 %v3824_v22, %v3820_v20  ;;  %v1960_v31 = vadd.f32 %v3826_v23, %v3822_v21  ;;  %v1886_v24 = vadd.f32 %v3840_v1, %v3836_v29 }
 0x179   :  { %v2030_v44 = vpop.f32.mrf.mxu0  ;;  %v2110_v52 = vpop.f32.mrf.mxu1  ;;  %v941_v14 = vadd.f32 %v1954_v50, %v796_v2  ;;  %v946_v7 = vadd.f32 %v1957_v45, %v801_v49  ;;  %v811_v28 = vadd.f32 %v1883_v54, %v704_v61  ;;  %v708_v61 = vld [vmem:[%s4091_s4 + $0x50] sm:$0xff] }
 0x17a   :  { %v1221_v3 = vadd.f32 %v2108_v33, %v1076_v17  ;;  %v2031_v57 = vadd.f32 %v2030_v44, %v2029_v55  ;;  %v2111_v56 = vadd.f32 %v2110_v52, %v2109_v16  ;;  %v806_v55 = vadd.f32 %v1880_v4, %v703_v39 }
 0x17b   :  { %v2032_v15 = vpop.f32.mrf.mxu0  ;;  %v2112_v12 = vpop.f32.mrf.mxu1  ;;  %v1966_v4 = vadd.f32 %v3842_v32, %v3838_v30  ;;  %v1892_v30 = vadd.f32 %v3856_v42, %v3852_v40  ;;  %v1895_v40 = vadd.f32 %v3864_v58, %v3860_v47 }
 0x17c   :  { %1296 = vst.msk [vmem:[%s4092_s7 + $0x8] sm:$0xff] %vm1294_vm0, %v1221_v3  ;;  %v1081_v53 = vadd.f32 %v2031_v57, %v936_v63  ;;  %v951_v2 = vadd.f32 %v1960_v31, %v806_v55  ;;  %v705_v3 = vld [vmem:[%s4091_s4 + $0x38] sm:$0xff]  ;;  %v1972_v31 = vadd.f32 %v3858_v43, %v3854_v41 }
 0x17d   :  { %v2033_v51 = vpop.f32.mrf.mxu0  ;;  %v2113_v36 = vpop.f32.mrf.mxu1  ;;  %v816_v50 = vadd.f32 %v1886_v24, %v705_v3  ;;  %v1975_v3 = vadd.f32 %v3866_v59, %v3862_v48  ;;  %v709_v41 = vld [vmem:[%s4091_s4 + $0x58] sm:$0xff]  ;;  %v1901_v48 = vadd.f32 %v3880_v11, %v3876_v9  ;;  %v4110_v9 = vld [vmem:[#allocation7_spill] sm:$0xff] }
 0x17e   :  { %v1226_v13 = vadd.f32 %v2111_v56, %v1081_v53  ;;  %v2034_v0 = vadd.f32 %v2033_v51, %v2032_v15  ;;  %v2114_v10 = vadd.f32 %v2113_v36, %v2112_v12  ;;  %v1963_v12 = vadd.f32 %v3834_v27, %v3830_v25  ;;  %v706_v25 = vld [vmem:[%s4091_s4 + $0x40] sm:$0xff] }
 0x17f   :  { %v2035_v46 = vpop.f32.mrf.mxu0  ;;  %v2115_v19 = vpop.f32.mrf.mxu1  ;;  %v1889_v51 = vadd.f32 %v3848_v37, %v3844_v34  ;;  %v961_v39 = vadd.f32 %v1966_v4, %v816_v50 }
 0x180   :  { %1297 = vst.msk [vmem:[%s4092_s7 + $0x10] sm:$0xff] %vm1294_vm0, %v1226_v13  ;;  %v1086_v62 = vadd.f32 %v2034_v0, %v941_v14  ;;  %v956_v49 = vadd.f32 %v1963_v12, %v811_v28 }
 0x181   :  { %v2036_v20 = vpop.f32.mrf.mxu0  ;;  %v2116_v22 = vpop.f32.mrf.mxu1 }
 0x182   :  { %v1231_v18 = vadd.f32 %v2114_v10, %v1086_v62  ;;  %v2037_v16 = vadd.f32 %v2036_v20, %v2035_v46  ;;  %v2117_v52 = vadd.f32 %v2116_v22, %v2115_v19  ;;  %v821_v46 = vadd.f32 %v1889_v51, %v706_v25  ;;  %v707_v62 = vld [vmem:[%s4091_s4 + $0x48] sm:$0xff] }
 0x183   :  { %v2038_v17 = vpop.f32.mrf.mxu0  ;;  %v2118_v33 = vpop.f32.mrf.mxu1  ;;  %v1969_v20 = vadd.f32 %v3850_v38, %v3846_v35 }
 0x184   :  { %1298 = vst.msk [vmem:[%s4092_s7 + $0x18] sm:$0xff] %vm1294_vm0, %v1231_v18  ;;  %v1091_v44 = vadd.f32 %v2037_v16, %v946_v7  ;;  %v826_v16 = vadd.f32 %v1892_v30, %v707_v62 }
 0x185   :  { %v2039_v26 = vpop.f32.mrf.mxu0  ;;  %v2119_v63 = vpop.f32.mrf.mxu1  ;;  %v966_v18 = vadd.f32 %v1969_v20, %v821_v46  ;;  %v4114_v20 = vld [vmem:[#allocation11_spill] sm:$0xff] }
 0x186   :  { %v1236_v57 = vadd.f32 %v2117_v52, %v1091_v44  ;;  %v2040_v21 = vadd.f32 %v2039_v26, %v2038_v17  ;;  %v2120_v1 = vadd.f32 %v2119_v63, %v2118_v33  ;;  %v831_v44 = vadd.f32 %v1895_v40, %v708_v61 }
 0x187   :  { %v2041_v23 = vpop.f32.mrf.mxu0  ;;  %v2121_v15 = vpop.f32.mrf.mxu1  ;;  %v971_v26 = vadd.f32 %v1972_v31, %v826_v16  ;;  %v1898_v63 = vadd.f32 %v3872_v6, %v3868_v60  ;;  %v712_v16 = vld [vmem:[%s4091_s4 + $0x70] sm:$0xff] }
 0x188   :  { %1299 = vst.msk [vmem:[%s4092_s7 + $0x20] sm:$0xff] %vm1294_vm0, %v1236_v57  ;;  %v1096_v29 = vadd.f32 %v2040_v21, %v951_v2 }
 0x189   :  { %v2042_v53 = vpop.f32.mrf.mxu0  ;;  %v2122_v56 = vpop.f32.mrf.mxu1  ;;  %v836_v12 = vadd.f32 %v1898_v63, %v709_v41  ;;  %v4119_v41 = vld [vmem:[#allocation10_spill] sm:$0xff] }
 0x18a   :  { %v1241_v36 = vadd.f32 %v2120_v1, %v1096_v29  ;;  %v2043_v14 = vadd.f32 %v2042_v53, %v2041_v23  ;;  %v2123_v45 = vadd.f32 %v2122_v56, %v2121_v15  ;;  %v976_v15 = vadd.f32 %v1975_v3, %v831_v44  ;;  %v710_v1 = vld [vmem:[%s4091_s4 + $0x60] sm:$0xff]  ;;  %v4117_v44 = vld [vmem:[#allocation13_spill] sm:$0xff] }
 0x18b   :  { %v2044_v27 = vpop.f32.mrf.mxu0  ;;  %v2124_v13 = vpop.f32.mrf.mxu1  ;;  %v1978_v56 = vadd.f32 %v3874_v8, %v3870_v5 }
 0x18c   :  { %1300 = vst.msk [vmem:[%s4092_s7 + $0x28] sm:$0xff] %vm1294_vm0, %v1241_v36  ;;  %v1101_v0 = vadd.f32 %v2043_v14, %v956_v49  ;;  %v4109_v36 = vld [vmem:[#allocation5_spill] sm:$0xff] }
 0x18d   :  { %v2045_v34 = vpop.f32.mrf.mxu0  ;;  %v2125_v37 = vpop.f32.mrf.mxu1  ;;  %v1904_v11 = vadd.f32 %v4110_v9, %v4109_v36  ;;  %v981_v25 = vadd.f32 %v1978_v56, %v836_v12 }
 0x18e   :  { %v1246_v32 = vadd.f32 %v2123_v45, %v1101_v0  ;;  %v2046_v19 = vadd.f32 %v2045_v34, %v2044_v27  ;;  %v2126_v55 = vadd.f32 %v2125_v37, %v2124_v13  ;;  %v841_v27 = vadd.f32 %v1901_v48, %v710_v1  ;;  %v711_v13 = vld [vmem:[%s4091_s4 + $0x68] sm:$0xff] }
 0x18f   :  { %v2047_v10 = vpop.f32.mrf.mxu0  ;;  %v2127_v7 = vpop.f32.mrf.mxu1  ;;  %v4112_v34 = vld [vmem:[#allocation4_spill] sm:$0xff] }
 0x190   :  { %1301 = vst.msk [vmem:[%s4092_s7 + $0x30] sm:$0xff] %vm1294_vm0, %v1246_v32  ;;  %v1106_v22 = vadd.f32 %v2046_v19, %v961_v39  ;;  %v4111_v39 = vld [vmem:[#allocation3_spill] sm:$0xff]  ;;  %v846_v32 = vadd.f32 %v1904_v11, %v711_v13 }
 0x191   :  { %v2048_v42 = vpop.f32.mrf.mxu0  ;;  %v2128_v54 = vpop.f32.mrf.mxu1  ;;  %v1981_v37 = vadd.f32 %v4112_v34, %v4111_v39  ;;  %v1491_v39 = vld [vmem:[%s4093_s5] sm:$0x1] }
 0x192   :  { %v1251_v17 = vadd.f32 %v2126_v55, %v1106_v22  ;;  %v2049_v35 = vadd.f32 %v2048_v42, %v2047_v10  ;;  %v2129_v58 = vadd.f32 %v2128_v54, %v2127_v7  ;;  %v4113_v7 = vld [vmem:[#allocation9_spill] sm:$0xff]  ;;  %v4115_v42 = vld [vmem:[#allocation6_spill] sm:$0xff]  ;;  %v4116_v54 = vld [vmem:[#allocation8_spill] sm:$0xff] }
 0x193   :  { %v2050_v38 = vpop.f32.mrf.mxu0  ;;  %v2130_v33 = vpop.f32.mrf.mxu1  ;;  %v986_v10 = vadd.f32 %v1981_v37, %v841_v27  ;;  %v1907_v22 = vadd.f32 %v4114_v20, %v4113_v7 }
 0x194   :  { %1302 = vst.msk [vmem:[%s4092_s7 + $0x38] sm:$0xff] %vm1294_vm0, %v1251_v17  ;;  %v1111_v47 = vadd.f32 %v2049_v35, %v966_v18  ;;  %v1984_v18 = vadd.f32 %v4116_v54, %v4115_v42 }
 0x195   :  { %v2051_v52 = vpop.f32.mrf.mxu0  ;;  %v2131_v24 = vpop.f32.mrf.mxu1 }
 0x196   :  { %v1256_v2 = vadd.f32 %v2129_v58, %v1111_v47  ;;  %v2052_v28 = vadd.f32 %v2051_v52, %v2050_v38  ;;  %v2132_v23 = vadd.f32 %v2131_v24, %v2130_v33  ;;  %v991_v33 = vadd.f32 %v1984_v18, %v846_v32  ;;  %v4118_v52 = vld [vmem:[#allocation15_spill] sm:$0xff] }
 0x197   :  { %v2053_v43 = vpop.f32.mrf.mxu0  ;;  %v2133_v57 = vpop.f32.mrf.mxu1  ;;  %v851_v58 = vadd.f32 %v1907_v22, %v712_v16  ;;  %v1910_v24 = vadd.f32 %v4118_v52, %v4117_v44 }
 0x198   :  { %1303 = vst.msk [vmem:[%s4092_s7 + $0x40] sm:$0xff] %vm1294_vm0, %v1256_v2  ;;  %v1116_v21 = vadd.f32 %v2052_v28, %v971_v26  ;;  %v713_v2 = vld [vmem:[%s4091_s4 + $0x78] sm:$0xff] }
 0x199   :  { %v2054_v60 = vpop.f32.mrf.mxu0  ;;  %v2134_v6 = vpop.f32.mrf.mxu1  ;;  %v856_v12 = vadd.f32 %v1910_v24, %v713_v2 }
 0x19a   :  { %v1261_v59 = vadd.f32 %v2132_v23, %v1116_v21  ;;  %v2055_v29 = vadd.f32 %v2054_v60, %v2053_v43  ;;  %v2135_v51 = vadd.f32 %v2134_v6, %v2133_v57  ;;  %v4120_v43 = vld [vmem:[#allocation12_spill] sm:$0xff] }
 0x19b   :  { %v2056_v50 = vpop.f32.mrf.mxu0  ;;  %v2136_v53 = vpop.f32.mrf.mxu1  ;;  %v1987_v57 = vadd.f32 %v4120_v43, %v4119_v41 }
 0x19c   :  { %1304 = vst.msk [vmem:[%s4092_s7 + $0x48] sm:$0xff] %vm1294_vm0, %v1261_v59  ;;  %v1121_v49 = vadd.f32 %v2055_v29, %v976_v15 }
 0x19d   :  { %v2057_v14 = vpop.f32.mrf.mxu0  ;;  %v2137_v4 = vpop.f32.mrf.mxu1  ;;  %v996_v6 = vadd.f32 %v1987_v57, %v851_v58 }
 0x19e   :  { %v1266_v0 = vadd.f32 %v2135_v51, %v1121_v49  ;;  %v2058_v5 = vadd.f32 %v2057_v14, %v2056_v50  ;;  %v2138_v30 = vadd.f32 %v2137_v4, %v2136_v53  ;;  %v4121_v50 = vld [vmem:[#allocation14_spill] sm:$0xff]  ;;  %v4122_v53 = vld [vmem:[#allocation16_spill] sm:$0xff] }
 0x19f   :  { %v2059_v8 = vpop.f32.mrf.mxu0  ;;  %v2139_v45 = vpop.f32.mrf.mxu1  ;;  %v1990_v56 = vadd.f32 %v4122_v53, %v4121_v50 }
 0x1a0   :  { %1305 = vst.msk [vmem:[%s4092_s7 + $0x50] sm:$0xff] %vm1294_vm0, %v1266_v0  ;;  %v1126_v46 = vadd.f32 %v2058_v5, %v981_v25 }
 0x1a1   :  { %v2060_v19 = vpop.f32.mrf.mxu0  ;;  %v2140_v62 = vpop.f32.mrf.mxu1  ;;  %v1001_v11 = vadd.f32 %v1990_v56, %v856_v12 }
 0x1a2   :  { %v1271_v55 = vadd.f32 %v2138_v30, %v1126_v46  ;;  %v2061_v40 = vadd.f32 %v2060_v19, %v2059_v8  ;;  %v2141_v38 = vadd.f32 %v2140_v62, %v2139_v45 }
 0x1a3   :  { %v2062_v61 = vpop.f32.mrf.mxu0  ;;  %v2142_v17 = vpop.f32.mrf.mxu1 }
 0x1a4   :  { %1306 = vst.msk [vmem:[%s4092_s7 + $0x58] sm:$0xff] %vm1294_vm0, %v1271_v55  ;;  %v1131_v35 = vadd.f32 %v2061_v40, %v986_v10 }
 0x1a5   :  { %v2063_v31 = vpop.f32.mrf.mxu0  ;;  %v2143_v47 = vpop.f32.mrf.mxu1 }
 0x1a6   :  { %v1276_v26 = vadd.f32 %v2141_v38, %v1131_v35  ;;  %v2064_v63 = vadd.f32 %v2063_v31, %v2062_v61  ;;  %v2144_v23 = vadd.f32 %v2143_v47, %v2142_v17 }
 0x1a7   :  { %v2065_v28 = vpop.f32.mrf.mxu0  ;;  %v2145_v3 = vpop.f32.mrf.mxu1 }
 0x1a8   :  { %1307 = vst.msk [vmem:[%s4092_s7 + $0x60] sm:$0xff] %vm1294_vm0, %v1276_v26  ;;  %v1136_v21 = vadd.f32 %v2064_v63, %v991_v33 }
 0x1a9   :  { %v2066_v15 = vpop.f32.mrf.mxu0  ;;  %v2146_v60 = vpop.f32.mrf.mxu1 }
 0x1aa   :  { %v1281_v48 = vadd.f32 %v2144_v23, %v1136_v21  ;;  %v2067_v59 = vadd.f32 %v2066_v15, %v2065_v28  ;;  %v2147_v51 = vadd.f32 %v2146_v60, %v2145_v3 }
 0x1ab   :  { %v2068_v29 = vpop.f32.mrf.mxu0  ;;  %v2148_v1 = vpop.f32.mrf.mxu1 }
 0x1ac   :  { %1308 = vst.msk [vmem:[%s4092_s7 + $0x68] sm:$0xff] %vm1294_vm0, %v1281_v48  ;;  %v1141_v49 = vadd.f32 %v2067_v59, %v996_v6 }
 0x1ad   :  { %v2069_v36 = vpop.f32.mrf.mxu0  ;;  %v2149_v9 = vpop.f32.mrf.mxu1 }
 0x1ae   :  { %v1286_v14 = vadd.f32 %v2147_v51, %v1141_v49  ;;  %v2070_v4 = vadd.f32 %v2069_v36, %v2068_v29  ;;  %v2150_v27 = vadd.f32 %v2149_v9, %v2148_v1 }
 0x1af   :  { %v2183_v0 = vpop.f32.mrf.mxu0  ;;  %v2218_v8 = vpop.f32.mrf.mxu1 }
 0x1b0   :  { %1309 = vst.msk [vmem:[%s4092_s7 + $0x70] sm:$0xff] %vm1294_vm0, %v1286_v14  ;;  %v1146_v25 = vadd.f32 %v2070_v4, %v1001_v11 }
 0x1b1   :  { %v2184_v5 = vpop.f32.mrf.mxu0  ;;  %v2219_v34 = vpop.f32.mrf.mxu1 }
 0x1b2   :  { %v1291_v13 = vadd.f32 %v2150_v27, %v1146_v25  ;;  %v2185_v45 = vadd.f32 %v2184_v5, %v2183_v0  ;;  %v2220_v32 = vadd.f32 %v2219_v34, %v2218_v8 }
 0x1b4   :  { %1310 = vst.msk [vmem:[%s4092_s7 + $0x78] sm:$0xff] %vm1294_vm0, %v1291_v13  ;;  %v1600_v37 = vadd.f32 %v2185_v45, %v1491_v39 }
 0x1b6   :  { %v1670_v10 = vadd.f32 %v2220_v32, %v1600_v37 }
 0x1d0   :  { %v2253_v46 = vpop.f32.mrf.mxu0  ;;  %v2288_v30 = vpop.f32.mrf.mxu1 }
 0x1d2   :  { %v2254_v19 = vpop.f32.mrf.mxu0  ;;  %v2289_v62 = vpop.f32.mrf.mxu1 }
 0x1d3   :  { %v2255_v7 = vadd.f32 %v2254_v19, %v2253_v46  ;;  %v2290_v22 = vadd.f32 %v2289_v62, %v2288_v30 }
 0x1d5   :  { %v1740_v20 = vadd.f32 %v2255_v7, %v1670_v10 }
 0x1d7   :  { %v1810_v55 = vadd.f32 %v2290_v22, %v1740_v20 }
 0x1d9   :  { %1814 = vst.msk [vmem:[%s4094_s8] sm:$0x1] %vm1813_vm1, %v1810_v55 }

</bundles_post_ra>
